<compile_context>
chip_gen: v6e
topology: v6e:2x2x1
jax: 0.10.0
libtpu: 0.0.40
codegen_flags: <defaults>
</compile_context>

<pallas_src>
import jax
import jax.numpy as jnp
from jax.experimental import pallas as pl
from jax.experimental.pallas import tpu as pltpu

EPS = 1e-5
LANE = 128


def _round_up(v, m):
    return (v + m - 1) // m * m


def basic_block_pallas(x_nchw, w1, g1, b1, w2, g2, b2, matmul_dtype=jnp.bfloat16):
    """x_nchw: (N, C, H, W) f32.  w1/w2: torch layout (Cout, Cin, 3, 3)."""
    N, C, H, W = x_nchw.shape
    KP = _round_up(C, 8)         # contraction-channel width (NOT padded to 128)
    CPO = _round_up(C, LANE)     # output-channel lane width (lane-dense stores)
    Hp = H + 2
    Wp = _round_up(W + 2, 8)     # second-minor dim kept (8)-aligned
    HW = H * W
    M = N * HW
    inv_m = 1.0 / M
    f32 = jnp.float32

    x_nhwc = jnp.transpose(x_nchw, (0, 2, 3, 1)).astype(f32)
    # MXU operand: haloed + channel-padded, cast to bf16 exactly once here.
    xp = jnp.pad(x_nhwc, ((0, 0), (1, 1), (1, Wp - W - 1), (0, KP - C)))
    xp = xp.astype(matmul_dtype)
    # Residual identity stays f32 (separate from the quantized conv operand).
    idn = jnp.pad(x_nhwc, ((0, 0), (0, 0), (0, 0), (0, CPO - C))).reshape(M, CPO)

    def pack_w(w):
        # torch (Cout, Cin, 3, 3) -> (3, 3, Cin, Cout) -> pad -> (9, KP, CPO)
        wt = jnp.transpose(w, (2, 3, 1, 0)).astype(f32)
        wt = jnp.pad(wt, ((0, 0), (0, 0), (0, KP - C), (0, CPO - C)))
        return wt.reshape(9, KP, CPO).astype(matmul_dtype)

    def pack_p(p):
        return jnp.pad(p.astype(f32), (0, CPO - C)).reshape(1, CPO)

    w1p, w2p = pack_w(w1), pack_w(w2)
    g1p, b1p, g2p, b2p = pack_p(g1), pack_p(b1), pack_p(g2), pack_p(b2)

    taps = [(dy, dx) for dy in range(3) for dx in range(3)]

    def conv3x3_acc(get_tap, w_ref):
        # 9 small-K MXU matmuls accumulated in f32; no im2col slab, no K padding
        # beyond Cin->KP (multiple of 8).
        y = jnp.zeros((HW, CPO), f32)
        for t, (dy, dx) in enumerate(taps):
            y = y + jnp.dot(get_tap(dy, dx), w_ref[t],
                            preferred_element_type=f32)
        return y

    def compiler_params(sem):
        # 48 MiB leaves headroom under v7x's 64 MiB physical VMEM; plenty for
        # the larger tiles that v5e/v6e's 128 MiB would allow.
        return pltpu.CompilerParams(dimension_semantics=sem,
                                    vmem_limit_bytes=48 * 1024 * 1024)

    conv_flops = 2 * M * 9 * KP * CPO

    # ---- pass A: conv1 per sample + partial BN1 statistics ------------------
    def pass_a_kernel(xp_ref, w_ref, y_ref, stats_ref):
        @pl.when(pl.program_id(0) == 0)
        def _():
            stats_ref[...] = jnp.zeros_like(stats_ref)

        def tap(dy, dx):
            return xp_ref[0:1, dy:dy + H, dx:dx + W, :].reshape(HW, KP)

        y = conv3x3_acc(tap, w_ref)
        y_ref[...] = y.reshape(1, HW, CPO)
        # E[x] / E[x^2] numerators, accumulated across the (reduction) grid axis.
        stats_ref[0:1, :] += jnp.sum(y, axis=0, keepdims=True)
        stats_ref[1:2, :] += jnp.sum(y * y, axis=0, keepdims=True)

    grid_a = pltpu.PrefetchScalarGridSpec(
        num_scalar_prefetch=0, grid=(N,),
        in_specs=[pl.BlockSpec((1, Hp, Wp, KP), lambda n: (n, 0, 0, 0)),
                  pl.BlockSpec((9, KP, CPO), lambda n: (0, 0, 0))],
        out_specs=[pl.BlockSpec((1, HW, CPO), lambda n: (n, 0, 0)),
                   pl.BlockSpec((2, CPO), lambda n: (0, 0))])

    y1, stats1 = pl.pallas_call(
        pass_a_kernel,
        grid_spec=grid_a,
        out_shape=[jax.ShapeDtypeStruct((N, HW, CPO), f32),
                   jax.ShapeDtypeStruct((2, CPO), f32)],
        compiler_params=compiler_params(("arbitrary",)),
        cost_estimate=pl.CostEstimate(
            flops=conv_flops, transcendentals=0,
            bytes_accessed=N * Hp * Wp * KP * 2 + M * CPO * 4),
    )(xp, w1p)

    # ---- pass B: bn1 + relu + conv2 per sample + partial BN2 statistics -----
    def pass_b_kernel(y1_ref, s1_ref, g_ref, b_ref, w_ref, y2_ref, s2_ref,
                      mid_ref):
        @pl.when(pl.program_id(0) == 0)
        def _():
            s2_ref[...] = jnp.zeros_like(s2_ref)

        mean = s1_ref[0:1, :] * inv_m
        var = s1_ref[1:2, :] * inv_m - mean * mean   # biased var (matches ref)
        a = (y1_ref[...].reshape(HW, CPO) - mean) * jax.lax.rsqrt(var + EPS) \
            * g_ref[...] + b_ref[...]
        a = jnp.maximum(a, 0.0)

        # Stage relu(bn1) with a 1-px zero halo: bf16, only KP channels.  One
        # dense full-slab zero (no narrow masked column stores); re-zeroed every
        # step because the scratch persists across grid iterations.
        mid_ref[...] = jnp.zeros(mid_ref.shape, mid_ref.dtype)
        mid_ref[1:H + 1, 1:W + 1, :] = (
            a[:, :KP].astype(mid_ref.dtype).reshape(H, W, KP))

        def tap(dy, dx):
            return mid_ref[dy:dy + H, dx:dx + W, :].reshape(HW, KP)

        y = conv3x3_acc(tap, w_ref)
        y2_ref[...] = y.reshape(1, HW, CPO)
        s2_ref[0:1, :] += jnp.sum(y, axis=0, keepdims=True)
        s2_ref[1:2, :] += jnp.sum(y * y, axis=0, keepdims=True)

    grid_b = pltpu.PrefetchScalarGridSpec(
        num_scalar_prefetch=0, grid=(N,),
        in_specs=[pl.BlockSpec((1, HW, CPO), lambda n: (n, 0, 0)),
                  pl.BlockSpec((2, CPO), lambda n: (0, 0)),
                  pl.BlockSpec((1, CPO), lambda n: (0, 0)),
                  pl.BlockSpec((1, CPO), lambda n: (0, 0)),
                  pl.BlockSpec((9, KP, CPO), lambda n: (0, 0, 0))],
        out_specs=[pl.BlockSpec((1, HW, CPO), lambda n: (n, 0, 0)),
                   pl.BlockSpec((2, CPO), lambda n: (0, 0))],
        scratch_shapes=[pltpu.VMEM((Hp, Wp, KP), matmul_dtype)])

    y2, stats2 = pl.pallas_call(
        pass_b_kernel,
        grid_spec=grid_b,
        out_shape=[jax.ShapeDtypeStruct((N, HW, CPO), f32),
                   jax.ShapeDtypeStruct((2, CPO), f32)],
        compiler_params=compiler_params(("arbitrary",)),
        cost_estimate=pl.CostEstimate(
            flops=conv_flops, transcendentals=N * CPO,
            bytes_accessed=2 * M * CPO * 4),
    )(y1, stats1, g1p, b1p, w2p)

    # ---- pass C: bn2 + residual add + relu over flat (M, CPO) tiles ---------
    TM = M
    for cand in (256, 128, 64, 32, 16, 8):
        if M % cand == 0:
            TM = cand
            break

    def pass_c_kernel(y2_ref, idn_ref, s2_ref, g_ref, b_ref, o_ref):
        mean = s2_ref[0:1, :] * inv_m
        var = s2_ref[1:2, :] * inv_m - mean * mean
        z = (y2_ref[...] - mean) * jax.lax.rsqrt(var + EPS) * g_ref[...] \
            + b_ref[...]
        o_ref[...] = jnp.maximum(z + idn_ref[...], 0.0)

    grid_c = pltpu.PrefetchScalarGridSpec(
        num_scalar_prefetch=0, grid=(M // TM,),
        in_specs=[pl.BlockSpec((TM, CPO), lambda i: (i, 0)),
                  pl.BlockSpec((TM, CPO), lambda i: (i, 0)),
                  pl.BlockSpec((2, CPO), lambda i: (0, 0)),
                  pl.BlockSpec((1, CPO), lambda i: (0, 0)),
                  pl.BlockSpec((1, CPO), lambda i: (0, 0))],
        out_specs=pl.BlockSpec((TM, CPO), lambda i: (i, 0)))

    out_flat = pl.pallas_call(
        pass_c_kernel,
        grid_spec=grid_c,
        out_shape=jax.ShapeDtypeStruct((M, CPO), f32),
        compiler_params=compiler_params(("parallel",)),   # megacore on v7x
        cost_estimate=pl.CostEstimate(flops=8 * M * CPO, transcendentals=CPO,
                                      bytes_accessed=3 * M * CPO * 4),
    )(y2.reshape(M, CPO), idn, stats2, g2p, b2p)

    out = out_flat.reshape(N, H, W, CPO)[:, :, :, :C]
    return jnp.transpose(out, (0, 3, 1, 2))               # back to NCHW


def basic_block_reference(x, w1, g1, b1, w2, g2, b2, matmul_dtype=jnp.bfloat16):
    """Pure-JAX NCHW reference matching PyTorch BasicBlock (train-mode BN).
    Conv operands are rounded through `matmul_dtype` to emulate the kernel's
    bf16 MXU inputs (f32 accumulation), so the comparison stays tight."""
    def q(t):
        return t.astype(matmul_dtype).astype(jnp.float32)

    def conv(y, w):
        return jax.lax.conv_general_dilated(
            q(y), q(w), window_strides=(1, 1), padding=((1, 1), (1, 1)),
            dimension_numbers=('NCHW', 'OIHW', 'NCHW'),
            preferred_element_type=jnp.float32)

    def bn(y, g, b):
        m = jnp.mean(y, axis=(0, 2, 3), keepdims=True)
        v = jnp.mean(y * y, axis=(0, 2, 3), keepdims=True) - m * m
        return (y - m) * jax.lax.rsqrt(v + EPS) * g.reshape(1, -1, 1, 1) \
            + b.reshape(1, -1, 1, 1)

    out = jax.nn.relu(bn(conv(x, w1), g1, b1))
    out = bn(conv(out, w2), g2, b2)
    return jax.nn.relu(out + x)


if __name__ == "__main__":
    # Small shapes: inplanes == planes (downsample=None requires matching C).
    N, C, H, W = 2, 8, 16, 16
    key = jax.random.PRNGKey(0)
    kx, k1, k2, kg1, kb1, kg2, kb2 = jax.random.split(key, 7)

    x = jax.random.normal(kx, (N, C, H, W), jnp.float32)
    w1 = 0.1 * jax.random.normal(k1, (C, C, 3, 3), jnp.float32)   # conv1
    w2 = 0.1 * jax.random.normal(k2, (C, C, 3, 3), jnp.float32)   # conv2
    g1 = 1.0 + 0.1 * jax.random.normal(kg1, (C,), jnp.float32)
    b1 = 0.1 * jax.random.normal(kb1, (C,), jnp.float32)
    g2 = 1.0 + 0.1 * jax.random.normal(kg2, (C,), jnp.float32)
    b2 = 0.1 * jax.random.normal(kb2, (C,), jnp.float32)

    out = jax.block_until_ready(basic_block_pallas(x, w1, g1, b1, w2, g2, b2))
    ref = basic_block_reference(x, w1, g1, b1, w2, g2, b2)

    assert out.shape == (N, C, H, W)
    err = float(jnp.max(jnp.abs(out - ref)))
    # bf16 MXU operands (f32 accumulation) in both kernel and reference; small
    # slack covers accumulation-order / rounding-boundary differences.
    assert err < 5e-3, f"max abs err = {err}"

    print("KERNEL_OK")
</pallas_src>

<mosaic_0001>
module attributes {stable_mosaic.version = 11 : i64} {
  func.func @pass_a_kernel(%arg0: i32, %arg1: memref<1x18x24x8xbf16, #tpu.memory_space<vmem>>, %arg2: memref<9x8x128xbf16, #tpu.memory_space<vmem>>, %arg3: memref<1x256x128xf32, #tpu.memory_space<vmem>>, %arg4: memref<2x128xf32, #tpu.memory_space<vmem>>) attributes {dimension_semantics = [#tpu.dimension_semantics<arbitrary>], iteration_bounds = array<i64: 2>, scalar_prefetch = 0 : i64, scratch_operands = 0 : i64, tpu.core_type = #tpu.core_type<tc>, window_params = [{transform_indices = @transform_0, window_bounds = array<i64: 1, 18, 24, 8>}, {pipeline_mode = #tpu.pipeline_mode<synchronous>, transform_indices = @transform_1, window_bounds = array<i64: 9, 8, 128>}, {transform_indices = @transform_2, window_bounds = array<i64: 1, 256, 128>}, {pipeline_mode = #tpu.pipeline_mode<synchronous>, transform_indices = @transform_3, window_bounds = array<i64: 2, 128>}]} {
    %c0_i32 = arith.constant 0 : i32
    %0 = arith.cmpi eq, %arg0, %c0_i32 : i32
    %1 = arith.extui %0 : i1 to i32
    %c0_i32_0 = arith.constant 0 : i32
    %2 = arith.cmpi ne, %1, %c0_i32_0 : i32
    scf.if %2 {
      %cst_77 = arith.constant 0.000000e+00 : f32
      %71 = vector.broadcast %cst_77 : f32 to vector<2x128xf32>
      %c0_78 = arith.constant 0 : index
      %c0_79 = arith.constant 0 : index
      %72 = vector.load %arg4[%c0_78, %c0_79] : memref<2x128xf32, #tpu.memory_space<vmem>>, vector<2x128xf32>
      tpu.vector_store %arg4[%c0_78, %c0_79], %71 {strides = array<i32>} : memref<2x128xf32, #tpu.memory_space<vmem>>, vector<2x128xf32>,
    } else {
    }
    %cst = arith.constant 0.000000e+00 : f32
    %3 = vector.broadcast %cst : f32 to vector<256x128xf32>
    %c0 = arith.constant 0 : index
    %c0_1 = arith.constant 0 : index
    %c0_2 = arith.constant 0 : index
    %c0_3 = arith.constant 0 : index
    %4 = vector.load %arg1[%c0, %c0_1, %c0_2, %c0_3] : memref<1x18x24x8xbf16, #tpu.memory_space<vmem>>, vector<1x16x16x8xbf16>
    %5 = vector.shape_cast %4 : vector<1x16x16x8xbf16> to vector<256x8xbf16>
    %c0_4 = arith.constant 0 : index
    %c0_5 = arith.constant 0 : index
    %c0_6 = arith.constant 0 : index
    %6 = vector.load %arg2[%c0_4, %c0_5, %c0_6] : memref<9x8x128xbf16, #tpu.memory_space<vmem>>, vector<1x8x128xbf16>
    %7 = vector.shape_cast %6 : vector<1x8x128xbf16> to vector<8x128xbf16>
    %cst_7 = arith.constant dense<0.000000e+00> : vector<256x128xf32>
    %8 = tpu.matmul %5, %7, %cst_7 {dimension_numbers = #tpu.dot_dimension_numbers<[1], [0], [0], [1], [0, 0, 1, 1], [], []>} : vector<256x8xbf16>, vector<8x128xbf16>, vector<256x128xf32> -> vector<256x128xf32>
    %9 = arith.addf %3, %8 : vector<256x128xf32>
    %c0_8 = arith.constant 0 : index
    %c0_9 = arith.constant 0 : index
    %c1 = arith.constant 1 : index
    %c0_10 = arith.constant 0 : index
    %10 = vector.load %arg1[%c0_8, %c0_9, %c1, %c0_10] : memref<1x18x24x8xbf16, #tpu.memory_space<vmem>>, vector<1x16x16x8xbf16>
    %11 = vector.shape_cast %10 : vector<1x16x16x8xbf16> to vector<256x8xbf16>
    %c1_11 = arith.constant 1 : index
    %c0_12 = arith.constant 0 : index
    %c0_13 = arith.constant 0 : index
    %12 = vector.load %arg2[%c1_11, %c0_12, %c0_13] : memref<9x8x128xbf16, #tpu.memory_space<vmem>>, vector<1x8x128xbf16>
    %13 = vector.shape_cast %12 : vector<1x8x128xbf16> to vector<8x128xbf16>
    %cst_14 = arith.constant dense<0.000000e+00> : vector<256x128xf32>
    %14 = tpu.matmul %11, %13, %cst_14 {dimension_numbers = #tpu.dot_dimension_numbers<[1], [0], [0], [1], [0, 0, 1, 1], [], []>} : vector<256x8xbf16>, vector<8x128xbf16>, vector<256x128xf32> -> vector<256x128xf32>
    %15 = arith.addf %9, %14 : vector<256x128xf32>
    %c0_15 = arith.constant 0 : index
    %c0_16 = arith.constant 0 : index
    %c2 = arith.constant 2 : index
    %c0_17 = arith.constant 0 : index
    %16 = vector.load %arg1[%c0_15, %c0_16, %c2, %c0_17] : memref<1x18x24x8xbf16, #tpu.memory_space<vmem>>, vector<1x16x16x8xbf16>
    %17 = vector.shape_cast %16 : vector<1x16x16x8xbf16> to vector<256x8xbf16>
    %c2_18 = arith.constant 2 : index
    %c0_19 = arith.constant 0 : index
    %c0_20 = arith.constant 0 : index
    %18 = vector.load %arg2[%c2_18, %c0_19, %c0_20] : memref<9x8x128xbf16, #tpu.memory_space<vmem>>, vector<1x8x128xbf16>
    %19 = vector.shape_cast %18 : vector<1x8x128xbf16> to vector<8x128xbf16>
    %cst_21 = arith.constant dense<0.000000e+00> : vector<256x128xf32>
    %20 = tpu.matmul %17, %19, %cst_21 {dimension_numbers = #tpu.dot_dimension_numbers<[1], [0], [0], [1], [0, 0, 1, 1], [], []>} : vector<256x8xbf16>, vector<8x128xbf16>, vector<256x128xf32> -> vector<256x128xf32>
    %21 = arith.addf %15, %20 : vector<256x128xf32>
    %c0_22 = arith.constant 0 : index
    %c1_23 = arith.constant 1 : index
    %c0_24 = arith.constant 0 : index
    %c0_25 = arith.constant 0 : index
    %22 = vector.load %arg1[%c0_22, %c1_23, %c0_24, %c0_25] : memref<1x18x24x8xbf16, #tpu.memory_space<vmem>>, vector<1x16x16x8xbf16>
    %23 = vector.shape_cast %22 : vector<1x16x16x8xbf16> to vector<256x8xbf16>
    %c3 = arith.constant 3 : index
    %c0_26 = arith.constant 0 : index
    %c0_27 = arith.constant 0 : index
    %24 = vector.load %arg2[%c3, %c0_26, %c0_27] : memref<9x8x128xbf16, #tpu.memory_space<vmem>>, vector<1x8x128xbf16>
    %25 = vector.shape_cast %24 : vector<1x8x128xbf16> to vector<8x128xbf16>
    %cst_28 = arith.constant dense<0.000000e+00> : vector<256x128xf32>
    %26 = tpu.matmul %23, %25, %cst_28 {dimension_numbers = #tpu.dot_dimension_numbers<[1], [0], [0], [1], [0, 0, 1, 1], [], []>} : vector<256x8xbf16>, vector<8x128xbf16>, vector<256x128xf32> -> vector<256x128xf32>
    %27 = arith.addf %21, %26 : vector<256x128xf32>
    %c0_29 = arith.constant 0 : index
    %c1_30 = arith.constant 1 : index
    %c1_31 = arith.constant 1 : index
    %c0_32 = arith.constant 0 : index
    %28 = vector.load %arg1[%c0_29, %c1_30, %c1_31, %c0_32] : memref<1x18x24x8xbf16, #tpu.memory_space<vmem>>, vector<1x16x16x8xbf16>
    %29 = vector.shape_cast %28 : vector<1x16x16x8xbf16> to vector<256x8xbf16>
    %c4 = arith.constant 4 : index
    %c0_33 = arith.constant 0 : index
    %c0_34 = arith.constant 0 : index
    %30 = vector.load %arg2[%c4, %c0_33, %c0_34] : memref<9x8x128xbf16, #tpu.memory_space<vmem>>, vector<1x8x128xbf16>
    %31 = vector.shape_cast %30 : vector<1x8x128xbf16> to vector<8x128xbf16>
    %cst_35 = arith.constant dense<0.000000e+00> : vector<256x128xf32>
    %32 = tpu.matmul %29, %31, %cst_35 {dimension_numbers = #tpu.dot_dimension_numbers<[1], [0], [0], [1], [0, 0, 1, 1], [], []>} : vector<256x8xbf16>, vector<8x128xbf16>, vector<256x128xf32> -> vector<256x128xf32>
    %33 = arith.addf %27, %32 : vector<256x128xf32>
    %c0_36 = arith.constant 0 : index
    %c1_37 = arith.constant 1 : index
    %c2_38 = arith.constant 2 : index
    %c0_39 = arith.constant 0 : index
    %34 = vector.load %arg1[%c0_36, %c1_37, %c2_38, %c0_39] : memref<1x18x24x8xbf16, #tpu.memory_space<vmem>>, vector<1x16x16x8xbf16>
    %35 = vector.shape_cast %34 : vector<1x16x16x8xbf16> to vector<256x8xbf16>
    %c5 = arith.constant 5 : index
    %c0_40 = arith.constant 0 : index
    %c0_41 = arith.constant 0 : index
    %36 = vector.load %arg2[%c5, %c0_40, %c0_41] : memref<9x8x128xbf16, #tpu.memory_space<vmem>>, vector<1x8x128xbf16>
    %37 = vector.shape_cast %36 : vector<1x8x128xbf16> to vector<8x128xbf16>
    %cst_42 = arith.constant dense<0.000000e+00> : vector<256x128xf32>
    %38 = tpu.matmul %35, %37, %cst_42 {dimension_numbers = #tpu.dot_dimension_numbers<[1], [0], [0], [1], [0, 0, 1, 1], [], []>} : vector<256x8xbf16>, vector<8x128xbf16>, vector<256x128xf32> -> vector<256x128xf32>
    %39 = arith.addf %33, %38 : vector<256x128xf32>
    %c0_43 = arith.constant 0 : index
    %c2_44 = arith.constant 2 : index
    %c0_45 = arith.constant 0 : index
    %c0_46 = arith.constant 0 : index
    %40 = vector.load %arg1[%c0_43, %c2_44, %c0_45, %c0_46] : memref<1x18x24x8xbf16, #tpu.memory_space<vmem>>, vector<1x16x16x8xbf16>
    %41 = vector.shape_cast %40 : vector<1x16x16x8xbf16> to vector<256x8xbf16>
    %c6 = arith.constant 6 : index
    %c0_47 = arith.constant 0 : index
    %c0_48 = arith.constant 0 : index
    %42 = vector.load %arg2[%c6, %c0_47, %c0_48] : memref<9x8x128xbf16, #tpu.memory_space<vmem>>, vector<1x8x128xbf16>
    %43 = vector.shape_cast %42 : vector<1x8x128xbf16> to vector<8x128xbf16>
    %cst_49 = arith.constant dense<0.000000e+00> : vector<256x128xf32>
    %44 = tpu.matmul %41, %43, %cst_49 {dimension_numbers = #tpu.dot_dimension_numbers<[1], [0], [0], [1], [0, 0, 1, 1], [], []>} : vector<256x8xbf16>, vector<8x128xbf16>, vector<256x128xf32> -> vector<256x128xf32>
    %45 = arith.addf %39, %44 : vector<256x128xf32>
    %c0_50 = arith.constant 0 : index
    %c2_51 = arith.constant 2 : index
    %c1_52 = arith.constant 1 : index
    %c0_53 = arith.constant 0 : index
    %46 = vector.load %arg1[%c0_50, %c2_51, %c1_52, %c0_53] : memref<1x18x24x8xbf16, #tpu.memory_space<vmem>>, vector<1x16x16x8xbf16>
    %47 = vector.shape_cast %46 : vector<1x16x16x8xbf16> to vector<256x8xbf16>
    %c7 = arith.constant 7 : index
    %c0_54 = arith.constant 0 : index
    %c0_55 = arith.constant 0 : index
    %48 = vector.load %arg2[%c7, %c0_54, %c0_55] : memref<9x8x128xbf16, #tpu.memory_space<vmem>>, vector<1x8x128xbf16>
    %49 = vector.shape_cast %48 : vector<1x8x128xbf16> to vector<8x128xbf16>
    %cst_56 = arith.constant dense<0.000000e+00> : vector<256x128xf32>
    %50 = tpu.matmul %47, %49, %cst_56 {dimension_numbers = #tpu.dot_dimension_numbers<[1], [0], [0], [1], [0, 0, 1, 1], [], []>} : vector<256x8xbf16>, vector<8x128xbf16>, vector<256x128xf32> -> vector<256x128xf32>
    %51 = arith.addf %45, %50 : vector<256x128xf32>
    %c0_57 = arith.constant 0 : index
    %c2_58 = arith.constant 2 : index
    %c2_59 = arith.constant 2 : index
    %c0_60 = arith.constant 0 : index
    %52 = vector.load %arg1[%c0_57, %c2_58, %c2_59, %c0_60] : memref<1x18x24x8xbf16, #tpu.memory_space<vmem>>, vector<1x16x16x8xbf16>
    %53 = vector.shape_cast %52 : vector<1x16x16x8xbf16> to vector<256x8xbf16>
    %c8 = arith.constant 8 : index
    %c0_61 = arith.constant 0 : index
    %c0_62 = arith.constant 0 : index
    %54 = vector.load %arg2[%c8, %c0_61, %c0_62] : memref<9x8x128xbf16, #tpu.memory_space<vmem>>, vector<1x8x128xbf16>
    %55 = vector.shape_cast %54 : vector<1x8x128xbf16> to vector<8x128xbf16>
    %cst_63 = arith.constant dense<0.000000e+00> : vector<256x128xf32>
    %56 = tpu.matmul %53, %55, %cst_63 {dimension_numbers = #tpu.dot_dimension_numbers<[1], [0], [0], [1], [0, 0, 1, 1], [], []>} : vector<256x8xbf16>, vector<8x128xbf16>, vector<256x128xf32> -> vector<256x128xf32>
    %57 = arith.addf %51, %56 : vector<256x128xf32>
    %58 = vector.shape_cast %57 : vector<256x128xf32> to vector<1x256x128xf32>
    %c0_64 = arith.constant 0 : index
    %c0_65 = arith.constant 0 : index
    %c0_66 = arith.constant 0 : index
    %59 = vector.load %arg3[%c0_64, %c0_65, %c0_66] : memref<1x256x128xf32, #tpu.memory_space<vmem>>, vector<1x256x128xf32>
    tpu.vector_store %arg3[%c0_64, %c0_65, %c0_66], %58 {strides = array<i32>} : memref<1x256x128xf32, #tpu.memory_space<vmem>>, vector<1x256x128xf32>,
    %c0_67 = arith.constant 0 : index
    %c0_68 = arith.constant 0 : index
    %60 = vector.load %arg4[%c0_67, %c0_68] : memref<2x128xf32, #tpu.memory_space<vmem>>, vector<1x128xf32>
    %cst_69 = arith.constant dense<0.000000e+00> : vector<128xf32>
    %61 = vector.multi_reduction <add>, %57, %cst_69 [0] : vector<256x128xf32> to vector<128xf32>
    %62 = vector.shape_cast %61 : vector<128xf32> to vector<1x128xf32>
    %63 = arith.addf %60, %62 : vector<1x128xf32>
    %c0_70 = arith.constant 0 : index
    %c0_71 = arith.constant 0 : index
    %64 = vector.load %arg4[%c0_70, %c0_71] : memref<2x128xf32, #tpu.memory_space<vmem>>, vector<1x128xf32>
    tpu.vector_store %arg4[%c0_70, %c0_71], %63 {strides = array<i32>} : memref<2x128xf32, #tpu.memory_space<vmem>>, vector<1x128xf32>,
    %c1_72 = arith.constant 1 : index
    %c0_73 = arith.constant 0 : index
    %65 = vector.load %arg4[%c1_72, %c0_73] : memref<2x128xf32, #tpu.memory_space<vmem>>, vector<1x128xf32>
    %66 = arith.mulf %57, %57 : vector<256x128xf32>
    %cst_74 = arith.constant dense<0.000000e+00> : vector<128xf32>
    %67 = vector.multi_reduction <add>, %66, %cst_74 [0] : vector<256x128xf32> to vector<128xf32>
    %68 = vector.shape_cast %67 : vector<128xf32> to vector<1x128xf32>
    %69 = arith.addf %65, %68 : vector<1x128xf32>
    %c1_75 = arith.constant 1 : index
    %c0_76 = arith.constant 0 : index
    %70 = vector.load %arg4[%c1_75, %c0_76] : memref<2x128xf32, #tpu.memory_space<vmem>>, vector<1x128xf32>
    tpu.vector_store %arg4[%c1_75, %c0_76], %69 {strides = array<i32>} : memref<2x128xf32, #tpu.memory_space<vmem>>, vector<1x128xf32>,
    return
  }
  func.func @transform_0(%arg0: i32) -> (i32, i32, i32, i32) {
    %c0_i32 = arith.constant 0 : i32
    %c0_i32_0 = arith.constant 0 : i32
    %c0_i32_1 = arith.constant 0 : i32
    %c0_i32_2 = arith.constant 0 : i32
    return %arg0, %c0_i32, %c0_i32_0, %c0_i32_1 : i32, i32, i32, i32
  }
  func.func @transform_1(%arg0: i32) -> (i32, i32, i32) {
    %c0_i32 = arith.constant 0 : i32
    %c0_i32_0 = arith.constant 0 : i32
    %c0_i32_1 = arith.constant 0 : i32
    %c0_i32_2 = arith.constant 0 : i32
    return %c0_i32, %c0_i32_0, %c0_i32_1 : i32, i32, i32
  }
  func.func @transform_2(%arg0: i32) -> (i32, i32, i32) {
    %c0_i32 = arith.constant 0 : i32
    %c0_i32_0 = arith.constant 0 : i32
    %c0_i32_1 = arith.constant 0 : i32
    return %arg0, %c0_i32, %c0_i32_0 : i32, i32, i32
  }
  func.func @transform_3(%arg0: i32) -> (i32, i32) {
    %c0_i32 = arith.constant 0 : i32
    %c0_i32_0 = arith.constant 0 : i32
    %c0_i32_1 = arith.constant 0 : i32
    return %c0_i32, %c0_i32_0 : i32, i32
  }
}

</mosaic_0001>

<bundles_post_ra>
// kernel: tpu_custom_call.1
= control target key start
LH: loop header
LB: loop body
LE: loop exit
PB: predicated region body
PF: predicated region fallthrough
CT: control target
= control target key end

     0   :  { %9 = vsyncpa [#allocation3], 0  ;;  %s8847_s0 = inlined_call_operand.vmem [shape: bf16[2,18,24,8], index: 0, kind: input, shape index: {}]   ;;  %s8848_s1 = inlined_call_operand.vmem [shape: bf16[9,8,128], index: 1, kind: input, shape index: {}]   ;;  %s8849_s2 = inlined_call_operand.hbm [shape: f32[2,256,128], index: 2, kind: output, shape index: {0}]   ;;  %s8850_s3 = inlined_call_operand.hbm [shape: f32[2,128], index: 3, kind: output, shape index: {1}]  }
   0x1   :  { %11 = vsyncpa [#allocation3 + $0x1], 0 }
   0x2   :  { %12 = vsyncpa [#allocation5], 0  ;;  %s6211_s12 = smov 0   ;;  %s6213_s13 = smov 0  }
   0x3   :  { %s6215_s14 = smov 0   ;;  %s6217_s15 = smov 0  }
   0x4 LB: > { %s6232_s16 = sadd.s32 4294967295, %s6184_s15   ;;  %s4975_s17 = sadd.s32 4294967294, %s6184_s15   ;;  %s6184_s15 = sphi %s6217_s15, %s9094_s15   ;;  %s6180_s14 = sphi %s6215_s14, %s9093_s14   ;;  %s6176_s13 = sphi %s6213_s13, %s9092_s13   ;;  %s6172_s12 = sphi %s6211_s12, %s9091_s12  }
   0x5   : > { %s6236_s18 = sadd.s32 1, %s6184_s15   ;;  %s72_s19 = sadd.s32 1, %s6180_s14 }
   0x6   : > { %s69_s20 = ssub.s32 %s6184_s15, %s6236_s18  ;;  %p82_p0 = scmp.ne.s32.totalorder %s6180_s14, %s6176_s13 }
   0x7   : > { %p70_p1 = scmp.eq.s32.totalorder %s69_s20, 0  ;;  %p83_p2 = scmp.eq.s32.totalorder %s6232_s16, 1 }
   0x8   : > { %p88_p3 = scmp.ne.s32.totalorder %s6176_s13, %s6172_s12  ;;  %p89_p4 = scmp.eq.s32.totalorder %s4975_s17, 1 }
   0x9   : > { %s6247_s21 = scalar_select %p70_p1, %s6180_s14, %s72_s19  }
   0xa   : > { %p6251_p5 = por %p83_p2, %p82_p0  ;;  %p6255_p6 = por %p89_p4, %p88_p3 }
   0xb   : > { %p4978_p7 = scmp.ge.s32.totalorder %s6184_s15, 1  ;;  %p139_p8 = scmp.lt.s32.totalorder %s6184_s15, 3 }
   0xd   : > { %p140_p9 = pnand %p4978_p7, %p139_p8 }
   0xf   : > { %143 = sbr.rel (%p140_p9) target bundleno = 604 (0x25c), region = 28 }
  0x14   : > { %s158_s24 = sand.u32 1, %s6176_s13   ;;  %p163_p10 = scmp.lt.s32.totalorder %s6232_s16, 1 }
  0x15   : > { %s4979_s25 = sshll.u32 %s158_s24, 8  ;;  %p4981_p11 = scmp.ne.s32.totalorder %s6232_s16, 0 }
  0x16   : > { %s164_s26 = scalar_select %p163_p10, %s6232_s16, 1 }
  0x17   : > { %s6271_s4 = scalar_lea.vmem [#allocation2], %s4979_s25  ;;  %172 = sbr.rel (%p4981_p11) target bundleno = 30 (0x1e), region = 32 }
  0x18   : > { %s5997_s27 = smul.u32 216, %s164_s26 }
  0x1a   : > { %s6269_s30 = scalar_lea.vmem %s8847_s0, %s5997_s27 }
  0x1c   : > { %v6186_v0 = vmov 0.0  }
  0x1d   : > { %173 = vst [vmem:[#allocation4] sm:$0x3] %v6186_v0 }
  0x1e PF: > { %v4982_v1 = vld [vmem:[%s8848_s1 + $0x4] sm:$0xf]  ;;  %vm709_vm0 = vcmask 1043456   ;;  %v6278_v2 = vld [vmem:[%s6269_s30] sm:$0xf]  ;;  %vm660_vm3 = vcmask 64512  }
  0x1f   : > { %5988 = vmatprep.subr.msk.bf16.mxu1 %vm709_vm0, %v4982_v1  ;;  %5987 = vmatprep.subr.msk.bf16.mxu0 %vm709_vm0, %v4982_v1  ;;  %v711_v3 = vsel %vm709_vm0, %v4982_v1, 0  ;;  %v6284_v4 = vld [vmem:[%s6269_s30 + $0x4] sm:$0xf]  ;;  %v6287_v5 = vld [vmem:[%s6269_s30 + $0x8] sm:$0x1]  ;;  %v227_v6 = vshrl.u32 %v6278_v2, 16 }
  0x20   : > { %5986 = vmatpush3.bf16.msra.mxu1 %v711_v3  ;;  %5680 = vmatpush3.bf16.msra.mxu0 %v711_v3  ;;  %vm223_vm1 = vsmask.f32 3328  ;;  %vm224_vm2 = vsmask.f32 7440  ;;  %v230_v7 = vshll.u32 %v6278_v2, 16  ;;  %v236_v8 = vshll.u32 %v6284_v4, 16 }
  0x21   : > { %v229_v9 = vrot.slane %v227_v6, 4  ;;  %v240_v10 = vshrl.u32 %v6284_v4, 16  ;;  %v246_v11 = vshll.u32 %v6287_v5, 16  ;;  %v6295_v12 = vld [vmem:[%s6269_s30 + $0x60] sm:$0xf]  ;;  %vm6318_vm4 = vmor %vm223_vm1, %vm224_vm2  ;;  %vm1214_vm5 = vcmask 1042432  }
  0x22   : > { %v232_v13 = vrot.slane %v230_v7, 5  ;;  %v238_v14 = vrot.slane %v236_v8, 5  ;;  %v6298_v15 = vld [vmem:[%s6269_s30 + $0x64] sm:$0xf]  ;;  %v6301_v16 = vld [vmem:[%s6269_s30 + $0x68] sm:$0x1] }
  0x23   : > { %v242_v17 = vrot.slane %v240_v10, 4  ;;  %v419_v19 = vshrl.u32 %v6295_v12, 16  ;;  %v422_v20 = vshll.u32 %v6295_v12, 16  ;;  %v206_v21 = vld [vmem:[%s8848_s1] sm:$0xf]  ;;  %v428_v23 = vshll.u32 %v6298_v15, 16 }
  0x24   : > { %v233_v22 = vor.u32 %v232_v13, %v229_v9  ;;  %v432_v24 = vshrl.u32 %v6298_v15, 16  ;;  %v438_v25 = vshll.u32 %v6301_v16, 16  ;;  %5989 = vmatprep.subr.msk.bf16.mxu1 %vm709_vm0, %v206_v21  ;;  %v6314_v26 = vld [vmem:[%s6269_s30 + $0xc] sm:$0xf]  ;;  %v248_v29 = vrot.slane %v246_v11, 5  ;;  %s4891_s8 = sshll.u32 %s6271_s4, 4  ;;  %s8790_s8 = int_to_ptr.vmem [resolvable:$true] %s4891_s8 }
  0x25   : > { %v243_v28 = vor.u32 %v242_v17, %v238_v14  ;;  %v421_v30 = vrot.slane %v419_v19, 4  ;;  %v424_v31 = vrot.slane %v422_v20, 5  ;;  %v6323_v32 = vld [vmem:[%s6269_s30 + $0x10] sm:$0xf]  ;;  %v430_v34 = vrot.slane %v428_v23, 5  ;;  %s8796_s17 = scalar_lea.sflag [#allocation3], %s158_s24 }
  0x26   : > { %v234_v33 = vrot.slane %v233_v22, 4  ;;  %v434_v35 = vrot.slane %v432_v24, 4  ;;  %v440_v36 = vrot.slane %v438_v25, 5  ;;  %v251_v39 = vshrl.u32 %v6314_v26, 16  ;;  %v6330_v43 = vld [vmem:[%s6269_s30 + $0x14] sm:$0x1] }
  0x27   : > { %v244_v37 = vrot.slane %v243_v28, 4  ;;  %v425_v38 = vor.u32 %v424_v31, %v421_v30  ;;  %v254_v40 = vshll.u32 %v6314_v26, 16  ;;  %v260_v44 = vshll.u32 %v6323_v32, 16  ;;  %v6335_v46 = vld [vmem:[%s6269_s30 + $0x6c] sm:$0xf]  ;;  %s6096_s19 = scalar_lea.vmem %s8790_s8, 4096 }
  0x28   : > { %v239_v41 = vsel %vm6318_vm4, %v234_v33, %v238_v14  ;;  %v435_v42 = vor.u32 %v434_v35, %v430_v34  ;;  %v264_v45 = vshrl.u32 %v6323_v32, 16  ;;  %v253_v49 = vrot.slane %v251_v39, 4  ;;  %v5063_v51 = vld [vmem:[%s8848_s1 + $0x8] sm:$0xf]  ;;  %v6348_v60 = vld [vmem:[%s6269_s30 + $0x70] sm:$0xf]  ;;  %p6097_p12 = scmp.ne.s32.totalorder %s8790_s8, %s6096_s19 }
  0x29   : > { %v249_v47 = vsel %vm6318_vm4, %v244_v37, %v248_v29  ;;  %v426_v48 = vrot.slane %v425_v38, 4  ;;  %v256_v50 = vrot.slane %v254_v40, 5  ;;  %v262_v54 = vrot.slane %v260_v44, 5  ;;  %5990 = vmatprep.subr.msk.bf16.mxu0 %vm709_vm0, %v5063_v51  ;;  %v6355_v0 = vld [vmem:[%s6269_s30 + $0x74] sm:$0x1]  ;;  %s6187_s20 = smov [#allocation2]  }
  0x2a   : > { %v4983_v52 = vcombine.low %v239_v41, %v249_v47  ;;  %v436_v53 = vrot.slane %v435_v42, 4  ;;  %v266_v55 = vrot.slane %v264_v45, 4  ;;  %v270_v58 = vshll.u32 %v6330_v43, 16  ;;  %v6360_v9 = vld [vmem:[%s6269_s30 + $0x18] sm:$0xf]  ;;  %p6098_p13 = pnand %p6097_p12, %p6251_p5  ;;  %s6100_s25 = sshll.u32 %s6187_s20, 4  ;;  %s6101_s25 = int_to_ptr.vmem [resolvable:$false] %s6100_s25 }
  0x2b   : > { %v431_v56 = vsel %vm6318_vm4, %v426_v48, %v430_v34  ;;  %v257_v57 = vor.u32 %v256_v50, %v253_v49  ;;  %v443_v1 = vshrl.u32 %v6335_v46, 16  ;;  %v446_v8 = vshll.u32 %v6335_v46, 16  ;;  %v6365_v17 = vld [vmem:[%s6269_s30 + $0x1c] sm:$0xf]  ;;  %v6373_v24 = vld [vmem:[%s6269_s30 + $0x20] sm:$0x1]  ;;  %p6103_p1 = scmp.lt.s32.totalorder %s8790_s8, %s6101_s25 }
  0x2c   : > { %5681 = vmatprep.mubr.msk.bf16.mxu0 %vm660_vm3, %v4983_v52  ;;  %v441_v61 = vsel %vm6318_vm4, %v436_v53, %v440_v36  ;;  %v267_v62 = vor.u32 %v266_v55, %v262_v54  ;;  %v272_v7 = vrot.slane %v270_v58, 5  ;;  %v452_v13 = vshll.u32 %v6348_v60, 16  ;;  %v6379_v31 = vld [vmem:[%s6269_s30 + $0x78] sm:$0xf]  ;;  %v6388_v44 = vld [vmem:[%s6269_s30 + $0x7c] sm:$0xf]  ;;  %p6099_p0 = pneg %p6098_p13 }
  0x2d   : > { %v4991_v3 = vcombine.low %v431_v56, %v441_v61  ;;  %v258_v6 = vrot.slane %v257_v57, 4  ;;  %v445_v11 = vrot.slane %v443_v1, 4  ;;  %v456_v14 = vshrl.u32 %v6348_v60, 16  ;;  %v6398_v56 = vld [vmem:[%s6269_s30 + $0x24] sm:$0xf]  ;;  %s6102_s26 = scalar_lea.vmem %s6101_s25, 8192 }
  0x2e   : > { %v268_v10 = vrot.slane %v267_v62, 4  ;;  %v448_v20 = vrot.slane %v446_v8, 5  ;;  %v462_v22 = vshll.u32 %v6355_v0, 16  ;;  %v1003_v23 = vsel %vm709_vm0, %v206_v21, 0  ;;  %v6406_v8 = vld [vmem:[%s6269_s30 + $0x28] sm:$0xf]  ;;  %p6104_p3 = scmp.lt.s32.totalorder %s6102_s26, %s6096_s19 }
  0x2f   : > { %5697 = vmatprep.mubr.msk.bf16.mxu1 %vm660_vm3, %v4991_v3  ;;  %v263_v19 = vsel %vm6318_vm4, %v258_v6, %v262_v54  ;;  %v454_v28 = vrot.slane %v452_v13, 5  ;;  %v458_v29 = vrot.slane %v456_v14, 4  ;;  %v1428_v30 = vsel %vm709_vm0, %v5063_v51, 0  ;;  %v6392_v51 = vld [vmem:[%s6269_s30 + $0x80] sm:$0x1] }
  0x30   : > { %v273_v25 = vsel %vm6318_vm4, %v268_v10, %v272_v7  ;;  %v449_v34 = vor.u32 %v448_v20, %v445_v11  ;;  %v464_v35 = vrot.slane %v462_v22, 5  ;;  %v275_v36 = vshrl.u32 %v6360_v9, 16  ;;  %8881 = vst [vmem:[#allocation8_spill] sm:$0xff] %v6392_v51  ;;  %v6409_v14 = vld [vmem:[%s6269_s30 + $0x2c] sm:$0x1]  ;;  %p6105_p4 = por %p6104_p3, %p6103_p1 }
  0x31   : > { %v4984_v33 = vcombine.low %v263_v19, %v273_v25  ;;  %v459_v37 = vor.u32 %v458_v29, %v454_v28  ;;  %v278_v21 = vshll.u32 %v6360_v9, 16  ;;  %v284_v38 = vshll.u32 %v6365_v17, 16  ;;  %v6415_v29 = vld [vmem:[%s6269_s30 + $0x84] sm:$0xf]  ;;  %v6547_v59 = vld [vmem:[%s6269_s30 + $0xa8] sm:$0xf] }
  0x32   : > { %v288_v39 = vshrl.u32 %v6365_v17, 16  ;;  %v450_v40 = vrot.slane %v449_v34, 4  ;;  %v277_v41 = vrot.slane %v275_v36, 4  ;;  %v294_v42 = vshll.u32 %v6373_v24, 16  ;;  %8888 = vst [vmem:[#allocation15_spill] sm:$0xff] %v6547_v59  ;;  %p6106_p7 = pnand %p6105_p4, %p6099_p0 }
  0x33   : > { %5682 = vmatmul.mubr.msk.bf16.vlgmr.msra.gmra.mxu0 %vm660_vm3, %v4984_v33  ;;  %v467_v45 = vshrl.u32 %v6379_v31, 16  ;;  %v460_v47 = vrot.slane %v459_v37, 4  ;;  %v280_v48 = vrot.slane %v278_v21, 5  ;;  %v286_v49 = vrot.slane %v284_v38, 5 }
  0x34   : > { %5748 = vmatpush3.bf16.msra.mxu0 %v1428_v30  ;;  %v290_v50 = vrot.slane %v288_v39, 4  ;;  %v455_v52 = vsel %vm6318_vm4, %v450_v40, %v454_v28  ;;  %v296_v53 = vrot.slane %v294_v42, 5  ;;  %v470_v55 = vshll.u32 %v6379_v31, 16  ;;  %v6423_v39 = vld [vmem:[%s6269_s30 + $0x88] sm:$0xf] }
  0x35   : > { %v469_v54 = vrot.slane %v467_v45, 4  ;;  %v465_v57 = vsel %vm6318_vm4, %v460_v47, %v464_v35  ;;  %v281_v58 = vor.u32 %v280_v48, %v277_v41  ;;  %v476_v62 = vshll.u32 %v6388_v44, 16 }
  0x36   : > { %v291_v61 = vor.u32 %v290_v50, %v286_v49  ;;  %v4992_v1 = vcombine.low %v455_v52, %v465_v57  ;;  %v472_v3 = vrot.slane %v470_v55, 5  ;;  %v480_v6 = vshrl.u32 %v6388_v44, 16  ;;  %v6437_v57 = vld [vmem:[%s6269_s30 + $0x30] sm:$0xf] }
  0x37   : > { %v486_v7 = vshll.u32 %v6392_v51, 16  ;;  %v282_v10 = vrot.slane %v281_v58, 4  ;;  %v478_v13 = vrot.slane %v476_v62, 5  ;;  %v299_v19 = vshrl.u32 %v6398_v56, 16 }
  0x38   : > { %v292_v11 = vrot.slane %v291_v61, 4  ;;  %5698 = vmatmul.mubr.msk.bf16.vlgmr.msra.gmra.mxu1 %vm660_vm3, %v4992_v1  ;;  %v473_v20 = vor.u32 %v472_v3, %v469_v54  ;;  %v482_v22 = vrot.slane %v480_v6, 4  ;;  %v302_v28 = vshll.u32 %v6398_v56, 16  ;;  %v6443_v3 = vld [vmem:[%s6269_s30 + $0x34] sm:$0xf] }
  0x39   : > { %v488_v25 = vrot.slane %v486_v7, 5  ;;  %5714 = vmatpush3.bf16.msra.mxu1 %v1003_v23  ;;  %v287_v30 = vsel %vm6318_vm4, %v282_v10, %v286_v49  ;;  %v301_v34 = vrot.slane %v299_v19, 4  ;;  %v308_v35 = vshll.u32 %v6406_v8, 16  ;;  %v6432_v49 = vld [vmem:[%s6269_s30 + $0x8c] sm:$0x1] }
  0x3a   : > { %v297_v33 = vsel %vm6318_vm4, %v292_v11, %v296_v53  ;;  %v474_v37 = vrot.slane %v473_v20, 4  ;;  %v483_v21 = vor.u32 %v482_v22, %v478_v13  ;;  %v304_v38 = vrot.slane %v302_v28, 5  ;;  %v6449_v22 = vld [vmem:[%s6269_s30 + $0x38] sm:$0x1] }
  0x3b   : > { %v4985_v36 = vcombine.low %v287_v30, %v297_v33  ;;  %v310_v40 = vrot.slane %v308_v35, 5  ;;  %v312_v23 = vshrl.u32 %v6406_v8, 16  ;;  %v318_v41 = vshll.u32 %v6409_v14, 16 }
  0x3c   : > { %v491_v42 = vshrl.u32 %v6415_v29, 16  ;;  %v479_v45 = vsel %vm6318_vm4, %v474_v37, %v478_v13  ;;  %v484_v47 = vrot.slane %v483_v21, 4  ;;  %v305_v48 = vor.u32 %v304_v38, %v301_v34  ;;  %v6457_v38 = vld [vmem:[%s6269_s30 + $0x90] sm:$0xf] }
  0x3d   : > { %5685 = vmatprep.mubr.msk.bf16.mxu0 %vm660_vm3, %v4985_v36  ;;  %v494_v50 = vshll.u32 %v6415_v29, 16  ;;  %v314_v52 = vrot.slane %v312_v23, 4  ;;  %v320_v53 = vrot.slane %v318_v41, 5  ;;  %v500_v55 = vshll.u32 %v6423_v39, 16  ;;  %8882 = vst [vmem:[#allocation9_spill] sm:$0xff] %v6457_v38 }
  0x3e   : > { %v493_v54 = vrot.slane %v491_v42, 4  ;;  %v489_v58 = vsel %vm6318_vm4, %v484_v47, %v488_v25  ;;  %v306_v61 = vrot.slane %v305_v48, 4  ;;  %v504_v1 = vshrl.u32 %v6423_v39, 16 }
  0x3f   : > { %v496_v62 = vrot.slane %v494_v50, 5  ;;  %v4993_v6 = vcombine.low %v479_v45, %v489_v58  ;;  %v315_v7 = vor.u32 %v314_v52, %v310_v40  ;;  %v502_v10 = vrot.slane %v500_v55, 5  ;;  %v6463_v45 = vld [vmem:[%s6269_s30 + $0x94] sm:$0xf]  ;;  %v6473_v58 = vld [vmem:[%s6269_s30 + $0x98] sm:$0x1] }
  0x40   : > { %v510_v11 = vshll.u32 %v6432_v49, 16  ;;  %v311_v13 = vsel %vm6318_vm4, %v306_v61, %v310_v40  ;;  %v506_v20 = vrot.slane %v504_v1, 4  ;;  %v323_v25 = vshrl.u32 %v6437_v57, 16  ;;  %8883 = vst [vmem:[#allocation10_spill] sm:$0xff] %v6463_v45  ;;  %8884 = vst [vmem:[#allocation11_spill] sm:$0xff] %v6473_v58 }
  0x41   : > { %v497_v19 = vor.u32 %v496_v62, %v493_v54  ;;  %5701 = vmatprep.mubr.msk.bf16.mxu1 %vm660_vm3, %v4993_v6  ;;  %v316_v28 = vrot.slane %v315_v7, 4  ;;  %v326_v33 = vshll.u32 %v6437_v57, 16  ;;  %v332_v34 = vshll.u32 %v6443_v3, 16  ;;  %v6470_v54 = vld [vmem:[%s8848_s1 + $0xc] sm:$0xf] }
  0x42   : > { %v512_v30 = vrot.slane %v510_v11, 5  ;;  %v507_v36 = vor.u32 %v506_v20, %v502_v10  ;;  %v325_v37 = vrot.slane %v323_v25, 4  ;;  %v336_v21 = vshrl.u32 %v6443_v3, 16  ;;  %5991 = vmatprep.subr.msk.bf16.mxu1 %vm709_vm0, %v6470_v54  ;;  %v6485_v11 = vld [vmem:[%s6269_s30 + $0x3c] sm:$0xf] }
  0x43   : > { %v498_v35 = vrot.slane %v497_v19, 4  ;;  %v321_v40 = vsel %vm6318_vm4, %v316_v28, %v320_v53  ;;  %v328_v23 = vrot.slane %v326_v33, 5  ;;  %v334_v41 = vrot.slane %v332_v34, 5  ;;  %v6493_v33 = vld [vmem:[%s6269_s30 + $0x40] sm:$0xf] }
  0x44   : > { %v342_v42 = vshll.u32 %v6449_v22, 16  ;;  %v4986_v47 = vcombine.low %v311_v13, %v321_v40  ;;  %v508_v50 = vrot.slane %v507_v36, 4  ;;  %v338_v52 = vrot.slane %v336_v21, 4  ;;  %v6490_v13 = vld [vmem:[%s8848_s1 + $0x10] sm:$0xf] }
  0x45   : > { %v503_v48 = vsel %vm6318_vm4, %v498_v35, %v502_v10  ;;  %v329_v55 = vor.u32 %v328_v23, %v325_v37  ;;  %v515_v61 = vshrl.u32 %v6457_v38, 16  ;;  %v518_v62 = vshll.u32 %v6457_v38, 16  ;;  %5992 = vmatprep.subr.msk.bf16.mxu0 %vm709_vm0, %v6490_v13  ;;  %v6502_v40 = vld [vmem:[%s6269_s30 + $0x44] sm:$0x1] }
  0x46   : > { %v344_v53 = vrot.slane %v342_v42, 5  ;;  %5686 = vmatmul.mubr.msk.bf16.gmra.mxu0 %vm660_vm3, %v4986_v47  ;;  %v513_v1 = vsel %vm6318_vm4, %v508_v50, %v512_v30  ;;  %v339_v6 = vor.u32 %v338_v52, %v334_v41  ;;  %v524_v7 = vshll.u32 %v6463_v45, 16 }
  0x47   : > { %v528_v10 = vshrl.u32 %v6463_v45, 16  ;;  %v4994_v19 = vcombine.low %v503_v48, %v513_v1  ;;  %v330_v20 = vrot.slane %v329_v55, 4  ;;  %v517_v25 = vrot.slane %v515_v61, 4  ;;  %v6510_v55 = vld [vmem:[%s6269_s30 + $0x9c] sm:$0xf] }
  0x48   : > { %v520_v28 = vrot.slane %v518_v62, 5  ;;  %v340_v30 = vrot.slane %v339_v6, 4  ;;  %v526_v34 = vrot.slane %v524_v7, 5  ;;  %v534_v36 = vshll.u32 %v6473_v58, 16  ;;  %8885 = vst [vmem:[#allocation12_spill] sm:$0xff] %v6510_v55 }
  0x49   : > { %v530_v35 = vrot.slane %v528_v10, 4  ;;  %5702 = vmatmul.mubr.msk.bf16.gmra.mxu1 %vm660_vm3, %v4994_v19  ;;  %v335_v37 = vsel %vm6318_vm4, %v330_v20, %v334_v41  ;;  %v347_v23 = vshrl.u32 %v6485_v11, 16  ;;  %v350_v42 = vshll.u32 %v6485_v11, 16  ;;  %v6513_v6 = vld [vmem:[%s6269_s30 + $0xa0] sm:$0xf] }
  0x4a   : > { %v521_v21 = vor.u32 %v520_v28, %v517_v25  ;;  %v345_v47 = vsel %vm6318_vm4, %v340_v30, %v344_v53  ;;  %v536_v50 = vrot.slane %v534_v36, 5  ;;  %v356_v52 = vshll.u32 %v6493_v33, 16  ;;  %8886 = vst [vmem:[#allocation13_spill] sm:$0xff] %v6513_v6  ;;  %v6521_v28 = vld [vmem:[%s6269_s30 + $0xa4] sm:$0x1] }
  0x4b   : > { %v531_v48 = vor.u32 %v530_v35, %v526_v34  ;;  %v4987_v61 = vcombine.low %v335_v37, %v345_v47  ;;  %v349_v41 = vrot.slane %v347_v23, 4  ;;  %v352_v1 = vrot.slane %v350_v42, 5  ;;  %8887 = vst [vmem:[#allocation14_spill] sm:$0xff] %v6521_v28  ;;  %v6529_v42 = vld [vmem:[%s6269_s30 + $0x48] sm:$0xf] }
  0x4c   : > { %v522_v62 = vrot.slane %v521_v21, 4  ;;  %v358_v10 = vrot.slane %v356_v52, 5  ;;  %v360_v19 = vshrl.u32 %v6493_v33, 16  ;;  %v366_v53 = vshll.u32 %v6502_v40, 16 }
  0x4d   : > { %v532_v7 = vrot.slane %v531_v48, 4  ;;  %5689 = vmatprep.mubr.msk.bf16.mxu0 %vm660_vm3, %v4987_v61  ;;  %v353_v25 = vor.u32 %v352_v1, %v349_v41  ;;  %v539_v30 = vshrl.u32 %v6510_v55, 16  ;;  %v542_v35 = vshll.u32 %v6510_v55, 16  ;;  %v6532_v61 = vld [vmem:[%s6269_s30 + $0x4c] sm:$0xf] }
  0x4e   : > { %v527_v20 = vsel %vm6318_vm4, %v522_v62, %v526_v34  ;;  %v362_v37 = vrot.slane %v360_v19, 4  ;;  %v368_v21 = vrot.slane %v366_v53, 5  ;;  %v548_v23 = vshll.u32 %v6513_v6, 16 }
  0x4f   : > { %v537_v36 = vsel %vm6318_vm4, %v532_v7, %v536_v50  ;;  %v354_v48 = vrot.slane %v353_v25, 4  ;;  %v541_v34 = vrot.slane %v539_v30, 4  ;;  %v544_v52 = vrot.slane %v542_v35, 5  ;;  %v6537_v50 = vld [vmem:[%s6269_s30 + $0x50] sm:$0x1] }
  0x50   : > { %v4995_v47 = vcombine.low %v527_v20, %v537_v36  ;;  %v363_v62 = vor.u32 %v362_v37, %v358_v10  ;;  %v550_v41 = vrot.slane %v548_v23, 5  ;;  %v552_v1 = vshrl.u32 %v6513_v6, 16 }
  0x51   : > { %v558_v18 = vshll.u32 %v6521_v28, 16  ;;  %v359_v7 = vsel %vm6318_vm4, %v354_v48, %v358_v10  ;;  %v545_v19 = vor.u32 %v544_v52, %v541_v34  ;;  %v371_v53 = vshrl.u32 %v6529_v42, 16 }
  0x52   : > { %5705 = vmatprep.mubr.msk.bf16.mxu1 %vm660_vm3, %v4995_v47  ;;  %v374_v20 = vshll.u32 %v6529_v42, 16  ;;  %v364_v25 = vrot.slane %v363_v62, 4  ;;  %v554_v30 = vrot.slane %v552_v1, 4  ;;  %v380_v36 = vshll.u32 %v6532_v61, 16  ;;  %v6553_v62 = vld [vmem:[%s6269_s30 + $0xac] sm:$0xf] }
  0x53   : > { %v560_v35 = vrot.slane %v558_v18, 5  ;;  %v546_v37 = vrot.slane %v545_v19, 4  ;;  %v373_v23 = vrot.slane %v371_v53, 4  ;;  %v384_v47 = vshrl.u32 %v6532_v61, 16  ;;  %8889 = vst [vmem:[#allocation16_spill] sm:$0xff] %v6553_v62 }
  0x54   : > { %v376_v63 = vrot.slane %v374_v20, 5  ;;  %v369_v10 = vsel %vm6318_vm4, %v364_v25, %v368_v21  ;;  %v555_v48 = vor.u32 %v554_v30, %v550_v41  ;;  %v382_v34 = vrot.slane %v380_v36, 5  ;;  %v6556_v18 = vld [vmem:[%s6269_s30 + $0xb0] sm:$0x1] }
  0x55   : > { %v390_v52 = vshll.u32 %v6537_v50, 16  ;;  %8890 = vst [vmem:[#allocation17_spill] sm:$0xff] %v6556_v18  ;;  %v4988_v1 = vcombine.low %v359_v7, %v369_v10  ;;  %v551_v19 = vsel %vm6318_vm4, %v546_v37, %v550_v41  ;;  %v386_v20 = vrot.slane %v384_v47, 4  ;;  %v6566_v10 = vld [vmem:[%s6269_s30 + $0x54] sm:$0xf] }
  0x56   : > { %v377_v53 = vor.u32 %v376_v63, %v373_v23  ;;  %v556_v51 = vrot.slane %v555_v48, 4  ;;  %v563_v21 = vshrl.u32 %v6547_v59, 16  ;;  %v566_v25 = vshll.u32 %v6547_v59, 16  ;;  %v6572_v47 = vld [vmem:[%s6269_s30 + $0x58] sm:$0xf] }
  0x57   : > { %v392_v28 = vrot.slane %v390_v52, 5  ;;  %5690 = vmatmul.mubr.msk.bf16.gmra.mxu0 %vm660_vm3, %v4988_v1  ;;  %v387_v36 = vor.u32 %v386_v20, %v382_v34  ;;  %v572_v55 = vshll.u32 %v6553_v62, 16  ;;  %v576_v7 = vshrl.u32 %v6553_v62, 16  ;;  %v6577_v20 = vld [vmem:[%s6269_s30 + $0x5c] sm:$0x1] }
  0x58   : > { %v378_v30 = vrot.slane %v377_v53, 4  ;;  %v561_v63 = vsel %vm6318_vm4, %v556_v51, %v560_v35  ;;  %v565_v41 = vrot.slane %v563_v21, 4  ;;  %v568_v37 = vrot.slane %v566_v25, 5 }
  0x59   : > { %v582_v23 = vshll.u32 %v6556_v18, 16  ;;  %v4996_v48 = vcombine.low %v551_v19, %v561_v63  ;;  %v388_v1 = vrot.slane %v387_v36, 4  ;;  %v574_v53 = vrot.slane %v572_v55, 5  ;;  %v6587_v55 = vld [vmem:[%s6269_s30 + $0xb4] sm:$0xf] }
  0x5a   : > { %v383_v52 = vsel %vm6318_vm4, %v378_v30, %v382_v34  ;;  %v569_v59 = vor.u32 %v568_v37, %v565_v41  ;;  %v578_v62 = vrot.slane %v576_v7, 4  ;;  %v395_v51 = vshrl.u32 %v6566_v10, 16  ;;  %v6590_v63 = vld [vmem:[%s6269_s30 + $0xb8] sm:$0xf]  ;;  %v6599_v18 = vld [vmem:[%s6269_s30 + $0xbc] sm:$0x1] }
  0x5b   : > { %v584_v6 = vrot.slane %v582_v23, 5  ;;  %5706 = vmatmul.mubr.msk.bf16.gmra.mxu1 %vm660_vm3, %v4996_v48  ;;  %v393_v35 = vsel %vm6318_vm4, %v388_v1, %v392_v28  ;;  %v398_v19 = vshll.u32 %v6566_v10, 16  ;;  %v404_v21 = vshll.u32 %v6572_v47, 16 }
  0x5c   : > { %v408_v34 = vshrl.u32 %v6572_v47, 16  ;;  %v4989_v25 = vcombine.low %v383_v52, %v393_v35  ;;  %v570_v30 = vrot.slane %v569_v59, 4  ;;  %v579_v36 = vor.u32 %v578_v62, %v574_v53 }
  0x5d   : > { %v397_v7 = vrot.slane %v395_v51, 4  ;;  %v400_v41 = vrot.slane %v398_v19, 5  ;;  %v406_v37 = vrot.slane %v404_v21, 5  ;;  %v414_v28 = vshll.u32 %v6577_v20, 16  ;;  %v1166_v21 = vld [vmem:[%s6269_s30] sm:$0xe] }
  0x5e   : > { %v410_v23 = vrot.slane %v408_v34, 4  ;;  %5693 = vmatprep.mubr.msk.bf16.mxu0 %vm660_vm3, %v4989_v25  ;;  %v575_v48 = vsel %vm6318_vm4, %v570_v30, %v574_v53  ;;  %v580_v1 = vrot.slane %v579_v36, 4  ;;  %v587_v59 = vshrl.u32 %v6587_v55, 16  ;;  %v1167_v30 = vld [vmem:[%s6269_s30 + $0xc] sm:$0xe] }
  0x5f   : > { %v590_v62 = vshll.u32 %v6587_v55, 16  ;;  %v401_v52 = vor.u32 %v400_v41, %v397_v7  ;;  %v416_v35 = vrot.slane %v414_v28, 5  ;;  %v596_v19 = vshll.u32 %v6590_v63, 16 }
  0x60   : > { %v411_v51 = vor.u32 %v410_v23, %v406_v37  ;;  %v585_v34 = vsel %vm6318_vm4, %v580_v1, %v584_v6  ;;  %v589_v25 = vrot.slane %v587_v59, 4  ;;  %v600_v53 = vshrl.u32 %v6590_v63, 16 }
  0x61   : > { %v592_v58 = vrot.slane %v590_v62, 5  ;;  %v4997_v36 = vcombine.low %v575_v48, %v585_v34  ;;  %v402_v38 = vrot.slane %v401_v52, 4  ;;  %v598_v7 = vrot.slane %v596_v19, 5  ;;  %v1168_v19 = vld [vmem:[%s6269_s30 + $0x18] sm:$0xe] }
  0x62   : > { %v412_v45 = vrot.slane %v411_v51, 4  ;;  %v602_v23 = vrot.slane %v600_v53, 4  ;;  %v606_v28 = vshll.u32 %v6599_v18, 16  ;;  %vm1215_vm6 = vcmask 1046532  }
  0x63   : > { %v593_v41 = vor.u32 %v592_v58, %v589_v25  ;;  %5709 = vmatprep.mubr.msk.bf16.mxu1 %vm660_vm3, %v4997_v36  ;;  %v407_v6 = vsel %vm6318_vm4, %v402_v38, %v406_v37  ;;  %v5047_v59 = vrot.slane %v1166_v21, 9  ;;  %vm6613_vm7 = vmor %vm1214_vm5, %vm1215_vm6  ;;  %v1219_v34 = vrot.slane %v6284_v4, 5 }
  0x64   : > { %v417_v1 = vsel %vm6318_vm4, %v412_v45, %v416_v35  ;;  %v603_v52 = vor.u32 %v602_v23, %v598_v7  ;;  %v608_v51 = vrot.slane %v606_v28, 5  ;;  %v5016_v38 = vcombine.low %v6314_v26, %v6323_v32  ;;  %v1169_v28 = vld [vmem:[%s6269_s30 + $0x24] sm:$0xe] }
  0x65   : > { %v4990_v48 = vcombine.low %v407_v6, %v417_v1  ;;  %v594_v62 = vrot.slane %v593_v41, 4  ;;  %v5048_v37 = vrot.slane %v1167_v30, 9  ;;  %v8893_v45 = vrot.slane %v6323_v32, 5 }
  0x66   : > { %v604_v25 = vrot.slane %v603_v52, 4  ;;  %v1220_v53 = vsel %vm6613_vm7, %v5047_v59, %v1219_v34  ;;  %v1221_v36 = vrot.slane %v1219_v34, 4  ;;  %v8895_v30 = vrot.slane %v6330_v43, 5  ;;  %v1170_v34 = vld [vmem:[%s6269_s30 + $0x30] sm:$0xe] }
  0x67   : > { %v1228_v35 = vrot.slane %v8893_v45, 4  ;;  %5694 = vmatmul.mubr.msk.bf16.gmra.mxu0 %vm660_vm3, %v4990_v48  ;;  %v599_v21 = vsel %vm6318_vm4, %v594_v62, %v598_v7  ;;  %v8894_v41 = vmov %v8893_v45  ;;  %v5015_v7 = vcombine.low %v6278_v2, %v6284_v4 }
  0x68   : > { %v1227_v26 = vsel %vm6613_vm7, %v5048_v37, %v8894_v41  ;;  %v609_v6 = vsel %vm6318_vm4, %v604_v25, %v608_v51  ;;  %v5017_v1 = vcombine.low %v6360_v9, %v6365_v17  ;;  %v5049_v59 = vrot.slane %v1168_v19, 9  ;;  %v1172_v41 = vld [vmem:[%s6269_s30 + $0x48] sm:$0xe] }
  0x69   : > { %v1230_v23 = vsel %vm6613_vm7, %v1228_v35, %v8895_v30  ;;  %v4998_v32 = vcombine.low %v599_v21, %v609_v6  ;;  %v8896_v48 = vrot.slane %v6287_v5, 5  ;;  %v1233_v62 = vrot.slane %v6365_v17, 5  ;;  %v1171_v21 = vld [vmem:[%s6269_s30 + $0x3c] sm:$0xe] }
  0x6a   : > { %v1236_v52 = vrot.slane %v6373_v24, 5  ;;  %v5065_v37 = vcombine.low %v1227_v26, %v1230_v23  ;;  %v1240_v2 = vrot.slane %v6406_v8, 5  ;;  %v5050_v5 = vrot.slane %v1169_v28, 9 }
  0x6b   : > { %v1223_v43 = vsel %vm6613_vm7, %v1221_v36, %v8896_v48  ;;  %5710 = vmatmul.mubr.msk.bf16.gmra.mxu1 %vm660_vm3, %v4998_v32  ;;  %v1234_v4 = vsel %vm6613_vm7, %v5049_v59, %v1233_v62  ;;  %v1235_v9 = vrot.slane %v1233_v62, 4  ;;  %v1243_v19 = vrot.slane %v6409_v14, 5  ;;  %v6667_v14 = vld [vmem:[%s8848_s1 + $0x18] sm:$0xf]  ;;  %v1173_v59 = vld [vmem:[%s6269_s30 + $0x54] sm:$0xe] }
  0x6c   : > { %v5064_v51 = vcombine.low %v1220_v53, %v1223_v43  ;;  %5715 = vmatprep.mubr.msk.bf16.mxu1 %vm660_vm3, %v5015_v7  ;;  %v2513_v17 = vsel %vm709_vm0, %v6490_v13, 0  ;;  %v1242_v24 = vrot.slane %v1240_v2, 4  ;;  %v5051_v45 = vrot.slane %v1170_v34, 9 }
  0x6d   : > { %v1247_v35 = vrot.slane %v6443_v3, 5  ;;  %v1237_v25 = vsel %vm6613_vm7, %v1235_v9, %v1236_v52  ;;  %v1250_v53 = vrot.slane %v6449_v22, 5  ;;  %v1787_v26 = vsel %vm709_vm0, %v6470_v54, 0  ;;  %v1174_v9 = vld [vmem:[%s6269_s30 + $0x60] sm:$0xe] }
  0x6e   : > { %5749 = vmatprep.mubr.msk.bf16.mxu0 %vm660_vm3, %v5064_v51  ;;  %v5066_v36 = vcombine.low %v1234_v4, %v1237_v25  ;;  %v1241_v30 = vsel %vm6613_vm7, %v5050_v5, %v1240_v2  ;;  %v1244_v22 = vsel %vm6613_vm7, %v1242_v24, %v1243_v19  ;;  %v1254_v23 = vrot.slane %v6493_v33, 5 }
  0x6f   : > { %5750 = vmatmul.mubr.msk.bf16.vlgmr.msra.gmra.mxu0 %vm660_vm3, %v5065_v37  ;;  %v1249_v13 = vrot.slane %v1247_v35, 4  ;;  %v1248_v28 = vsel %vm6613_vm7, %v5051_v45, %v1247_v35  ;;  %v5052_v7 = vrot.slane %v1171_v21, 9  ;;  %v1261_v54 = vrot.slane %v6532_v61, 5  ;;  %v6693_v37 = vld [vmem:[%s8848_s1 + $0x14] sm:$0xf] }
  0x70   : > { %5816 = vmatpush3.bf16.msra.mxu0 %v2513_v17  ;;  %5753 = vmatprep.mubr.msk.bf16.mxu0 %vm660_vm3, %v5066_v36  ;;  %v1256_v32 = vrot.slane %v1254_v23, 4  ;;  %v1257_v48 = vrot.slane %v6502_v40, 5  ;;  %v5053_v43 = vrot.slane %v1172_v41, 9  ;;  %v1264_v62 = vrot.slane %v6537_v50, 5  ;;  %v1177_v45 = vld [vmem:[%s6269_s30 + $0x84] sm:$0xe] }
  0x71   : > { %v1251_v6 = vsel %vm6613_vm7, %v1249_v13, %v1250_v53  ;;  %5994 = vmatprep.subr.msk.bf16.mxu0 %vm709_vm0, %v6667_v14  ;;  %v5067_v52 = vcombine.low %v1241_v30, %v1244_v22  ;;  %v1263_v34 = vrot.slane %v1261_v54, 4  ;;  %v1268_v51 = vrot.slane %v6572_v47, 5  ;;  %v1178_v30 = vld [vmem:[%s6269_s30 + $0x90] sm:$0xe] }
  0x72   : > { %v5068_v2 = vcombine.low %v1248_v28, %v1251_v6  ;;  %v5054_v4 = vrot.slane %v1173_v59, 9  ;;  %v1271_v40 = vrot.slane %v6577_v20, 5  ;;  %v1278_v50 = vrot.slane %v6301_v16, 5 }
  0x73   : > { %5716 = vmatmul.mubr.msk.bf16.vlgmr.msra.gmra.mxu1 %vm660_vm3, %v5016_v38  ;;  %v5018_v5 = vcombine.low %v6398_v56, %v6406_v8  ;;  %v5019_v19 = vcombine.low %v6437_v57, %v6443_v3  ;;  %v1270_v17 = vrot.slane %v1268_v51, 4  ;;  %v1255_v38 = vsel %vm6613_vm7, %v5052_v7, %v1254_v23  ;;  %v1181_v23 = vld [vmem:[%s6269_s30 + $0xb4] sm:$0xe] }
  0x74   : > { %5782 = vmatpush3.bf16.msra.mxu1 %v1787_v26  ;;  %5719 = vmatprep.mubr.msk.bf16.mxu1 %vm660_vm3, %v5017_v1  ;;  %v1258_v24 = vsel %vm6613_vm7, %v1256_v32, %v1257_v48  ;;  %v1262_v20 = vsel %vm6613_vm7, %v5053_v43, %v1261_v54  ;;  %v1265_v16 = vsel %vm6613_vm7, %v1263_v34, %v1264_v62  ;;  %v1175_v1 = vld [vmem:[%s6269_s30 + $0x6c] sm:$0xe]  ;;  %v5055_v3 = vrot.slane %v1174_v9, 9  ;;  %v1179_v48 = vld [vmem:[%s6269_s30 + $0x9c] sm:$0xe] }
  0x75   : > { %5993 = vmatprep.subr.msk.bf16.mxu1 %vm709_vm0, %v6693_v37  ;;  %v5020_v56 = vcombine.low %v6485_v11, %v6493_v33  ;;  %v5021_v8 = vcombine.low %v6529_v42, %v6532_v61  ;;  %v5022_v57 = vcombine.low %v6566_v10, %v6572_v47  ;;  %v6726_v35 = vsel %vm6613_vm7, %v5054_v4, %v1268_v51  ;;  %v8898_v4 = vld [vmem:[#allocation9_spill] sm:$0xff] }
  0x76   : > { %v6730_v21 = vsel %vm6613_vm7, %v1270_v17, %v1271_v40  ;;  %v5023_v25 = vcombine.low %v6295_v12, %v6298_v15  ;;  %v1275_v53 = vrot.slane %v6298_v15, 5  ;;  %v5069_v36 = vcombine.low %v1255_v38, %v1258_v24  ;;  %v1176_v17 = vld [vmem:[%s6269_s30 + $0x78] sm:$0xe]  ;;  %v6887_v10 = vld [vmem:[%s6269_s30 + $0x2c] sm:$0x1] }
  0x77   : > { %5754 = vmatmul.mubr.msk.bf16.gmra.mxu0 %vm660_vm3, %v5067_v52  ;;  %v5070_v13 = vcombine.low %v1262_v20, %v1265_v16  ;;  %v5056_v41 = vrot.slane %v1175_v1, 9  ;;  %v1282_v26 = vrot.slane %v6348_v60, 5  ;;  %v5058_v28 = vrot.slane %v1177_v45, 9  ;;  %v8899_v24 = vld [vmem:[#allocation11_spill] sm:$0xff]  ;;  %v8901_v16 = vld [vmem:[#allocation12_spill] sm:$0xff] }
  0x78   : > { %5757 = vmatprep.mubr.msk.bf16.mxu0 %vm660_vm3, %v5068_v2  ;;  %v1296_v6 = vrot.slane %v6423_v39, 5  ;;  %v5071_v7 = vcombine.low %v6726_v35, %v6730_v21  ;;  %v6746_v54 = vsel %vm6613_vm7, %v5055_v3, %v1275_v53  ;;  %v1285_v59 = vrot.slane %v6355_v0, 5  ;;  %v8897_v2 = vld [vmem:[#allocation10_spill] sm:$0xff]  ;;  %v6855_v1 = vld [vmem:[%s6269_s30 + $0x28] sm:$0xf] }
  0x79   : > { %v1277_v43 = vrot.slane %v1275_v53, 4  ;;  %v1299_v34 = vrot.slane %v6432_v49, 5  ;;  %v1284_v51 = vrot.slane %v1282_v26, 4  ;;  %v5059_v40 = vrot.slane %v1178_v30, 9  ;;  %v8900_v49 = vld [vmem:[#allocation13_spill] sm:$0xff] }
  0x7a   : > { %v6755_v62 = vsel %vm6613_vm7, %v5058_v28, %v1296_v6  ;;  %v1298_v52 = vrot.slane %v1296_v6, 4  ;;  %v1303_v9 = vrot.slane %v8897_v2, 5  ;;  %v1306_v20 = vrot.slane %v8899_v24, 5  ;;  %v8902_v6 = vld [vmem:[#allocation14_spill] sm:$0xff] }
  0x7b   : > { %5720 = vmatmul.mubr.msk.bf16.gmra.mxu1 %vm660_vm3, %v5018_v5  ;;  %v1289_v5 = vrot.slane %v6388_v44, 5  ;;  %v5060_v53 = vrot.slane %v1179_v48, 9  ;;  %v1279_v30 = vsel %vm6613_vm7, %v1277_v43, %v1278_v50  ;;  %v1310_v28 = vrot.slane %v8900_v49, 5  ;;  %v5161_v48 = vld [vmem:[%s6269_s30 + $0xc] sm:$0xf]  ;;  %v8905_v50 = vld [vmem:[#allocation8_spill] sm:$0xff] }
  0x7c   : > { %5723 = vmatprep.mubr.msk.bf16.mxu1 %vm660_vm3, %v5019_v19  ;;  %v6766_v38 = vsel %vm6613_vm7, %v1298_v52, %v1299_v34  ;;  %v6776_v45 = vsel %vm6613_vm7, %v5059_v40, %v1303_v9  ;;  %v1305_v3 = vrot.slane %v1303_v9, 4  ;;  %v1313_v52 = vrot.slane %v8902_v6, 5  ;;  %v8904_v34 = vld [vmem:[#allocation15_spill] sm:$0xff]  ;;  %v1180_v19 = vld [vmem:[%s6269_s30 + $0xa8] sm:$0xe] }
  0x7d   : > { %v6788_v40 = vsel %vm6613_vm7, %v5056_v41, %v1282_v26  ;;  %v5057_v9 = vrot.slane %v1176_v17, 9  ;;  %v6798_v43 = vld [vmem:[%s6269_s30 + $0x10] sm:$0xf]  ;;  %v6802_v6 = vsel %vm6613_vm7, %v1284_v51, %v1285_v59  ;;  %v6808_v26 = vsel %vm6613_vm7, %v5060_v53, %v1310_v28 }
  0x7e   : > { %v1312_v17 = vrot.slane %v1310_v28, 4  ;;  %v1292_v24 = vrot.slane %v8905_v50, 5  ;;  %v2031_v51 = vshrl.u32 %v5161_v48, 16  ;;  %v2034_v53 = vshll.u32 %v5161_v48, 16  ;;  %v6838_v50 = vld [vmem:[%s6269_s30 + $0x1c] sm:$0xf] }
  0x7f   : > { %5758 = vmatmul.mubr.msk.bf16.gmra.mxu0 %vm660_vm3, %v5069_v36  ;;  %v8903_v36 = vld [vmem:[#allocation16_spill] sm:$0xff]  ;;  %v5073_v11 = vcombine.low %v6788_v40, %v6802_v6  ;;  %v1290_v33 = vsel %vm6613_vm7, %v5057_v9, %v1289_v5  ;;  %v5061_v28 = vrot.slane %v1180_v19, 9  ;;  %v8906_v48 = vld [vmem:[#allocation17_spill] sm:$0xff]  ;;  %v1324_v61 = vrot.slane %v6590_v63, 5  ;;  %v5166_v9 = vld [vmem:[%s6269_s30 + $0x20] sm:$0x1] }
  0x80   : > { %5761 = vmatprep.mubr.msk.bf16.mxu0 %vm660_vm3, %v5070_v13  ;;  %v6792_v13 = vsel %vm6613_vm7, %v1305_v3, %v1306_v20  ;;  %v5072_v20 = vcombine.low %v6746_v54, %v1279_v30  ;;  %v1291_v3 = vrot.slane %v1289_v5, 4  ;;  %v1317_v0 = vrot.slane %v8903_v36, 5  ;;  %v5164_v30 = vld [vmem:[%s6269_s30 + $0x18] sm:$0xf]  ;;  %v5170_v15 = vld [vmem:[%s6269_s30 + $0x30] sm:$0xf] }
  0x81   : > { %v6820_v59 = vsel %vm6613_vm7, %v1312_v17, %v1313_v52  ;;  %v2040_v54 = vshll.u32 %v6798_v43, 16  ;;  %v6835_v52 = vld [vmem:[%s6269_s30 + $0x14] sm:$0x1]  ;;  %v1320_v42 = vrot.slane %v8906_v48, 5  ;;  %v2036_v17 = vrot.slane %v2034_v53, 5 }
  0x82   : > { %v1319_v5 = vrot.slane %v1317_v0, 4  ;;  %v5062_v40 = vrot.slane %v1181_v23, 9  ;;  %v2044_v19 = vshrl.u32 %v6798_v43, 16  ;;  %v2055_v6 = vshrl.u32 %v5164_v30, 16  ;;  %v5167_v53 = vld [vmem:[%s6269_s30 + $0x24] sm:$0xf] }
  0x83   : > { %5724 = vmatmul.mubr.msk.bf16.gmra.mxu1 %vm660_vm3, %v5020_v56  ;;  %v1293_v48 = vsel %vm6613_vm7, %v1291_v3, %v1292_v24  ;;  %v6851_v41 = vrot.slane %v2040_v54, 5  ;;  %v1327_v35 = vrot.slane %v6599_v18, 5  ;;  %v2064_v23 = vshll.u32 %v6838_v50, 16 }
  0x84   : > { %5727 = vmatprep.mubr.msk.bf16.mxu1 %vm660_vm3, %v5021_v8  ;;  %v2033_v8 = vrot.slane %v2031_v51, 4  ;;  %v2058_v51 = vshll.u32 %v5164_v30, 16  ;;  %v2046_v21 = vrot.slane %v2044_v19, 4  ;;  %v1326_v32 = vrot.slane %v1324_v61, 4 }
  0x85   : > { %v2057_v22 = vrot.slane %v2055_v6, 4  ;;  %v5074_v3 = vcombine.low %v1290_v33, %v1293_v48  ;;  %v6863_v54 = vsel %vm6613_vm7, %v5061_v28, %v1317_v0  ;;  %v6867_v30 = vsel %vm6613_vm7, %v1319_v5, %v1320_v42  ;;  %v5173_v48 = vld [vmem:[%s6269_s30 + $0x3c] sm:$0xf] }
  0x86   : > { %v2037_v56 = vor.u32 %v2036_v17, %v2033_v8  ;;  %v2060_v24 = vrot.slane %v2058_v51, 5  ;;  %v6871_v18 = vsel %vm6613_vm7, %v5062_v40, %v1324_v61  ;;  %v2047_v0 = vor.u32 %v2046_v21, %v6851_v41 }
  0x87   : > { %5762 = vmatmul.mubr.msk.bf16.gmra.mxu0 %vm660_vm3, %v5071_v7  ;;  %v2068_v7 = vshrl.u32 %v6838_v50, 16  ;;  %v2074_v28 = vshll.u32 %v5166_v9, 16  ;;  %v2079_v8 = vshrl.u32 %v5167_v53, 16  ;;  %v6884_v42 = vrot.slane %v2064_v23, 5 }
  0x88   : > { %5765 = vmatprep.mubr.msk.bf16.mxu0 %vm660_vm3, %v5072_v20  ;;  %v2050_v20 = vshll.u32 %v6835_v52, 16  ;;  %v6877_v33 = vrot.slane %v2037_v56, 4  ;;  %v2082_v47 = vshll.u32 %v5167_v53, 16  ;;  %v6892_v56 = vsel %vm6613_vm7, %v1326_v32, %v1327_v35  ;;  %v6909_v32 = vld [vmem:[%s6269_s30 + $0x38] sm:$0x1] }
  0x89   : > { %v2070_v61 = vrot.slane %v2068_v7, 4  ;;  %v2061_v5 = vor.u32 %v2060_v24, %v2057_v22  ;;  %v2092_v12 = vshrl.u32 %v6855_v1, 16  ;;  %v6904_v40 = vsel %vm709_vm0, %v6693_v37, 0 }
  0x8a   : > { %v6894_v17 = vrot.slane %v2050_v20, 5  ;;  %v2081_v19 = vrot.slane %v2079_v8, 4  ;;  %v2084_v9 = vrot.slane %v2082_v47, 5  ;;  %v2048_v22 = vrot.slane %v2047_v0, 4 }
  0x8b   : > { %5728 = vmatmul.mubr.msk.bf16.gmra.mxu1 %vm660_vm3, %v5022_v57  ;;  %v2088_v57 = vshll.u32 %v6855_v1, 16  ;;  %v6913_v51 = vrot.slane %v2074_v28, 5  ;;  %v2094_v53 = vrot.slane %v2092_v12, 4  ;;  %v2043_v37 = vsel %vm6318_vm4, %v6877_v33, %v6851_v41  ;;  %v6931_v41 = vld [vmem:[%s6269_s30 + $0x40] sm:$0xf] }
  0x8c   : > { %5731 = vmatprep.mubr.msk.bf16.mxu1 %vm660_vm3, %v5023_v25  ;;  %v6899_v25 = vld [vmem:[%s6269_s30 + $0x34] sm:$0xf]  ;;  %v2071_v35 = vor.u32 %v2070_v61, %v6884_v42  ;;  %v2103_v21 = vshrl.u32 %v5170_v15, 16  ;;  %v2106_v23 = vshll.u32 %v5170_v15, 16  ;;  %v6924_v7 = vrot.slane %v2061_v5, 4 }
  0x8d   : > { %v6906_v6 = vrot.slane %v2088_v57, 5  ;;  %v2098_v20 = vshll.u32 %v6887_v10, 16  ;;  %v2112_v24 = vshll.u32 %v6899_v25, 16  ;;  %v8907_v33 = vcombine.low %v6335_v46, %v6348_v60  ;;  %v5176_v12 = vld [vmem:[%s6269_s30 + $0x48] sm:$0xf] }
  0x8e   : > { %v2105_v28 = vrot.slane %v2103_v21, 4  ;;  %v2108_v8 = vrot.slane %v2106_v23, 5  ;;  %v2122_v57 = vshll.u32 %v6909_v32, 16  ;;  %v2127_v5 = vshrl.u32 %v5173_v48, 16 }
  0x8f   : > { %5766 = vmatmul.mubr.msk.bf16.gmra.mxu0 %vm660_vm3, %v5073_v11  ;;  %v6917_v11 = vsel %vm709_vm0, %v6667_v14, 0  ;;  %v2116_v14 = vshrl.u32 %v6899_v25, 16  ;;  %v2095_v0 = vor.u32 %v2094_v53, %v6906_v6  ;;  %v6937_v61 = vrot.slane %v2112_v24, 5 }
  0x90   : > { %5769 = vmatprep.mubr.msk.bf16.mxu0 %vm660_vm3, %v5074_v3  ;;  %v2085_v3 = vor.u32 %v2084_v9, %v2081_v19  ;;  %v8908_v15 = vcombine.low %v6379_v31, %v6388_v44  ;;  %v2053_v19 = vsel %vm6318_vm4, %v2048_v22, %v6894_v17  ;;  %v2072_v46 = vrot.slane %v2071_v35, 4  ;;  %v6949_v9 = vld [vmem:[%s6269_s30 + $0x44] sm:$0x1] }
  0x91   : > { %v2118_v47 = vrot.slane %v2116_v14, 4  ;;  %v2109_v60 = vor.u32 %v2108_v8, %v2105_v28  ;;  %v2130_v53 = vshll.u32 %v5173_v48, 16  ;;  %v2100_v21 = vrot.slane %v2098_v20, 5 }
  0x92   : > { %v2129_v24 = vrot.slane %v2127_v5, 4  ;;  %v2136_v14 = vshll.u32 %v6931_v41, 16  ;;  %v8909_v31 = vcombine.low %v6755_v62, %v6766_v38  ;;  %v2086_v44 = vrot.slane %v2085_v3, 4  ;;  %v5179_v5 = vld [vmem:[%s6269_s30 + $0x54] sm:$0xf] }
  0x93   : > { %5732 = vmatmul.mubr.msk.bf16.gmra.mxu1 %vm660_vm3, %v8907_v33  ;;  %v2119_v23 = vor.u32 %v2118_v47, %v6937_v61  ;;  %v6954_v33 = vld [vmem:[%s6269_s30 + $0x4c] sm:$0xf]  ;;  %v2096_v17 = vrot.slane %v2095_v0, 4  ;;  %v2132_v22 = vrot.slane %v2130_v53, 5  ;;  %v2140_v48 = vshrl.u32 %v6931_v41, 16 }
  0x94   : > { %5735 = vmatprep.mubr.msk.bf16.mxu1 %vm660_vm3, %v8908_v15  ;;  %v8910_v35 = vcombine.low %v6776_v45, %v6792_v13  ;;  %v2110_v20 = vrot.slane %v2109_v60, 4  ;;  %v2124_v28 = vrot.slane %v2122_v57, 5  ;;  %v6965_v8 = vrot.slane %v2136_v14, 5  ;;  %v6974_v60 = vld [vmem:[%s6269_s30 + $0x50] sm:$0x1] }
  0x95   : > { %v2151_v47 = vshrl.u32 %v5176_v12, 16  ;;  %v5078_v62 = vcombine.low %v6863_v54, %v6867_v30  ;;  %v5079_v38 = vcombine.low %v6871_v18, %v6892_v56  ;;  %v2142_v3 = vrot.slane %v2140_v48, 4  ;;  %v6063_v56 = vld [vmem:[%s6269_s30 + $0xc] sm:$0xff]  }
  0x96   : > { %v2154_v0 = vshll.u32 %v5176_v12, 16  ;;  %v2120_v15 = vrot.slane %v2119_v23, 4  ;;  %v2133_v45 = vor.u32 %v2132_v22, %v2129_v24  ;;  %v2146_v13 = vshll.u32 %v6949_v9, 16  ;;  %v6993_v23 = vld [vmem:[%s6269_s30 + $0x58] sm:$0xf] }
  0x97   : > { %5770 = vmatmul.mubr.msk.bf16.gmra.mxu0 %vm660_vm3, %v8909_v31  ;;  %v2153_v57 = vrot.slane %v2151_v47, 4  ;;  %v6976_v53 = vcombine.low %v2043_v37, %v2053_v19  ;;  %v2143_v14 = vor.u32 %v2142_v3, %v6965_v8  ;;  %v2160_v54 = vshll.u32 %v6954_v33, 16  ;;  %v5182_v22 = vld [vmem:[%s6269_s30 + $0x60] sm:$0xf]  ;;  %v7009_v3 = vld [vmem:[%s6269_s30 + $0x5c] sm:$0x1] }
  0x98   : > { %5773 = vmatprep.mubr.msk.bf16.mxu0 %vm660_vm3, %v8910_v35  ;;  %v2156_v31 = vrot.slane %v2154_v0, 5  ;;  %v8911_v30 = vcombine.low %v6415_v29, %v6423_v39  ;;  %v2067_v12 = vsel %vm6318_vm4, %v6924_v7, %v6884_v42  ;;  %v2077_v37 = vsel %vm6318_vm4, %v2072_v46, %v6913_v51 }
  0x99   : > { %v2164_v19 = vshrl.u32 %v6954_v33, 16  ;;  %v2175_v24 = vshrl.u32 %v5179_v5, 16  ;;  %v8912_v29 = vcombine.low %v8898_v4, %v8897_v2  ;;  %v2091_v39 = vsel %vm6318_vm4, %v2086_v44, %v6906_v6  ;;  %v7012_v2 = vld [vmem:[%s6269_s30 + $0x64] sm:$0xf] }
  0x9a   : > { %v2101_v42 = vsel %vm6318_vm4, %v2096_v17, %v2100_v21  ;;  %v2157_v7 = vor.u32 %v2156_v31, %v2153_v57  ;;  %v2178_v51 = vshll.u32 %v5179_v5, 16  ;;  %v2115_v46 = vsel %vm6318_vm4, %v2110_v20, %v6937_v61 }
  0x9b   : > { %5736 = vmatmul.mubr.msk.bf16.gmra.mxu1 %vm660_vm3, %v8911_v30  ;;  %v2134_v48 = vrot.slane %v2133_v45, 4  ;;  %v2144_v35 = vrot.slane %v2143_v14, 4  ;;  %v2148_v47 = vrot.slane %v2146_v13, 5  ;;  %v8913_v4 = vcombine.low %v6808_v26, %v6820_v59 }
  0x9c   : > { %5739 = vmatprep.mubr.msk.bf16.mxu1 %vm660_vm3, %v8912_v29  ;;  %v2125_v6 = vsel %vm6318_vm4, %v2120_v15, %v2124_v28  ;;  %v7020_v21 = vrot.slane %v2160_v54, 5  ;;  %v2166_v44 = vrot.slane %v2164_v19, 4  ;;  %v2170_v61 = vshll.u32 %v6974_v60, 16 }
  0x9d   : > { %v2177_v17 = vrot.slane %v2175_v24, 4  ;;  %v2180_v20 = vrot.slane %v2178_v51, 5  ;;  %v2184_v5 = vshll.u32 %v6993_v23, 16  ;;  %v2188_v26 = vshrl.u32 %v6993_v23, 16 }
  0x9e   : > { %v7026_v59 = vcombine.low %v2067_v12, %v2077_v37  ;;  %v7028_v0 = vcombine.low %v2091_v39, %v2101_v42  ;;  %v7030_v28 = vrot.slane %v2157_v7, 4  ;;  %v2199_v15 = vshrl.u32 %v5182_v22, 16  ;;  %v5185_v12 = vld [vmem:[%s6269_s30 + $0x6c] sm:$0xf]  ;;  %v7045_v37 = vld [vmem:[%s6269_s30 + $0x70] sm:$0xf] }
  0x9f   : > { %5774 = vmatmul.mubr.msk.bf16.gmra.mxu0 %vm660_vm3, %v8913_v4  ;;  %v2149_v45 = vsel %vm6318_vm4, %v2144_v35, %v2148_v47  ;;  %v2202_v13 = vshll.u32 %v5182_v22, 16  ;;  %v2208_v57 = vshll.u32 %v7012_v2, 16  ;;  %v7038_v14 = vcombine.low %v2115_v46, %v2125_v6  ;;  %v7056_v39 = vld [vmem:[%s6269_s30 + $0x68] sm:$0x1]  ;;  %v7069_v46 = vld [vmem:[%s6269_s30 + $0x74] sm:$0x1] }
  0xa0   : > { %5777 = vmatprep.mubr.msk.bf16.mxu0 %vm660_vm3, %v5078_v62  ;;  %v2139_v62 = vsel %vm6318_vm4, %v2134_v48, %v6965_v8  ;;  %v2167_v31 = vor.u32 %v2166_v44, %v7020_v21  ;;  %v2194_v54 = vshll.u32 %v7009_v3, 16  ;;  %v2212_v30 = vshrl.u32 %v7012_v2, 16  ;;  %v5188_v48 = vld [vmem:[%s6269_s30 + $0x78] sm:$0xf] }
  0xa1   : > { %v8914_v8 = vcombine.low %v8901_v16, %v8900_v49  ;;  %v7051_v19 = vrot.slane %v2170_v61, 5  ;;  %v2181_v24 = vor.u32 %v2180_v20, %v2177_v17  ;;  %v7053_v22 = vrot.slane %v2184_v5, 5 }
  0xa2   : > { %v2190_v29 = vrot.slane %v2188_v26, 4  ;;  %v8915_v42 = vcombine.low %v8904_v34, %v8903_v36  ;;  %v7062_v7 = vcombine.low %v2139_v62, %v2149_v45  ;;  %v2163_v49 = vsel %vm6318_vm4, %v7030_v28, %v7020_v21  ;;  %v7075_v34 = vld [vmem:[%s6269_s30 + $0x7c] sm:$0xf] }
  0xa3   : > { %5740 = vmatmul.mubr.msk.bf16.gmra.mxu1 %vm660_vm3, %v8914_v8  ;;  %v2201_v16 = vrot.slane %v2199_v15, 4  ;;  %v2204_v51 = vrot.slane %v2202_v13, 5  ;;  %v7072_v35 = vrot.slane %v2208_v57, 5  ;;  %v2214_v47 = vrot.slane %v2212_v30, 4 }
  0xa4   : > { %5743 = vmatprep.mubr.msk.bf16.mxu1 %vm660_vm3, %v8915_v42  ;;  %v2223_v4 = vshrl.u32 %v5185_v12, 16  ;;  %v2226_v36 = vshll.u32 %v5185_v12, 16  ;;  %v7081_v6 = vrot.slane %v2167_v31, 4  ;;  %v7083_v44 = vrot.slane %v2194_v54, 5  ;;  %v7144_v42 = vld [vmem:[%s6269_s30 + $0x94] sm:$0xf] }
  0xa5   : > { %v2232_v61 = vshll.u32 %v7045_v37, 16  ;;  %v2236_v17 = vshrl.u32 %v7045_v37, 16  ;;  %v7089_v20 = vrot.slane %v2181_v24, 4  ;;  %v2191_v5 = vor.u32 %v2190_v29, %v7053_v22  ;;  %v5191_v24 = vld [vmem:[%s6269_s30 + $0x84] sm:$0xf]  ;;  %8918 = vst [vmem:[#allocation9_spill] sm:$0xff] %v7144_v42 }
  0xa6   : > { %v2225_v26 = vrot.slane %v2223_v4, 4  ;;  %v2228_v18 = vrot.slane %v2226_v36, 5  ;;  %v2218_v15 = vshll.u32 %v7056_v39, 16  ;;  %v2215_v13 = vor.u32 %v2214_v47, %v7072_v35  ;;  %v7116_v47 = vld [vmem:[%s6269_s30 + $0x88] sm:$0xf] }
  0xa7   : > { %5778 = vmatmul.mubr.msk.bf16.gmra.mxu0 %vm660_vm3, %v5079_v38  ;;  %v2205_v38 = vor.u32 %v2204_v51, %v2201_v16  ;;  %v7094_v62 = vrot.slane %v2232_v61, 5  ;;  %v2238_v45 = vrot.slane %v2236_v17, 4  ;;  %v2242_v57 = vshll.u32 %v7069_v46, 16 }
  0xa8   : > { %5817 = vmatprep.mubr.msk.bf16.mxu0 %vm660_vm3, %v6976_v53  ;;  %v2247_v53 = vshrl.u32 %v5188_v48, 16  ;;  %v2250_v31 = vshll.u32 %v5188_v48, 16  ;;  %v2173_v54 = vsel %vm6318_vm4, %v7081_v6, %v7051_v19  ;;  %v2229_v30 = vor.u32 %v2228_v18, %v2225_v26 }
  0xa9   : > { %v2239_v12 = vor.u32 %v2238_v45, %v7094_v62  ;;  %v2256_v8 = vshll.u32 %v7075_v34, 16  ;;  %v8916_v29 = vcombine.low %v6587_v55, %v6590_v63  ;;  %v7113_v16 = vrot.slane %v2191_v5, 4  ;;  %v7124_v63 = vld [vmem:[%s6269_s30 + $0x80] sm:$0x1] }
  0xaa   : > { %v2249_v51 = vrot.slane %v2247_v53, 4  ;;  %v2252_v48 = vrot.slane %v2250_v31, 5  ;;  %v7119_v4 = vrot.slane %v2205_v38, 4  ;;  %v7121_v55 = vrot.slane %v2218_v15, 5 }
  0xab   : > { %5744 = vmatmul.mubr.msk.bf16.gmra.mxu1 %vm660_vm3, %v8916_v29  ;;  %v7126_v36 = vrot.slane %v2256_v8, 5  ;;  %v2260_v61 = vshrl.u32 %v7075_v34, 16  ;;  %v2216_v17 = vrot.slane %v2215_v13, 4  ;;  %v2244_v5 = vrot.slane %v2242_v57, 5  ;;  %v5194_v13 = vld [vmem:[%s6269_s30 + $0x90] sm:$0xf] }
  0xac   : > { %5783 = vmatprep.mubr.msk.bf16.mxu1 %vm660_vm3, %v6063_v56  ;;  %v2271_v26 = vshrl.u32 %v5191_v24, 16  ;;  %v2274_v18 = vshll.u32 %v5191_v24, 16  ;;  %v7132_v56 = vld [vmem:[%s8848_s1 + $0x20] sm:$0xf]  ;;  %v2230_v38 = vrot.slane %v2229_v30, 4  ;;  %v2240_v15 = vrot.slane %v2239_v12, 4 }
  0xad   : > { %8917 = vst [vmem:[#allocation10_spill] sm:$0xff] %v7132_v56  ;;  %v2262_v45 = vrot.slane %v2260_v61, 4  ;;  %v2280_v53 = vshll.u32 %v7116_v47, 16  ;;  %v6064_v57 = vld [vmem:[%s6269_s30 + $0x18] sm:$0xff]   ;;  %v2253_v31 = vor.u32 %v2252_v48, %v2249_v51  ;;  %v2266_v8 = vshll.u32 %v7124_v63, 16 }
  0xae   : > { %v2273_v24 = vrot.slane %v2271_v26, 4  ;;  %v2276_v29 = vrot.slane %v2274_v18, 5  ;;  %v2197_v30 = vsel %vm6318_vm4, %v7113_v16, %v7083_v44  ;;  %v2284_v12 = vshrl.u32 %v7116_v47, 16  ;;  %v7160_v51 = vld [vmem:[%s6269_s30 + $0x8c] sm:$0x1] }
  0xaf   : > { %5818 = vmatmul.mubr.msk.bf16.vlgmr.msra.gmra.mxu0 %vm660_vm3, %v7026_v59  ;;  %v6065_v59 = vld [vmem:[%s6269_s30 + $0x24] sm:$0xff]   ;;  %8919 = vst [vmem:[#allocation11_spill] sm:$0xff] %v7160_v51  ;;  %v7162_v61 = vrot.slane %v2280_v53, 5  ;;  %v2295_v26 = vshrl.u32 %v5194_v13, 16  ;;  %v2298_v44 = vshll.u32 %v5194_v13, 16  ;;  %v2221_v16 = vsel %vm6318_vm4, %v2216_v17, %v7121_v55 }
  0xb0   : > { %5884 = vmatpush3.bf16.msra.mxu0 %v6917_v11  ;;  %5821 = vmatprep.mubr.msk.bf16.mxu0 %vm660_vm3, %v7028_v0  ;;  %v2211_v11 = vsel %vm6318_vm4, %v7119_v4, %v7072_v35  ;;  %v2263_v0 = vor.u32 %v2262_v45, %v7126_v36  ;;  %v2277_v48 = vor.u32 %v2276_v29, %v2273_v24  ;;  %v2286_v4 = vrot.slane %v2284_v12, 4  ;;  %v7174_v45 = vld [vmem:[%s8848_s1 + $0x1c] sm:$0xf]  ;;  %v7191_v12 = vld [vmem:[%s6269_s30 + $0xa0] sm:$0xf] }
  0xb1   : > { %5996 = vmatprep.subr.msk.bf16.mxu0 %vm709_vm0, %v7132_v56  ;;  %v2235_v35 = vsel %vm6318_vm4, %v2230_v38, %v7094_v62  ;;  %v2304_v18 = vshll.u32 %v7144_v42, 16  ;;  %8920 = vst [vmem:[#allocation13_spill] sm:$0xff] %v7174_v45  ;;  %v2245_v53 = vsel %vm6318_vm4, %v2240_v15, %v2244_v5  ;;  %v7179_v55 = vrot.slane %v2253_v31, 4  ;;  %v5197_v38 = vld [vmem:[%s6269_s30 + $0x9c] sm:$0xf]  ;;  %8921 = vst [vmem:[#allocation12_spill] sm:$0xff] %v7191_v12 }
  0xb2   : > { %v7181_v17 = vrot.slane %v2266_v8, 5  ;;  %v2308_v62 = vshrl.u32 %v7144_v42, 16  ;;  %v7187_v13 = vrot.slane %v2263_v0, 4  ;;  %v2290_v24 = vshll.u32 %v7160_v51, 16  ;;  %v7197_v31 = vld [vmem:[%s6269_s30 + $0x98] sm:$0x1] }
  0xb3   : > { %5784 = vmatmul.mubr.msk.bf16.vlgmr.msra.gmra.mxu1 %vm660_vm3, %v6064_v57  ;;  %v2297_v57 = vrot.slane %v2295_v26, 4  ;;  %v2300_v29 = vrot.slane %v2298_v44, 5  ;;  %v7193_v5 = vrot.slane %v2277_v48, 4  ;;  %v2287_v15 = vor.u32 %v2286_v4, %v7162_v61  ;;  %8922 = vst [vmem:[#allocation14_spill] sm:$0xff] %v7197_v31  ;;  %v6066_v44 = vld [vmem:[%s6269_s30 + $0x30] sm:$0xff]  }
  0xb4   : > { %5850 = vmatpush3.bf16.msra.mxu1 %v6904_v40  ;;  %5787 = vmatprep.mubr.msk.bf16.mxu1 %vm660_vm3, %v6065_v59  ;;  %v7199_v40 = vrot.slane %v2304_v18, 5  ;;  %v2310_v8 = vrot.slane %v2308_v62, 4  ;;  %v5215_v59 = vcombine.low %v2163_v49, %v2173_v54  ;;  %v8923_v0 = vsel %vm6318_vm4, %v7089_v20, %v7053_v22  ;;  %v5200_v49 = vld [vmem:[%s6269_s30 + $0xa8] sm:$0xf]  ;;  %v6067_v22 = vld [vmem:[%s6269_s30 + $0x3c] sm:$0xff]  }
  0xb5   : > { %5995 = vmatprep.subr.msk.bf16.mxu1 %vm709_vm0, %v7174_v45  ;;  %v5216_v48 = vcombine.low %v8923_v0, %v2197_v30  ;;  %v2319_v26 = vshrl.u32 %v5197_v38, 16  ;;  %v7223_v19 = vcombine.low %v2211_v11, %v2221_v16  ;;  %v7225_v6 = vcombine.low %v2235_v35, %v2245_v53  ;;  %v7239_v11 = vld [vmem:[%s6269_s30 + $0xac] sm:$0xf]  ;;  %v7253_v53 = vld [vmem:[%s6269_s30 + $0xa4] sm:$0x1] }
  0xb6   : > { %v2328_v21 = vshll.u32 %v7191_v12, 16  ;;  %v2332_v28 = vshrl.u32 %v7191_v12, 16  ;;  %v7235_v54 = vrot.slane %v2290_v24, 5  ;;  %v2314_v30 = vshll.u32 %v7197_v31, 16  ;;  %8924 = vst [vmem:[#allocation16_spill] sm:$0xff] %v7239_v11  ;;  %8925 = vst [vmem:[#allocation15_spill] sm:$0xff] %v7253_v53 }
  0xb7   : > { %5822 = vmatmul.mubr.msk.bf16.gmra.mxu0 %vm660_vm3, %v7038_v14  ;;  %v2322_v14 = vshll.u32 %v5197_v38, 16  ;;  %v7249_v4 = vrot.slane %v2287_v15, 4  ;;  %v2311_v18 = vor.u32 %v2310_v8, %v7199_v40  ;;  %v2321_v62 = vrot.slane %v2319_v26, 4  ;;  %v5203_v8 = vld [vmem:[%s6269_s30 + $0xb4] sm:$0xf] }
  0xb8   : > { %5825 = vmatprep.mubr.msk.bf16.mxu0 %vm660_vm3, %v7062_v7  ;;  %v2301_v7 = vor.u32 %v2300_v29, %v2297_v57  ;;  %v7255_v24 = vrot.slane %v2328_v21, 5  ;;  %v7258_v57 = vld [vmem:[%s6269_s30 + $0xb0] sm:$0x1]  ;;  %v2343_v29 = vshrl.u32 %v5200_v49, 16  ;;  %v2334_v0 = vrot.slane %v2332_v28, 4  ;;  %v6069_v12 = vld [vmem:[%s6269_s30 + $0x54] sm:$0xff]  }
  0xb9   : > { %v2324_v38 = vrot.slane %v2322_v14, 5  ;;  %8926 = vst [vmem:[#allocation8_spill] sm:$0xff] %v7258_v57  ;;  %v2346_v20 = vshll.u32 %v5200_v49, 16  ;;  %v2352_v15 = vshll.u32 %v7239_v11, 16  ;;  %v2356_v35 = vshrl.u32 %v7239_v11, 16  ;;  %v6068_v11 = vld [vmem:[%s6269_s30 + $0x48] sm:$0xff]  }
  0xba   : > { %v7265_v26 = vrot.slane %v2301_v7, 4  ;;  %v7267_v14 = vrot.slane %v2314_v30, 5  ;;  %v2338_v21 = vshll.u32 %v7253_v53, 16  ;;  %v2345_v16 = vrot.slane %v2343_v29, 4  ;;  %v7271_v45 = vld [vmem:[%s6269_s30 + $0xb8] sm:$0xf] }
  0xbb   : > { %5788 = vmatmul.mubr.msk.bf16.gmra.mxu1 %vm660_vm3, %v6066_v44  ;;  %8927 = vst [vmem:[#allocation17_spill] sm:$0xff] %v7271_v45  ;;  %v7273_v44 = vrot.slane %v2311_v18, 4  ;;  %v2348_v28 = vrot.slane %v2346_v20, 5  ;;  %v7275_v49 = vrot.slane %v2352_v15, 5  ;;  %v2358_v56 = vrot.slane %v2356_v35, 4 }
  0xbc   : > { %5791 = vmatprep.mubr.msk.bf16.mxu1 %vm660_vm3, %v6067_v22  ;;  %v2293_v22 = vsel %vm6318_vm4, %v7249_v4, %v7235_v54  ;;  %v2325_v7 = vor.u32 %v2324_v38, %v2321_v62  ;;  %v2367_v30 = vshrl.u32 %v5203_v8, 16  ;;  %v2370_v29 = vshll.u32 %v5203_v8, 16  ;;  %v7287_v35 = vld [vmem:[%s6269_s30 + $0xbc] sm:$0x1]  ;;  %v5206_v53 = vld [vmem:[%s6269_s30 + $0xc0] sm:$0xf] }
  0xbd   : > { %v2335_v20 = vor.u32 %v2334_v0, %v7255_v24  ;;  %v2349_v18 = vor.u32 %v2348_v28, %v2345_v16  ;;  %v2362_v15 = vshll.u32 %v7258_v57, 16  ;;  %v2359_v31 = vor.u32 %v2358_v56, %v7275_v49  ;;  %v7295_v38 = vld [vmem:[%s6269_s30 + $0xc4] sm:$0xf]  ;;  %v7308_v42 = vld [vmem:[%s6269_s30 + $0xc8] sm:$0x1] }
  0xbe   : > { %v2369_v54 = vrot.slane %v2367_v30, 4  ;;  %v2372_v4 = vrot.slane %v2370_v29, 5  ;;  %v2380_v62 = vshrl.u32 %v7271_v45, 16  ;;  %v2317_v16 = vsel %vm6318_vm4, %v7273_v44, %v7267_v14 }
  0xbf   : > { %5826 = vmatmul.mubr.msk.bf16.gmra.mxu0 %vm660_vm3, %v5215_v59  ;;  %v2376_v59 = vshll.u32 %v7271_v45, 16  ;;  %v2340_v0 = vrot.slane %v2338_v21, 5  ;;  %v2386_v30 = vshll.u32 %v7287_v35, 16  ;;  %v2391_v29 = vshrl.u32 %v5206_v53, 16 }
  0xc0   : > { %5829 = vmatprep.mubr.msk.bf16.mxu0 %vm660_vm3, %v5216_v48  ;;  %v2307_v48 = vsel %vm6318_vm4, %v7265_v26, %v7199_v40  ;;  %v2373_v56 = vor.u32 %v2372_v4, %v2369_v54  ;;  %v2382_v28 = vrot.slane %v2380_v62, 4  ;;  %v2326_v45 = vrot.slane %v2325_v7, 4 }
  0xc1   : > { %v2378_v8 = vrot.slane %v2376_v59, 5  ;;  %v2336_v57 = vrot.slane %v2335_v20, 4  ;;  %v2394_v51 = vshll.u32 %v5206_v53, 16  ;;  %v2400_v40 = vshll.u32 %v7295_v38, 16 }
  0xc2   : > { %v2350_v26 = vrot.slane %v2349_v18, 4  ;;  %v2360_v14 = vrot.slane %v2359_v31, 4  ;;  %v2364_v21 = vrot.slane %v2362_v15, 5  ;;  %v2393_v59 = vrot.slane %v2391_v29, 4  ;;  %v6071_v15 = vld [vmem:[%s6269_s30 + $0x6c] sm:$0xff]  }
  0xc3   : > { %5792 = vmatmul.mubr.msk.bf16.gmra.mxu1 %vm660_vm3, %v6068_v11  ;;  %v2383_v44 = vor.u32 %v2382_v28, %v2378_v8  ;;  %v2396_v54 = vrot.slane %v2394_v51, 5  ;;  %v2402_v4 = vrot.slane %v2400_v40, 5  ;;  %v2404_v11 = vshrl.u32 %v7295_v38, 16  ;;  %v5244_v29 = vld [vmem:[%s6269_s30 + $0x24] sm:$0xe] }
  0xc4   : > { %5795 = vmatprep.mubr.msk.bf16.mxu1 %vm660_vm3, %v6069_v12  ;;  %v2374_v53 = vrot.slane %v2373_v56, 4  ;;  %v2388_v20 = vrot.slane %v2386_v30, 5  ;;  %v2410_v62 = vshll.u32 %v7308_v42, 16  ;;  %v6070_v12 = vld [vmem:[%s6269_s30 + $0x60] sm:$0xff]   ;;  %v2331_v51 = vsel %vm6318_vm4, %v2326_v45, %v7255_v24 }
  0xc5   : > { %v2384_v7 = vrot.slane %v2383_v44, 4  ;;  %v2341_v31 = vsel %vm6318_vm4, %v2336_v57, %v2340_v0  ;;  %v2397_v18 = vor.u32 %v2396_v54, %v2393_v59  ;;  %v8928_v56 = vsel %vm6318_vm4, %v7187_v13, %v7181_v17  ;;  %v7346_v17 = vld [vmem:[%s6269_s30 + $0xc] sm:$0xe]  ;;  %v5246_v54 = vld [vmem:[%s6269_s30 + $0x3c] sm:$0xe] }
  0xc6   : > { %v8930_v45 = vsel %vm6318_vm4, %v7193_v5, %v7162_v61  ;;  %v2355_v57 = vsel %vm6318_vm4, %v2350_v26, %v7275_v49  ;;  %v2365_v0 = vsel %vm6318_vm4, %v2360_v14, %v2364_v21  ;;  %v7350_v40 = vcombine.low %v2307_v48, %v2317_v16  ;;  %v5245_v16 = vld [vmem:[%s6269_s30 + $0x30] sm:$0xe] }
  0xc7   : > { %5830 = vmatmul.mubr.msk.bf16.gmra.mxu0 %vm660_vm3, %v7223_v19  ;;  %v2406_v19 = vrot.slane %v2404_v11, 4  ;;  %v5220_v24 = vcombine.low %v8930_v45, %v2293_v22  ;;  %v2398_v13 = vrot.slane %v2397_v18, 4  ;;  %v7352_v61 = vcombine.low %v2331_v51, %v2341_v31  ;;  %v6072_v31 = vld [vmem:[%s6269_s30 + $0x78] sm:$0xff]  }
  0xc8   : > { %5833 = vmatprep.mubr.msk.bf16.mxu0 %vm660_vm3, %v7225_v6  ;;  %v8929_v6 = vsel %vm6318_vm4, %v7179_v55, %v7126_v36  ;;  %v2412_v36 = vrot.slane %v2410_v62, 5  ;;  %v2774_v55 = vrot.slane %v6798_v43, 5  ;;  %v2379_v5 = vsel %vm6318_vm4, %v2374_v53, %v2378_v8 }
  0xc9   : > { %v5219_v28 = vcombine.low %v8929_v6, %v8928_v56  ;;  %v2407_v30 = vor.u32 %v2406_v19, %v2402_v4  ;;  %v2389_v49 = vsel %vm6318_vm4, %v2384_v7, %v2388_v20  ;;  %v7359_v22 = vcombine.low %v2355_v57, %v2365_v0  ;;  %v5247_v20 = vld [vmem:[%s6269_s30 + $0x48] sm:$0xe]  ;;  %v5248_v0 = vld [vmem:[%s6269_s30 + $0x54] sm:$0xe] }
  0xca   : > { %v2403_v26 = vsel %vm6318_vm4, %v2398_v13, %v2402_v4  ;;  %v5258_v48 = vrot.slane %v7346_v17, 9  ;;  %v2777_v8 = vrot.slane %v6835_v52, 5  ;;  %v2781_v21 = vrot.slane %v6838_v50, 5  ;;  %v6073_v56 = vld [vmem:[%s6269_s30 + $0x84] sm:$0xff]   ;;  %v5249_v13 = vld [vmem:[%s6269_s30 + $0x60] sm:$0xe] }
  0xcb   : > { %5796 = vmatmul.mubr.msk.bf16.gmra.mxu1 %vm660_vm3, %v6070_v12  ;;  %v2408_v14 = vrot.slane %v2407_v30, 4  ;;  %v5260_v44 = vrot.slane %v5244_v29, 9  ;;  %v2788_v59 = vrot.slane %v6855_v1, 5  ;;  %v7370_v11 = vcombine.low %v2379_v5, %v2389_v49 }
  0xcc   : > { %5799 = vmatprep.mubr.msk.bf16.mxu1 %vm660_vm3, %v6071_v15  ;;  %v7376_v53 = vrot.slane %v2774_v55, 4  ;;  %v2791_v7 = vrot.slane %v6887_v10, 5  ;;  %v5261_v51 = vrot.slane %v5245_v16, 9  ;;  %v2795_v18 = vrot.slane %v6899_v25, 5 }
  0xcd   : > { %v2413_v4 = vsel %vm6318_vm4, %v2408_v14, %v2412_v36  ;;  %v7385_v1 = vsel %vm6613_vm7, %v5260_v44, %v2788_v59  ;;  %v2790_v12 = vrot.slane %v2788_v59, 4  ;;  %v2798_v10 = vrot.slane %v6909_v32, 5  ;;  %v5250_v14 = vld [vmem:[%s6269_s30 + $0x6c] sm:$0xe] }
  0xce   : > { %v7381_v62 = vcombine.low %v2403_v26, %v2413_v4  ;;  %v5262_v19 = vrot.slane %v5246_v54, 9  ;;  %v2802_v15 = vrot.slane %v6931_v41, 5  ;;  %v5263_v45 = vrot.slane %v5247_v20, 9  ;;  %v5251_v54 = vld [vmem:[%s6269_s30 + $0x78] sm:$0xe] }
  0xcf   : > { %5834 = vmatmul.mubr.msk.bf16.gmra.mxu0 %vm660_vm3, %v5219_v28  ;;  %v7395_v6 = vsel %vm6613_vm7, %v2790_v12, %v2791_v7  ;;  %v2805_v28 = vrot.slane %v6949_v9, 5  ;;  %v2809_v57 = vrot.slane %v6954_v33, 5  ;;  %v7404_v32 = vsel %vm6613_vm7, %v5261_v51, %v2795_v18 }
  0xd0   : > { %5837 = vmatprep.mubr.msk.bf16.mxu0 %vm660_vm3, %v5220_v24  ;;  %v5277_v25 = vcombine.low %v7385_v1, %v7395_v6  ;;  %v2797_v41 = vrot.slane %v2795_v18, 4  ;;  %v7408_v24 = vsel %vm6613_vm7, %v5262_v19, %v2802_v15  ;;  %v2804_v9 = vrot.slane %v2802_v15, 4  ;;  %v6074_v18 = vld [vmem:[%s6269_s30 + $0x90] sm:$0xff]  }
  0xd1   : > { %v7413_v33 = vsel %vm6613_vm7, %v5263_v45, %v2809_v57  ;;  %v2811_v30 = vrot.slane %v2809_v57, 4  ;;  %v2812_v36 = vrot.slane %v6974_v60, 5  ;;  %v5264_v5 = vrot.slane %v5248_v0, 9 }
  0xd2   : > { %v7419_v29 = vsel %vm6613_vm7, %v2797_v41, %v2798_v10  ;;  %v2816_v49 = vrot.slane %v6993_v23, 5  ;;  %v2819_v26 = vrot.slane %v7009_v3, 5  ;;  %v7429_v60 = vsel %vm6613_vm7, %v2804_v9, %v2805_v28 }
  0xd3   : > { %5800 = vmatmul.mubr.msk.bf16.gmra.mxu1 %vm660_vm3, %v6072_v31  ;;  %v5278_v16 = vcombine.low %v7404_v32, %v7419_v29  ;;  %v7433_v44 = vsel %vm6613_vm7, %v2811_v30, %v2812_v36  ;;  %v5265_v59 = vrot.slane %v5249_v13, 9  ;;  %v5279_v23 = vcombine.low %v7408_v24, %v7429_v60  ;;  %v8931_v30 = vld [vmem:[#allocation11_spill] sm:$0xff]  ;;  %v5454_v29 = vld [vmem:[%s6269_s30 + $0x24] sm:$0xe] }
  0xd4   : > { %5803 = vmatprep.mubr.msk.bf16.mxu1 %vm660_vm3, %v6073_v56  ;;  %v5280_v3 = vcombine.low %v7413_v33, %v7433_v44  ;;  %v7442_v4 = vsel %vm6613_vm7, %v5264_v5, %v2816_v49  ;;  %v2818_v7 = vrot.slane %v2816_v49, 4  ;;  %v2823_v20 = vrot.slane %v7012_v2, 5  ;;  %v5252_v2 = vld [vmem:[%s6269_s30 + $0x84] sm:$0xe]  ;;  %v6075_v56 = vld [vmem:[%s6269_s30 + $0x9c] sm:$0xff]  }
  0xd5   : > { %v2826_v12 = vrot.slane %v7056_v39, 5  ;;  %v5266_v51 = vrot.slane %v5250_v14, 9  ;;  %v2830_v31 = vrot.slane %v7045_v37, 5  ;;  %v2833_v19 = vrot.slane %v7069_v46, 5  ;;  %v5253_v46 = vld [vmem:[%s6269_s30 + $0x90] sm:$0xe] }
  0xd6   : > { %v7454_v10 = vsel %vm6613_vm7, %v2818_v7, %v2819_v26  ;;  %v5267_v15 = vrot.slane %v5251_v54, 9  ;;  %v7464_v37 = vsel %vm6613_vm7, %v5265_v59, %v2823_v20  ;;  %v2840_v0 = vrot.slane %v7124_v63, 5  ;;  %v5254_v5 = vld [vmem:[%s6269_s30 + $0x9c] sm:$0xe]  ;;  %v5255_v59 = vld [vmem:[%s6269_s30 + $0xa8] sm:$0xe] }
  0xd7   : > { %5838 = vmatmul.mubr.msk.bf16.gmra.mxu0 %vm660_vm3, %v7350_v40  ;;  %v2837_v40 = vrot.slane %v7075_v34, 5  ;;  %v5281_v39 = vcombine.low %v7442_v4, %v7454_v10  ;;  %v7468_v28 = vsel %vm6613_vm7, %v5266_v51, %v2830_v31  ;;  %v2832_v45 = vrot.slane %v2830_v31, 4  ;;  %v8933_v31 = vld [vmem:[#allocation14_spill] sm:$0xff] }
  0xd8   : > { %5841 = vmatprep.mubr.msk.bf16.mxu0 %vm660_vm3, %v7352_v61  ;;  %v2825_v61 = vrot.slane %v2823_v20, 4  ;;  %v5268_v13 = vrot.slane %v5252_v2, 9  ;;  %v2844_v9 = vrot.slane %v7116_v47, 5  ;;  %v2847_v36 = vrot.slane %v8931_v30, 5 }
  0xd9   : > { %v7473_v34 = vsel %vm6613_vm7, %v5267_v15, %v2837_v40  ;;  %v2839_v57 = vrot.slane %v2837_v40, 4  ;;  %v7488_v26 = vsel %vm6613_vm7, %v2832_v45, %v2833_v19  ;;  %v5269_v14 = vrot.slane %v5253_v46, 9  ;;  %v8934_v15 = vld [vmem:[#allocation12_spill] sm:$0xff] }
  0xda   : > { %v7478_v41 = vsel %vm6613_vm7, %v2825_v61, %v2826_v12  ;;  %v7502_v7 = vsel %vm6613_vm7, %v5268_v13, %v2844_v9  ;;  %v2846_v20 = vrot.slane %v2844_v9, 4  ;;  %v8932_v12 = vld [vmem:[#allocation9_spill] sm:$0xff]  ;;  %v5270_v19 = vrot.slane %v5254_v5, 9  ;;  %v8936_v45 = vld [vmem:[#allocation16_spill] sm:$0xff] }
  0xdb   : > { %5804 = vmatmul.mubr.msk.bf16.gmra.mxu1 %vm660_vm3, %v6074_v18  ;;  %v7492_v63 = vsel %vm6613_vm7, %v2839_v57, %v2840_v0  ;;  %v2851_v51 = vrot.slane %v8932_v12, 5  ;;  %v2854_v18 = vrot.slane %v8933_v31, 5  ;;  %v2858_v40 = vrot.slane %v8934_v15, 5  ;;  %v5256_v0 = vld [vmem:[%s6269_s30 + $0xb4] sm:$0xe]  ;;  %v6076_v13 = vld [vmem:[%s6269_s30 + $0xa8] sm:$0xff]  }
  0xdc   : > { %5807 = vmatprep.mubr.msk.bf16.mxu1 %vm660_vm3, %v6075_v56  ;;  %v7511_v2 = vsel %vm6613_vm7, %v2846_v20, %v2847_v36  ;;  %v8935_v56 = vld [vmem:[#allocation15_spill] sm:$0xff]  ;;  %v5271_v46 = vrot.slane %v5255_v59, 9  ;;  %v2865_v57 = vrot.slane %v8936_v45, 5  ;;  %v8937_v31 = vld [vmem:[#allocation8_spill] sm:$0xff]  ;;  %v2875_v45 = vrot.slane %v7287_v35, 5 }
  0xdd   : > { %v2861_v61 = vrot.slane %v8935_v56, 5  ;;  %v2853_v30 = vrot.slane %v2851_v51, 4  ;;  %v7527_v36 = vsel %vm6613_vm7, %v5270_v19, %v2858_v40  ;;  %v5257_v5 = vld [vmem:[%s6269_s30 + $0xc0] sm:$0xe]  ;;  %v6077_v59 = vld [vmem:[%s6269_s30 + $0xb4] sm:$0xff]   ;;  %v2860_v20 = vrot.slane %v2858_v40, 4 }
  0xde   : > { %v7533_v12 = vsel %vm6613_vm7, %v5271_v46, %v2865_v57  ;;  %v2868_v15 = vrot.slane %v8937_v31, 5  ;;  %v8938_v56 = vld [vmem:[#allocation17_spill] sm:$0xff]  ;;  %v5273_v31 = vrot.slane %v5257_v5, 9  ;;  %v2879_v5 = vrot.slane %v7295_v38, 5  ;;  %v6078_v38 = vld [vmem:[%s6269_s30 + $0xc0] sm:$0xff]  }
  0xdf   : > { %5842 = vmatmul.mubr.msk.bf16.gmra.mxu0 %vm660_vm3, %v7359_v22  ;;  %v7523_v22 = vsel %vm6613_vm7, %v5269_v14, %v2851_v51  ;;  %v7538_v14 = vsel %vm6613_vm7, %v2853_v30, %v2854_v18  ;;  %v5272_v51 = vrot.slane %v5256_v0, 9  ;;  %v2872_v19 = vrot.slane %v8938_v56, 5  ;;  %v6079_v18 = vld [vmem:[%s6269_s30 + $0x18] sm:$0xff]   ;;  %v6080_v56 = vld [vmem:[%s6269_s30 + $0x24] sm:$0xff]  }
  0xe0   : > { %5845 = vmatprep.mubr.msk.bf16.mxu0 %vm660_vm3, %v7370_v11  ;;  %v2867_v11 = vrot.slane %v2865_v57, 4  ;;  %v7546_v46 = vsel %vm6613_vm7, %v2860_v20, %v2861_v61  ;;  %v5243_v20 = vld [vmem:[%s6269_s30 + $0x18] sm:$0xe]  ;;  %v2881_v52 = vrot.slane %v2879_v5, 4 }
  0xe1   : > { %v7560_v30 = vsel %vm6613_vm7, %v5272_v51, %v2872_v19  ;;  %v2874_v61 = vrot.slane %v2872_v19, 4  ;;  %v5259_v17 = vrot.slane %v5243_v20, 9  ;;  %v5372_v20 = vld [vmem:[%s6269_s30 + $0x18] sm:$0xf] }
  0xe2   : > { %v7550_v57 = vsel %vm6613_vm7, %v2867_v11, %v2868_v15  ;;  %v2775_v11 = vsel %vm6613_vm7, %v5258_v48, %v2774_v55  ;;  %v2778_v15 = vsel %vm6613_vm7, %v7376_v53, %v2777_v8  ;;  %v2783_v55 = vrot.slane %v2781_v21, 4  ;;  %v6095_v48 = vld [vmem:[%s6269_s30 + $0x20] sm:$0x1] }
  0xe3   : > { %5808 = vmatmul.mubr.msk.bf16.gmra.mxu1 %vm660_vm3, %v6076_v13  ;;  %v2882_v13 = vrot.slane %v7308_v42, 5  ;;  %v7587_v42 = vsel %vm6613_vm7, %v5273_v31, %v2879_v5  ;;  %v2784_v8 = vrot.slane %v6095_v48, 5  ;;  %v5275_v53 = vcombine.low %v2775_v11, %v2778_v15  ;;  %v6081_v31 = vld [vmem:[%s6269_s30 + $0x30] sm:$0xff]   ;;  %v7614_v5 = vld [vmem:[%s6269_s30 + $0x1c] sm:$0xf] }
  0xe4   : > { %5811 = vmatprep.mubr.msk.bf16.mxu1 %vm660_vm3, %v6077_v59  ;;  %v7579_v59 = vsel %vm6613_vm7, %v2874_v61, %v2875_v45  ;;  %v2782_v19 = vsel %vm6613_vm7, %v5259_v17, %v2781_v21  ;;  %v3586_v21 = vshrl.u32 %v5372_v20, 16  ;;  %v3595_v11 = vshll.u32 %v7614_v5, 16  ;;  %v5375_v17 = vld [vmem:[%s6269_s30 + $0x24] sm:$0xf]  ;;  %v6082_v48 = vld [vmem:[%s6269_s30 + $0x3c] sm:$0xff]  }
  0xe5   : > { %v2785_v45 = vsel %vm6613_vm7, %v2783_v55, %v2784_v8  ;;  %v3599_v15 = vshrl.u32 %v7614_v5, 16  ;;  %v7624_v55 = vld [vmem:[%s6269_s30 + $0x28] sm:$0xf] }
  0xe6   : > { %v5276_v50 = vcombine.low %v2782_v19, %v2785_v45  ;;  %v6083_v8 = vld [vmem:[%s6269_s30 + $0x48] sm:$0xff]   ;;  %v7629_v19 = vrot.slane %v3595_v11, 5  ;;  %v5378_v11 = vld [vmem:[%s6269_s30 + $0x30] sm:$0xf] }
  0xe7   : > { %5846 = vmatmul.mubr.msk.bf16.gmra.mxu0 %vm660_vm3, %v7381_v62  ;;  %v7596_v62 = vsel %vm6613_vm7, %v2881_v52, %v2882_v13  ;;  %v3589_v13 = vshll.u32 %v5372_v20, 16  ;;  %v8940_v52 = vld [vmem:[#allocation13_spill] sm:$0xff]  ;;  %v3601_v45 = vrot.slane %v3599_v15, 4  ;;  %v3619_v20 = vshll.u32 %v7624_v55, 16 }
  0xe8   : > { %5885 = vmatprep.mubr.msk.bf16.mxu0 %vm660_vm3, %v6079_v18  ;;  %v8939_v18 = vld [vmem:[#allocation10_spill] sm:$0xff]  ;;  %v3634_v35 = vshrl.u32 %v5378_v11, 16  ;;  %v3637_v0 = vshll.u32 %v5378_v11, 16 }
  0xe9   : > { %v4538_v61 = vsel %vm709_vm0, %v8939_v18, 0  ;;  %v3610_v18 = vshrl.u32 %v5375_v17, 16  ;;  %v7652_v51 = vrot.slane %v3619_v20, 5 }
  0xea   : > { %v3636_v54 = vrot.slane %v3634_v35, 4  ;;  %v3639_v47 = vrot.slane %v3637_v0, 5 }
  0xeb   : > { %5812 = vmatmul.mubr.msk.bf16.gmra.mxu1 %vm660_vm3, %v6078_v38  ;;  %v4068_v38 = vsel %vm709_vm0, %v8940_v52, 0  ;;  %v7647_v52 = vld [vmem:[%s6269_s30 + $0x34] sm:$0xf] }
  0xec   : > { %5851 = vmatprep.mubr.msk.bf16.mxu1 %vm660_vm3, %v5275_v53  ;;  %v3588_v53 = vrot.slane %v3586_v21, 4  ;;  %v5453_v21 = vld [vmem:[%s6269_s30 + $0x18] sm:$0xe] }
  0xed   : > { %v5469_v43 = vrot.slane %v5453_v21, 9 }
  0xef   : > { %5886 = vmatmul.mubr.msk.bf16.vlgmr.msra.gmra.mxu0 %vm660_vm3, %v6080_v56  ;;  %v3591_v56 = vrot.slane %v3589_v13, 5  ;;  %v4329_v13 = vrot.slane %v7614_v5, 5 }
  0xf0   : > { %5952 = vmatpush3.bf16.msra.mxu0 %v4538_v61  ;;  %5889 = vmatprep.mubr.msk.bf16.mxu0 %vm660_vm3, %v6081_v31  ;;  %v5374_v31 = vld [vmem:[%s6269_s30 + $0x20] sm:$0x1]  ;;  %v3613_v61 = vshll.u32 %v5375_v17, 16  ;;  %v3612_v17 = vrot.slane %v3610_v18, 4 }
  0xf1   : > { %v3592_v6 = vor.u32 %v3591_v56, %v3588_v53  ;;  %v3605_v15 = vshll.u32 %v5374_v31, 16  ;;  %v4331_v40 = vrot.slane %v4329_v13, 4  ;;  %v4332_v53 = vrot.slane %v5374_v31, 5  ;;  %v6085_v18 = vld [vmem:[%s6269_s30 + $0x60] sm:$0xff]  }
  0xf2   : > { %v3643_v56 = vshll.u32 %v7647_v52, 16 }
  0xf3   : > { %5852 = vmatmul.mubr.msk.bf16.vlgmr.msra.gmra.mxu1 %vm660_vm3, %v5276_v50  ;;  %v3623_v50 = vshrl.u32 %v7624_v55, 16  ;;  %v7643_v1 = vpop.f32.mrf.mxu0  ;;  %v3607_v11 = vrot.slane %v3605_v15, 5  ;;  %v7681_v24 = vsel %vm6613_vm7, %v4331_v40, %v4332_v53  ;;  %v5381_v15 = vld [vmem:[%s6269_s30 + $0x3c] sm:$0xf]  ;;  %v7699_v53 = vld [vmem:[%s6269_s30 + $0x40] sm:$0xf] }
  0xf4   : > { %5918 = vmatpush3.bf16.msra.mxu1 %v4068_v38  ;;  %5855 = vmatprep.mubr.msk.bf16.mxu1 %vm660_vm3, %v5277_v25  ;;  %v3602_v25 = vor.u32 %v3601_v45, %v7629_v19  ;;  %v7650_v38 = vld [vmem:[%s6269_s30 + $0x2c] sm:$0x1]  ;;  %v3647_v45 = vshrl.u32 %v7647_v52, 16  ;;  %v7683_v60 = vrot.slane %v3643_v56, 5  ;;  %v3640_v56 = vor.u32 %v3639_v47, %v3636_v54 }
  0xf5   : > { %v3625_v5 = vrot.slane %v3623_v50, 4  ;;  %v7664_v20 = vpop.f32.mrf.mxu0  ;;  %v3593_v50 = vrot.slane %v3592_v6, 4  ;;  %v3629_v9 = vshll.u32 %v7650_v38, 16  ;;  %v7677_v6 = vsel %vm6613_vm7, %v5469_v43, %v4329_v13 }
  0xf6   : > { %v3603_v21 = vrot.slane %v3602_v25, 4  ;;  %v5470_v13 = vrot.slane %v5454_v29, 9  ;;  %v5380_v25 = vld [vmem:[%s6269_s30 + $0x38] sm:$0x1]  ;;  %v3671_v29 = vshrl.u32 %v7699_v53, 16 }
  0xf7   : > { %5890 = vmatmul.mubr.msk.bf16.gmra.mxu0 %vm660_vm3, %v6082_v48  ;;  %v3615_v48 = vrot.slane %v3613_v61, 5  ;;  %v3626_v32 = vor.u32 %v3625_v5, %v7652_v51  ;;  %v7688_v0 = vpop.f32.mrf.mxu0  ;;  %v3598_v35 = vsel %vm6318_vm4, %v3593_v50, %v7629_v19  ;;  %v3631_v43 = vrot.slane %v3629_v9, 5  ;;  %v6086_v19 = vld [vmem:[%s6269_s30 + $0x6c] sm:$0xff]  }
  0xf8   : > { %5893 = vmatprep.mubr.msk.bf16.mxu0 %vm660_vm3, %v6083_v8  ;;  %v6084_v8 = vld [vmem:[%s6269_s30 + $0x54] sm:$0xff]   ;;  %v7662_v61 = vpop.f32.mrf.mxu1  ;;  %8943 = vst [vmem:[#allocation14_spill] sm:$0xff] %v7688_v0  ;;  %v3608_v40 = vsel %vm6318_vm4, %v3603_v21, %v3607_v11  ;;  %v3653_v50 = vshll.u32 %v5380_v25, 16  ;;  %v5455_v21 = vld [vmem:[%s6269_s30 + $0x30] sm:$0xe]  ;;  %v3658_v9 = vshrl.u32 %v5381_v15, 16 }
  0xf9   : > { %8941 = vst [vmem:[#allocation11_spill] sm:$0xff] %v7662_v61  ;;  %v3616_v31 = vor.u32 %v3615_v48, %v3612_v17  ;;  %v3627_v48 = vrot.slane %v3626_v32, 4  ;;  %v3661_v11 = vshll.u32 %v5381_v15, 16  ;;  %v7712_v47 = vpop.f32.mrf.mxu0  ;;  %v7714_v54 = vcombine.low %v3598_v35, %v3608_v40  ;;  %v5384_v35 = vld [vmem:[%s6269_s30 + $0x48] sm:$0xf] }
  0xfa   : > { %8945 = vst [vmem:[#allocation15_spill] sm:$0xff] %v7712_v47  ;;  %v3667_v32 = vshll.u32 %v7699_v53, 16  ;;  %v3641_v40 = vrot.slane %v3640_v56, 4  ;;  %v5471_v4 = vrot.slane %v5455_v21, 9  ;;  %v7739_v15 = vld [vmem:[%s6269_s30 + $0x4c] sm:$0xf] }
  0xfb   : > { %5856 = vmatmul.mubr.msk.bf16.gmra.mxu1 %vm660_vm3, %v5278_v16  ;;  %v4336_v16 = vrot.slane %v7624_v55, 5  ;;  %v7686_v55 = vpop.f32.mrf.mxu1  ;;  %v3617_v17 = vrot.slane %v3616_v31, 4  ;;  %v6087_v31 = vld [vmem:[%s6269_s30 + $0x78] sm:$0xff]   ;;  %v3632_v44 = vsel %vm6318_vm4, %v3627_v48, %v3631_v43  ;;  %v3655_v43 = vrot.slane %v3653_v50, 5  ;;  %v5387_v50 = vld [vmem:[%s6269_s30 + $0x54] sm:$0xf] }
  0xfc   : > { %5859 = vmatprep.mubr.msk.bf16.mxu1 %vm660_vm3, %v5279_v23  ;;  %v3649_v23 = vrot.slane %v3647_v45, 4  ;;  %8942 = vst [vmem:[#allocation9_spill] sm:$0xff] %v7686_v55  ;;  %v4343_v45 = vrot.slane %v7647_v52, 5  ;;  %v7754_v56 = vrot.slane %v3667_v32, 5  ;;  %v3682_v21 = vshrl.u32 %v5384_v35, 16 }
  0xfd   : > { %v4338_v5 = vrot.slane %v4336_v16, 4  ;;  %v3622_v33 = vsel %vm6318_vm4, %v3617_v17, %v7652_v51  ;;  %v7743_v17 = vld [vmem:[%s6269_s30 + $0x44] sm:$0x1]  ;;  %v7761_v52 = vld [vmem:[%s6269_s30 + $0x58] sm:$0xf] }
  0xfe   : > { %v4345_v10 = vrot.slane %v4343_v45, 4  ;;  %v7768_v32 = vsel %vm6613_vm7, %v5471_v4, %v4343_v45  ;;  %v6089_v45 = vld [vmem:[%s6269_s30 + $0x90] sm:$0xff]   ;;  %v3715_v55 = vshll.u32 %v7761_v52, 16 }
  0xff   : > { %5894 = vmatmul.mubr.msk.bf16.gmra.mxu0 %vm660_vm3, %v6084_v8  ;;  %v4339_v8 = vrot.slane %v7650_v38, 5  ;;  %v7710_v38 = vpop.f32.mrf.mxu1 }
 0x100   : > { %5897 = vmatprep.mubr.msk.bf16.mxu0 %vm660_vm3, %v6085_v18  ;;  %v3650_v18 = vor.u32 %v3649_v23, %v7683_v60  ;;  %8944 = vst [vmem:[#allocation12_spill] sm:$0xff] %v7710_v38  ;;  %v3709_v38 = vshll.u32 %v5387_v50, 16 }
 0x101   : > { %v7735_v23 = vsel %vm6613_vm7, %v4338_v5, %v4339_v8  ;;  %v7746_v48 = vpop.f32.mrf.mxu1 }
 0x102   : > { %v3651_v51 = vrot.slane %v3650_v18, 4  ;;  %8946 = vst [vmem:[#allocation16_spill] sm:$0xff] %v7746_v48  ;;  %v5456_v18 = vld [vmem:[%s6269_s30 + $0x3c] sm:$0xe]  ;;  %v3706_v48 = vshrl.u32 %v5387_v50, 16 }
 0x103   : > { %5860 = vmatmul.mubr.msk.bf16.gmra.mxu1 %vm660_vm3, %v5280_v3  ;;  %v7731_v3 = vsel %vm6613_vm7, %v5470_v13, %v4336_v16  ;;  %v3660_v16 = vrot.slane %v3658_v9, 4  ;;  %v3663_v13 = vrot.slane %v3661_v11, 5  ;;  %v3685_v9 = vshll.u32 %v5384_v35, 16  ;;  %v6088_v35 = vld [vmem:[%s6269_s30 + $0x84] sm:$0xff]  }
 0x104   : > { %5863 = vmatprep.mubr.msk.bf16.mxu1 %vm660_vm3, %v5281_v39  ;;  %v4346_v39 = vrot.slane %v5380_v25, 5  ;;  %v7750_v25 = vcombine.low %v3622_v33, %v3632_v44  ;;  %v3691_v11 = vshll.u32 %v7739_v15, 16  ;;  %v3646_v33 = vsel %vm6318_vm4, %v3641_v40, %v7683_v60 }
 0x105   : > { %v3677_v44 = vshll.u32 %v7743_v17, 16  ;;  %v3656_v8 = vsel %vm6318_vm4, %v3651_v51, %v3655_v43  ;;  %v3664_v49 = vor.u32 %v3663_v13, %v3660_v16  ;;  %v8948_v60 = vcombine.low %v7464_v37, %v7478_v41  ;;  %v7795_v37 = vld [vmem:[%s6269_s30 + $0x50] sm:$0x1] }
 0x106   : > { %v7748_v5 = vpop.f32.mrf.mxu0  ;;  %v3719_v51 = vshrl.u32 %v7761_v52, 16  ;;  %v8951_v43 = vcombine.low %v7468_v28, %v7488_v26  ;;  %v3684_v41 = vrot.slane %v3682_v21, 4  ;;  %v3687_v16 = vrot.slane %v3685_v9, 5  ;;  %v5390_v28 = vld [vmem:[%s6269_s30 + $0x60] sm:$0xf] }
 0x107   : > { %5898 = vmatmul.mubr.msk.bf16.gmra.mxu0 %vm660_vm3, %v6086_v19  ;;  %8947 = vst [vmem:[#allocation8_spill] sm:$0xff] %v7748_v5  ;;  %v3673_v19 = vrot.slane %v3671_v29, 4  ;;  %v7772_v29 = vsel %vm6613_vm7, %v4345_v10, %v4346_v39  ;;  %v5472_v39 = vrot.slane %v5456_v18, 9  ;;  %v7797_v13 = vrot.slane %v3691_v11, 5 }
 0x108   : > { %5901 = vmatprep.mubr.msk.bf16.mxu0 %vm660_vm3, %v6087_v31  ;;  %v3695_v31 = vshrl.u32 %v7739_v15, 16  ;;  %v7785_v4 = vpop.f32.mrf.mxu0  ;;  %v7803_v18 = vrot.slane %v3677_v44, 5  ;;  %v7808_v26 = vrot.slane %v3664_v49, 4  ;;  %v4353_v21 = vrot.slane %v7743_v17, 5 }
 0x109   : > { %v7783_v40 = vpop.f32.mrf.mxu1  ;;  %8950 = vst [vmem:[#allocation10_spill] sm:$0xff] %v7785_v4  ;;  %v3674_v10 = vor.u32 %v3673_v19, %v7754_v56  ;;  %v3708_v9 = vrot.slane %v3706_v48, 4  ;;  %v3711_v11 = vrot.slane %v3709_v38, 5  ;;  %v3701_v44 = vshll.u32 %v7795_v37, 16  ;;  %v5389_v19 = vld [vmem:[%s6269_s30 + $0x5c] sm:$0x1] }
 0x10a   : > { %8949 = vst [vmem:[#allocation17_spill] sm:$0xff] %v7783_v40  ;;  %v3697_v50 = vrot.slane %v3695_v31, 4  ;;  %v4350_v40 = vrot.slane %v7699_v53, 5  ;;  %v7822_v49 = vrot.slane %v3715_v55, 5  ;;  %v3688_v38 = vor.u32 %v3687_v16, %v3684_v41  ;;  %v6091_v4 = vld [vmem:[%s6269_s30 + $0xa8] sm:$0xff]  }
 0x10b   : > { %5864 = vmatmul.mubr.msk.bf16.gmra.mxu1 %vm660_vm3, %v8948_v60  ;;  %v7799_v60 = vcombine.low %v3646_v33, %v3656_v8  ;;  %v7812_v8 = vld [vmem:[%s6269_s30 + $0x64] sm:$0xf]  ;;  %v7815_v31 = vpop.f32.mrf.mxu1  ;;  %v7817_v33 = vpop.f32.mrf.mxu0  ;;  %v7819_v53 = vrot.slane %v3674_v10, 4  ;;  %v3733_v10 = vshll.u32 %v5390_v28, 16  ;;  %v3712_v16 = vor.u32 %v3711_v11, %v3708_v9 }
 0x10c   : > { %5867 = vmatprep.mubr.msk.bf16.mxu1 %vm660_vm3, %v8951_v43  ;;  %8952 = vst [vmem:[#allocation13_spill] sm:$0xff] %v7815_v31  ;;  %8953 = vst [vmem:[#allocation18_spill] sm:$0xff] %v7817_v33  ;;  %v7826_v17 = vsel %vm6613_vm7, %v5472_v39, %v4350_v40  ;;  %v3698_v48 = vor.u32 %v3697_v50, %v7797_v13  ;;  %v4357_v43 = vrot.slane %v7739_v15, 5  ;;  %v3730_v31 = vshrl.u32 %v5390_v28, 16 }
 0x10d   : > { %v3739_v61 = vshll.u32 %v7812_v8, 16  ;;  %v3743_v55 = vshrl.u32 %v7812_v8, 16  ;;  %v3670_v39 = vsel %vm6318_vm4, %v7808_v26, %v7754_v56  ;;  %v4352_v41 = vrot.slane %v4350_v40, 4  ;;  %v7844_v28 = vpop.f32.mrf.mxu1  ;;  %v7846_v33 = vpop.f32.mrf.mxu0  ;;  %v5458_v26 = vld [vmem:[%s6269_s30 + $0x54] sm:$0xe] }
 0x10e   : > { %v4364_v50 = vrot.slane %v7761_v52, 5  ;;  %v8954_v15 = vcombine.low %v7473_v34, %v7492_v63  ;;  %8955 = vst [vmem:[#allocation19_spill] sm:$0xff] %v7844_v28  ;;  %8956 = vst [vmem:[#allocation20_spill] sm:$0xff] %v7846_v33  ;;  %v7849_v5 = vrot.slane %v3701_v44, 5  ;;  %v3725_v40 = vshll.u32 %v5389_v19, 16 }
 0x10f   : > { %5902 = vmatmul.mubr.msk.bf16.gmra.mxu0 %vm660_vm3, %v6088_v35  ;;  %v3721_v35 = vrot.slane %v3719_v51, 4  ;;  %v6090_v51 = vld [vmem:[%s6269_s30 + $0x9c] sm:$0xff]   ;;  %v8957_v52 = vcombine.low %v7502_v7, %v7511_v2  ;;  %v3689_v34 = vrot.slane %v3688_v38, 4  ;;  %v3699_v63 = vrot.slane %v3698_v48, 4  ;;  %v5393_v38 = vld [vmem:[%s6269_s30 + $0x6c] sm:$0xf]  ;;  %v7865_v48 = vpop.f32.mrf.mxu1 }
 0x110   : > { %5905 = vmatprep.mubr.msk.bf16.mxu0 %vm660_vm3, %v6089_v45  ;;  %v5457_v45 = vld [vmem:[%s6269_s30 + $0x48] sm:$0xe]  ;;  %v4359_v9 = vrot.slane %v4357_v43, 4  ;;  %v4360_v11 = vrot.slane %v7795_v37, 5  ;;  %v3732_v44 = vrot.slane %v3730_v31, 4  ;;  %v3735_v28 = vrot.slane %v3733_v10, 5 }
 0x111   : > { %v5473_v47 = vrot.slane %v5457_v45, 9  ;;  %v3722_v56 = vor.u32 %v3721_v35, %v7822_v49  ;;  %v7861_v45 = vrot.slane %v3739_v61, 5  ;;  %v3745_v35 = vrot.slane %v3743_v55, 4  ;;  %8958 = vst [vmem:[#allocation21_spill] sm:$0xff] %v7865_v48 }
 0x112   : > { %v3713_v33 = vrot.slane %v3712_v16, 4  ;;  %v5474_v7 = vrot.slane %v5458_v26, 9  ;;  %v4366_v2 = vrot.slane %v4364_v50, 4  ;;  %v4367_v0 = vrot.slane %v5389_v19, 5  ;;  %v5459_v16 = vld [vmem:[%s6269_s30 + $0x60] sm:$0xe] }
 0x113   : > { %5868 = vmatmul.mubr.msk.bf16.gmra.mxu1 %vm660_vm3, %v8954_v15  ;;  %v7859_v15 = vld [vmem:[%s6269_s30 + $0x68] sm:$0x1]  ;;  %v3680_v61 = vsel %vm6318_vm4, %v7819_v53, %v7803_v18  ;;  %v7876_v31 = vsel %vm6613_vm7, %v4352_v41, %v4353_v21  ;;  %v3723_v10 = vrot.slane %v3722_v56, 4  ;;  %v3727_v19 = vrot.slane %v3725_v40, 5  ;;  %v7890_v53 = vld [vmem:[%s6269_s30 + $0x70] sm:$0xf] }
 0x114   : > { %5871 = vmatprep.mubr.msk.bf16.mxu1 %vm660_vm3, %v8957_v52  ;;  %v3694_v55 = vsel %vm6318_vm4, %v3689_v34, %v7797_v13  ;;  %v3749_v18 = vshll.u32 %v7859_v15, 16  ;;  %v3736_v21 = vor.u32 %v3735_v28, %v3732_v44  ;;  %v3746_v41 = vor.u32 %v3745_v35, %v7861_v45  ;;  %v6092_v13 = vld [vmem:[%s6269_s30 + $0xb4] sm:$0xff]  }
 0x115   : > { %v3754_v56 = vshrl.u32 %v5393_v38, 16  ;;  %v3757_v40 = vshll.u32 %v5393_v38, 16  ;;  %v7910_v28 = vsel %vm6613_vm7, %v4366_v2, %v4367_v0  ;;  %v8959_v52 = vcombine.low %v7523_v22, %v7538_v14  ;;  %v5396_v35 = vld [vmem:[%s6269_s30 + $0x78] sm:$0xf] }
 0x116   : > { %v8961_v0 = vcombine.low %v7527_v36, %v7546_v46  ;;  %v7928_v22 = vcombine.low %v3670_v39, %v3680_v61  ;;  %v5475_v44 = vrot.slane %v5459_v16, 9 }
 0x117   : > { %5906 = vmatmul.mubr.msk.bf16.gmra.mxu0 %vm660_vm3, %v6090_v51  ;;  %v7868_v37 = vpop.f32.mrf.mxu0  ;;  %v7886_v51 = vsel %vm6613_vm7, %v5473_v47, %v4357_v43  ;;  %v3718_v47 = vsel %vm6318_vm4, %v3713_v33, %v7822_v49  ;;  %v7906_v43 = vsel %vm6613_vm7, %v5474_v7, %v4364_v50  ;;  %v3728_v33 = vsel %vm6318_vm4, %v3723_v10, %v3727_v19  ;;  %v7934_v10 = vld [vmem:[%s6269_s30 + $0x7c] sm:$0xf] }
 0x118   : > { %5909 = vmatprep.mubr.msk.bf16.mxu0 %vm660_vm3, %v6091_v4  ;;  %v3704_v4 = vsel %vm6318_vm4, %v3699_v63, %v7849_v5  ;;  %v7899_v5 = vsel %vm6613_vm7, %v4359_v9, %v4360_v11  ;;  %v6093_v63 = vld [vmem:[%s6269_s30 + $0xc0] sm:$0xff]   ;;  %v4371_v49 = vrot.slane %v7812_v8, 5  ;;  %v3763_v50 = vshll.u32 %v7890_v53, 16 }
 0x119   : > { %v7895_v26 = vpop.f32.mrf.mxu0  ;;  %v3767_v9 = vshrl.u32 %v7890_v53, 16  ;;  %v3751_v11 = vrot.slane %v3749_v18, 5  ;;  %v3737_v8 = vrot.slane %v3736_v21, 4  ;;  %v3747_v7 = vrot.slane %v3746_v41, 4  ;;  %v7948_v18 = vld [vmem:[%s6269_s30 + $0x74] sm:$0x1] }
 0x11a   : > { %v3756_v2 = vrot.slane %v3754_v56, 4  ;;  %v3759_v38 = vrot.slane %v3757_v40, 5  ;;  %v7939_v46 = vcombine.low %v3694_v55, %v3704_v4  ;;  %v7943_v61 = vcombine.low %v3718_v47, %v3728_v33  ;;  %v5399_v21 = vld [vmem:[%s6269_s30 + $0x84] sm:$0xf]  ;;  %v7958_v40 = vld [vmem:[%s6269_s30 + $0x88] sm:$0xf] }
 0x11b   : > { %5872 = vmatmul.mubr.msk.bf16.gmra.mxu1 %vm660_vm3, %v8959_v52  ;;  %v7916_v34 = vpop.f32.mrf.mxu1  ;;  %v7937_v36 = vpop.f32.mrf.mxu0  ;;  %v4373_v16 = vrot.slane %v4371_v49, 4  ;;  %v4374_v55 = vrot.slane %v7859_v15, 5  ;;  %v7955_v4 = vrot.slane %v3763_v50, 5  ;;  %v3769_v56 = vrot.slane %v3767_v9, 4 }
 0x11c   : > { %8960 = vst [vmem:[#allocation22_spill] sm:$0xff] %v7916_v34  ;;  %5875 = vmatprep.mubr.msk.bf16.mxu1 %vm660_vm3, %v8961_v0  ;;  %v3778_v47 = vshrl.u32 %v5396_v35, 16  ;;  %v3781_v52 = vshll.u32 %v5396_v35, 16  ;;  %v3787_v33 = vshll.u32 %v7934_v10, 16  ;;  %v3791_v0 = vshrl.u32 %v7934_v10, 16  ;;  %v6094_v35 = vld [vmem:[%s6269_s30 + $0xcc] sm:$0xff]  }
 0x11d   : > { %v7951_v41 = vpop.f32.mrf.mxu1  ;;  %v3752_v19 = vsel %vm6318_vm4, %v3747_v7, %v3751_v11  ;;  %v7970_v15 = vsel %vm6613_vm7, %v5475_v44, %v4371_v49  ;;  %v3760_v50 = vor.u32 %v3759_v38, %v3756_v2  ;;  %v7972_v9 = vpop.f32.mrf.mxu0  ;;  %v3802_v39 = vshrl.u32 %v5399_v21, 16 }
 0x11e   : > { %8962 = vst [vmem:[#allocation23_spill] sm:$0xff] %v7951_v41  ;;  %v3805_v14 = vshll.u32 %v5399_v21, 16  ;;  %v3811_v41 = vshll.u32 %v7958_v40, 16  ;;  %v3815_v34 = vshrl.u32 %v7958_v40, 16  ;;  %v7985_v49 = vsel %vm6613_vm7, %v4373_v16, %v4374_v55 }
 0x11f   : > { %5910 = vmatmul.mubr.msk.bf16.gmra.mxu0 %vm660_vm3, %v6092_v13  ;;  %v5460_v13 = vld [vmem:[%s6269_s30 + $0x6c] sm:$0xe]  ;;  %v7981_v11 = vpop.f32.mrf.mxu1  ;;  %v3770_v44 = vor.u32 %v3769_v56, %v7955_v4  ;;  %v8965_v2 = vcombine.low %v7560_v30, %v7579_v59  ;;  %v3783_v38 = vrot.slane %v3781_v52, 5  ;;  %v7994_v21 = vrot.slane %v3787_v33, 5  ;;  %v5461_v30 = vld [vmem:[%s6269_s30 + $0x78] sm:$0xe] }
 0x120   : > { %5913 = vmatprep.mubr.msk.bf16.mxu0 %vm660_vm3, %v6093_v63  ;;  %v3742_v63 = vsel %vm6318_vm4, %v3737_v8, %v7861_v45  ;;  %v8963_v45 = vcombine.low %v7533_v12, %v7550_v57  ;;  %8964 = vst [vmem:[#allocation24_spill] sm:$0xff] %v7981_v11  ;;  %v3773_v8 = vshll.u32 %v7948_v18, 16  ;;  %v5476_v7 = vrot.slane %v5460_v13, 9  ;;  %v5398_v12 = vld [vmem:[%s6269_s30 + $0x80] sm:$0x1] }
 0x121   : > { %v3780_v57 = vrot.slane %v3778_v47, 4  ;;  %v7996_v11 = vcombine.low %v3742_v63, %v3752_v19  ;;  %v7998_v16 = vrot.slane %v3760_v50, 4  ;;  %v4378_v55 = vrot.slane %v7890_v53, 5  ;;  %v8008_v19 = vpop.f32.mrf.mxu1  ;;  %v8018_v50 = vld [vmem:[%s6269_s30 + $0x8c] sm:$0x1] }
 0x122   : > { %v4385_v56 = vrot.slane %v7934_v10, 5  ;;  %v3804_v59 = vrot.slane %v3802_v39, 4  ;;  %v3807_v47 = vrot.slane %v3805_v14, 5  ;;  %v8006_v52 = vrot.slane %v3811_v41, 5  ;;  %8967 = vst [vmem:[#allocation26_spill] sm:$0xff] %v8008_v19 }
 0x123   : > { %5876 = vmatmul.mubr.msk.bf16.gmra.mxu1 %vm660_vm3, %v8963_v45  ;;  %v3793_v45 = vrot.slane %v3791_v0, 4  ;;  %v3817_v33 = vrot.slane %v3815_v34, 4  ;;  %v8968_v0 = vcombine.low %v7677_v6, %v7681_v24  ;;  %v3775_v10 = vrot.slane %v3773_v8, 5  ;;  %v8998_v58 = vld [vmem:[#allocation22_spill] sm:$0xff] }
 0x124   : > { %5879 = vmatprep.mubr.msk.bf16.mxu1 %vm660_vm3, %v8965_v2  ;;  %v4381_v63 = vrot.slane %v7948_v18, 5  ;;  %v3797_v39 = vshll.u32 %v5398_v12, 16  ;;  %v3771_v34 = vrot.slane %v3770_v44, 4  ;;  %v8024_v41 = vsel %vm6613_vm7, %v5476_v7, %v4378_v55  ;;  %v8029_v18 = vld [vmem:[%s6269_s30 + $0x94] sm:$0xf] }
 0x125   : > { %v3784_v6 = vor.u32 %v3783_v38, %v3780_v57  ;;  %v3794_v24 = vor.u32 %v3793_v45, %v7994_v21  ;;  %v4380_v2 = vrot.slane %v4378_v55, 4  ;;  %v4387_v8 = vrot.slane %v4385_v56, 4 }
 0x126   : > { %v4388_v53 = vrot.slane %v5398_v12, 5  ;;  %v3766_v44 = vsel %vm6318_vm4, %v7998_v16, %v7955_v4  ;;  %v3808_v7 = vor.u32 %v3807_v47, %v3804_v59  ;;  %v3818_v57 = vor.u32 %v3817_v33, %v8006_v52 }
 0x127   : > { %v8002_v13 = vpop.f32.mrf.mxu0  ;;  %5914 = vmatmul.mubr.msk.bf16.gmra.mxu0 %vm660_vm3, %v6094_v35  ;;  %v5402_v35 = vld [vmem:[%s6269_s30 + $0x90] sm:$0xf]  ;;  %v3821_v38 = vshll.u32 %v8018_v50, 16  ;;  %v8971_v55 = vcombine.low %v7587_v42, %v7596_v62  ;;  %v3799_v12 = vrot.slane %v3797_v39, 5  ;;  %v4392_v48 = vrot.slane %v7958_v40, 5 }
 0x128   : > { %8966 = vst [vmem:[#allocation25_spill] sm:$0xff] %v8002_v13  ;;  %5953 = vmatprep.mubr.msk.bf16.mxu0 %vm660_vm3, %v8968_v0  ;;  %v5477_v0 = vrot.slane %v5461_v30, 9  ;;  %v5462_v30 = vld [vmem:[%s6269_s30 + $0x84] sm:$0xe]  ;;  %v3785_v4 = vrot.slane %v3784_v6, 4  ;;  %v3795_v16 = vrot.slane %v3794_v24, 4  ;;  %v3776_v47 = vsel %vm6318_vm4, %v3771_v34, %v3775_v10 }
 0x129   : > { %v8020_v14 = vpop.f32.mrf.mxu0  ;;  %v3835_v59 = vshll.u32 %v8029_v18, 16  ;;  %v3839_v42 = vshrl.u32 %v8029_v18, 16  ;;  %v8059_v40 = vsel %vm6613_vm7, %v4380_v2, %v4381_v63  ;;  %v8067_v33 = vsel %vm6613_vm7, %v4387_v8, %v4388_v53  ;;  %v5405_v8 = vld [vmem:[%s6269_s30 + $0x9c] sm:$0xf]  ;;  %v9001_v27 = vld [vmem:[#allocation26_spill] sm:$0xff] }
 0x12a   : > { %8969 = vst [vmem:[#allocation27_spill] sm:$0xff] %v8020_v14  ;;  %v3829_v14 = vshll.u32 %v5402_v35, 16  ;;  %v8972_v6 = vcombine.low %v7731_v3, %v7735_v23  ;;  %v3809_v10 = vrot.slane %v3808_v7, 4  ;;  %v3819_v34 = vrot.slane %v3818_v57, 4 }
 0x12b   : > { %v8031_v19 = vpop.f32.mrf.mxu0  ;;  %v8039_v45 = vpop.f32.mrf.mxu1  ;;  %5880 = vmatmul.mubr.msk.bf16.gmra.mxu1 %vm660_vm3, %v8971_v55  ;;  %v3823_v24 = vrot.slane %v3821_v38, 5  ;;  %v5478_v63 = vrot.slane %v5462_v30, 9  ;;  %v4394_v53 = vrot.slane %v4392_v48, 4  ;;  %v3790_v57 = vsel %vm6318_vm4, %v3785_v4, %v7994_v21 }
 0x12c   : > { %8970 = vst [vmem:[#allocation28_spill] sm:$0xff] %v8031_v19  ;;  %v3826_v19 = vshrl.u32 %v5402_v35, 16  ;;  %5919 = vmatprep.mubr.msk.bf16.mxu1 %vm660_vm3, %v7714_v54  ;;  %v8063_v54 = vsel %vm6613_vm7, %v5477_v0, %v4385_v56  ;;  %v8074_v35 = vld [vmem:[%s6269_s30 + $0x98] sm:$0x1]  ;;  %v8973_v56 = vcombine.low %v7768_v32, %v7772_v29  ;;  %v4395_v0 = vrot.slane %v8018_v50, 5 }
 0x12d   : > { %v8047_v13 = vpop.f32.mrf.mxu0  ;;  %v8053_v62 = vpop.f32.mrf.mxu1  ;;  %v3831_v23 = vrot.slane %v3829_v14, 5  ;;  %v3800_v38 = vsel %vm6318_vm4, %v3795_v16, %v3799_v12  ;;  %v8089_v55 = vrot.slane %v3835_v59, 5  ;;  %v3841_v32 = vrot.slane %v3839_v42, 4 }
 0x12e   : > { %v3828_v3 = vrot.slane %v3826_v19, 4  ;;  %v8093_v30 = vcombine.low %v3766_v44, %v3776_v47  ;;  %v3845_v14 = vshll.u32 %v8074_v35, 16  ;;  %v3814_v12 = vsel %vm6318_vm4, %v3809_v10, %v8006_v52  ;;  %v8107_v44 = vld [vmem:[%s6269_s30 + $0xa0] sm:$0xf] }
 0x12f   : > { %v5751_v39 = vpop.f32.mrf.mxu0  ;;  %5954 = vmatmul.mubr.msk.bf16.vlgmr.msra.gmra.mxu0 %vm660_vm3, %v8972_v6  ;;  %v8076_v2 = vpop.f32.mrf.mxu1  ;;  %v5463_v6 = vld [vmem:[%s6269_s30 + $0x90] sm:$0xe]  ;;  %v3824_v4 = vsel %vm6318_vm4, %v3819_v34, %v3823_v24  ;;  %v3850_v16 = vshrl.u32 %v5405_v8, 16  ;;  %v3853_v59 = vshll.u32 %v5405_v8, 16  ;;  %v8111_v47 = vcombine.low %v3790_v57, %v3800_v38  ;;  %v5408_v38 = vld [vmem:[%s6269_s30 + $0xa8] sm:$0xf] }
 0x130   : > { %5957 = vmatprep.mubr.msk.bf16.mxu0 %vm660_vm3, %v8973_v56  ;;  %v8115_v56 = vsel %vm6613_vm7, %v5478_v63, %v4392_v48  ;;  %v8119_v52 = vsel %vm6613_vm7, %v4394_v53, %v4395_v0  ;;  %v3832_v10 = vor.u32 %v3831_v23, %v3828_v3  ;;  %v5479_v8 = vrot.slane %v5463_v6, 9  ;;  %v8141_v6 = vld [vmem:[%s6269_s30 + $0xac] sm:$0xf] }
 0x131   : > { %v1464_v7 = vpop.f32.mrf.mxu0  ;;  %v8091_v29 = vpop.f32.mrf.mxu1  ;;  %v4399_v57 = vrot.slane %v8029_v18, 5  ;;  %v8127_v63 = vcombine.low %v3814_v12, %v3824_v4  ;;  %v8129_v50 = vrot.slane %v3845_v14, 5  ;;  %v3859_v53 = vshll.u32 %v8107_v44, 16 }
 0x132   : > { %v8974_v23 = vcombine.low %v7826_v17, %v7876_v31  ;;  %v3852_v18 = vrot.slane %v3850_v16, 4  ;;  %v8975_v12 = vcombine.low %v7886_v51, %v7899_v5  ;;  %v4402_v4 = vrot.slane %v8074_v35, 5  ;;  %v8976_v17 = vld [vmem:[#allocation14_spill] sm:$0xff] }
 0x133   : > { %v5752_v21 = vpop.f32.mrf.mxu0  ;;  %v5717_v42 = vpop.f32.mrf.mxu1  ;;  %5920 = vmatmul.mubr.msk.bf16.vlgmr.msra.gmra.mxu1 %vm660_vm3, %v7750_v25  ;;  %v3842_v25 = vor.u32 %v3841_v32, %v8089_v55  ;;  %v3855_v32 = vrot.slane %v3853_v59, 5  ;;  %v8151_v19 = vrot.slane %v3859_v53, 5  ;;  %v3883_v5 = vshll.u32 %v8141_v6, 16 }
 0x134   : > { %v1048_v34 = vadd.f32 %v5717_v42, %v7643_v1  ;;  %5923 = vmatprep.mubr.msk.bf16.mxu1 %vm660_vm3, %v7799_v60  ;;  %v3863_v1 = vshrl.u32 %v8107_v44, 16  ;;  %v3877_v42 = vshll.u32 %v5408_v38, 16 }
 0x135   : > { %v1467_v24 = vpop.f32.mrf.mxu0  ;;  %v1039_v48 = vpop.f32.mrf.mxu1  ;;  %v3843_v59 = vrot.slane %v3842_v25, 4  ;;  %v5407_v25 = vld [vmem:[%s6269_s30 + $0xa4] sm:$0x1] }
 0x136   : > { %v8133_v0 = vadd.f32 %v5751_v39, %v1048_v34  ;;  %v1040_v60 = vadd.f32 %v1039_v48, %v7664_v20  ;;  %v3833_v39 = vrot.slane %v3832_v10, 4  ;;  %v3874_v20 = vshrl.u32 %v5408_v38, 16 }
 0x137   : > { %v5755_v3 = vpop.f32.mrf.mxu0  ;;  %5958 = vmatmul.mubr.msk.bf16.gmra.mxu0 %vm660_vm3, %v8974_v23  ;;  %v5718_v14 = vpop.f32.mrf.mxu1  ;;  %v4401_v48 = vrot.slane %v4399_v57, 4  ;;  %v3865_v51 = vrot.slane %v3863_v1, 4  ;;  %v3887_v10 = vshrl.u32 %v8141_v6, 16  ;;  %v5464_v1 = vld [vmem:[%s6269_s30 + $0x9c] sm:$0xe] }
 0x138   : > { %5961 = vmatprep.mubr.msk.bf16.mxu0 %vm660_vm3, %v8975_v12  ;;  %v8148_v34 = vadd.f32 %v1464_v7, %v1040_v60  ;;  %v1051_v31 = vadd.f32 %v5718_v14, %v8976_v17  ;;  %v8978_v12 = vld [vmem:[#allocation15_spill] sm:$0xff]  ;;  %v8160_v60 = vsel %vm6613_vm7, %v5479_v8, %v4399_v57  ;;  %v3856_v14 = vor.u32 %v3855_v32, %v3852_v18 }
 0x139   : > { %v1480_v16 = vpop.f32.mrf.mxu0  ;;  %v1042_v23 = vpop.f32.mrf.mxu1  ;;  %v3838_v53 = vsel %vm6318_vm4, %v3833_v39, %v8089_v55  ;;  %v8180_v55 = vsel %vm6613_vm7, %v4401_v48, %v4402_v4  ;;  %v3866_v18 = vor.u32 %v3865_v51, %v8151_v19  ;;  %v8183_v32 = vrot.slane %v3883_v5, 5 }
 0x13a   : > { %v8155_v35 = vadd.f32 %v5752_v21, %v1051_v31  ;;  %v1043_v38 = vadd.f32 %v1042_v23, %v8978_v12  ;;  %v4406_v21 = vrot.slane %v8107_v44, 5  ;;  %v3876_v31 = vrot.slane %v3874_v20, 4 }
 0x13b   : > { %v5756_v7 = vpop.f32.mrf.mxu0  ;;  %v5721_v17 = vpop.f32.mrf.mxu1  ;;  %5924 = vmatmul.mubr.msk.bf16.gmra.mxu1 %vm660_vm3, %v7928_v22  ;;  %v3879_v23 = vrot.slane %v3877_v42, 5  ;;  %v3848_v22 = vsel %vm6318_vm4, %v3843_v59, %v8129_v50  ;;  %v3889_v39 = vrot.slane %v3887_v10, 4  ;;  %v8980_v42 = vld [vmem:[#allocation10_spill] sm:$0xff]  ;;  %v8192_v50 = vrot.slane %v3856_v14, 4  ;;  %v8195_v59 = vld [vmem:[%s6269_s30 + $0xb0] sm:$0x1] }
 0x13c   : > { %8977 = vst [vmem:[#allocation14_spill] sm:$0xff] %v8155_v35  ;;  %v8170_v12 = vadd.f32 %v1467_v24, %v1043_v38  ;;  %v8979_v35 = vld [vmem:[#allocation8_spill] sm:$0xff]  ;;  %5927 = vmatprep.mubr.msk.bf16.mxu1 %vm660_vm3, %v7939_v46  ;;  %v3869_v24 = vshll.u32 %v5407_v25, 16  ;;  %v8981_v38 = vcombine.low %v7906_v43, %v7910_v28  ;;  %v5480_v4 = vrot.slane %v5464_v1, 9  ;;  %v8983_v14 = vld [vmem:[#allocation18_spill] sm:$0xff] }
 0x13d   : > { %v1064_v8 = vadd.f32 %v5721_v17, %v8979_v35  ;;  %v1483_v57 = vpop.f32.mrf.mxu0  ;;  %v1055_v44 = vpop.f32.mrf.mxu1  ;;  %v8982_v51 = vcombine.low %v7970_v15, %v7985_v49  ;;  %v4408_v5 = vrot.slane %v4406_v21, 4  ;;  %v4409_v43 = vrot.slane %v5407_v25, 5  ;;  %v5411_v15 = vld [vmem:[%s6269_s30 + $0xb4] sm:$0xf] }
 0x13e   : > { %v1056_v35 = vadd.f32 %v1055_v44, %v8980_v42  ;;  %v3880_v28 = vor.u32 %v3879_v23, %v3876_v31  ;;  %v5496_v44 = vcombine.low %v8160_v60, %v8180_v55  ;;  %v3867_v42 = vrot.slane %v3866_v18, 4  ;;  %v8214_v31 = vld [vmem:[%s6269_s30 + $0xb8] sm:$0xf]  ;;  %v8984_v23 = vld [vmem:[#allocation20_spill] sm:$0xff]  ;;  %v5417_v55 = vld [vmem:[%s6269_s30 + $0xcc] sm:$0xf] }
 0x13f   : > { %v8185_v20 = vadd.f32 %v5755_v3, %v1064_v8  ;;  %v5759_v46 = vpop.f32.mrf.mxu0  ;;  %5962 = vmatmul.mubr.msk.bf16.gmra.mxu0 %vm660_vm3, %v8981_v38  ;;  %v5722_v48 = vpop.f32.mrf.mxu1  ;;  %v5495_v3 = vcombine.low %v8115_v56, %v8119_v52  ;;  %v8206_v8 = vcombine.low %v3838_v53, %v3848_v22  ;;  %v3871_v38 = vrot.slane %v3869_v24, 5  ;;  %v5467_v52 = vld [vmem:[%s6269_s30 + $0xc0] sm:$0xe] }
 0x140   : > { %5965 = vmatprep.mubr.msk.bf16.mxu0 %vm660_vm3, %v8982_v51  ;;  %v8203_v10 = vadd.f32 %v1480_v16, %v1056_v35  ;;  %v1067_v17 = vadd.f32 %v5722_v48, %v8983_v14  ;;  %v3890_v51 = vor.u32 %v3889_v39, %v8183_v32  ;;  %v3893_v25 = vshll.u32 %v8195_v59, 16  ;;  %v5465_v48 = vld [vmem:[%s6269_s30 + $0xa8] sm:$0xe] }
 0x141   : > { %v1496_v1 = vpop.f32.mrf.mxu0  ;;  %v1058_v49 = vpop.f32.mrf.mxu1  ;;  %v3862_v22 = vsel %vm6318_vm4, %v8192_v50, %v8151_v19  ;;  %v8225_v18 = vsel %vm6613_vm7, %v5480_v4, %v4406_v21  ;;  %v3881_v39 = vrot.slane %v3880_v28, 4  ;;  %v4413_v14 = vrot.slane %v8141_v6, 5 }
 0x142   : > { %v8216_v16 = vadd.f32 %v5756_v7, %v1067_v17  ;;  %v1059_v35 = vadd.f32 %v1058_v49, %v8984_v23  ;;  %v8231_v7 = vsel %vm6613_vm7, %v4408_v5, %v4409_v43  ;;  %v3898_v17 = vshrl.u32 %v5411_v15, 16 }
 0x143   : > { %v5760_v53 = vpop.f32.mrf.mxu0  ;;  %v5725_v24 = vpop.f32.mrf.mxu1  ;;  %5928 = vmatmul.mubr.msk.bf16.gmra.mxu1 %vm660_vm3, %v7943_v61  ;;  %v3901_v50 = vshll.u32 %v5411_v15, 16  ;;  %v3907_v61 = vshll.u32 %v8214_v31, 16  ;;  %v3872_v5 = vsel %vm6318_vm4, %v3867_v42, %v3871_v38  ;;  %v3891_v43 = vrot.slane %v3890_v51, 4  ;;  %v5414_v38 = vld [vmem:[%s6269_s30 + $0xc0] sm:$0xf] }
 0x144   : > { %v8235_v49 = vadd.f32 %v1483_v57, %v1059_v35  ;;  %v1080_v19 = vadd.f32 %v5725_v24, %v7868_v37  ;;  %5931 = vmatprep.mubr.msk.bf16.mxu1 %vm660_vm3, %v7996_v11  ;;  %v3895_v6 = vrot.slane %v3893_v25, 5  ;;  %v3911_v57 = vshrl.u32 %v8214_v31, 16  ;;  %v8263_v35 = vld [vmem:[%s6269_s30 + $0xc4] sm:$0xf] }
 0x145   : > { %v1499_v21 = vpop.f32.mrf.mxu0  ;;  %v1071_v4 = vpop.f32.mrf.mxu1  ;;  %v8985_v11 = vcombine.low %v8024_v41, %v8059_v40  ;;  %v5497_v15 = vcombine.low %v8225_v18, %v8231_v7  ;;  %v5481_v42 = vrot.slane %v5465_v48, 9  ;;  %v8986_v25 = vcombine.low %v8063_v54, %v8067_v33  ;;  %v8992_v18 = vld [vmem:[#allocation12_spill] sm:$0xff] }
 0x146   : > { %v8244_v28 = vadd.f32 %v5759_v46, %v1080_v19  ;;  %v1072_v37 = vadd.f32 %v1071_v4, %v7895_v26  ;;  %v3886_v26 = vsel %vm6318_vm4, %v3881_v39, %v8183_v32  ;;  %v4415_v46 = vrot.slane %v4413_v14, 4  ;;  %v8269_v4 = vld [vmem:[%s6269_s30 + $0xbc] sm:$0x1] }
 0x147   : > { %v5763_v23 = vpop.f32.mrf.mxu0  ;;  %5966 = vmatmul.mubr.msk.bf16.gmra.mxu0 %vm660_vm3, %v8985_v11  ;;  %v5726_v51 = vpop.f32.mrf.mxu1  ;;  %v4416_v41 = vrot.slane %v8195_v59, 5  ;;  %v3900_v40 = vrot.slane %v3898_v17, 4  ;;  %v3903_v54 = vrot.slane %v3901_v50, 5  ;;  %v8271_v33 = vrot.slane %v3907_v61, 5 }
 0x148   : > { %5969 = vmatprep.mubr.msk.bf16.mxu0 %vm660_vm3, %v8986_v25  ;;  %v8265_v24 = vadd.f32 %v1496_v1, %v1072_v37  ;;  %v1083_v48 = vadd.f32 %v5726_v51, %v7937_v36  ;;  %v3896_v32 = vsel %vm6318_vm4, %v3891_v43, %v3895_v6  ;;  %v3913_v39 = vrot.slane %v3911_v57, 4  ;;  %v8987_v57 = vld [vmem:[#allocation25_spill] sm:$0xff] }
 0x149   : > { %v1512_v19 = vpop.f32.mrf.mxu0  ;;  %v1074_v11 = vpop.f32.mrf.mxu1  ;;  %v3922_v25 = vshrl.u32 %v5414_v38, 16  ;;  %v3925_v59 = vshll.u32 %v5414_v38, 16  ;;  %v3931_v36 = vshll.u32 %v8263_v35, 16  ;;  %v3935_v51 = vshrl.u32 %v8263_v35, 16 }
 0x14a   : > { %v8275_v17 = vadd.f32 %v5760_v53, %v1083_v48  ;;  %v1075_v1 = vadd.f32 %v1074_v11, %v7972_v9  ;;  %v8282_v61 = vcombine.low %v3862_v22, %v3872_v5  ;;  %v8286_v43 = vsel %vm6613_vm7, %v5481_v42, %v4413_v14  ;;  %v5466_v14 = vld [vmem:[%s6269_s30 + $0xb4] sm:$0xe] }
 0x14b   : > { %v5764_v37 = vpop.f32.mrf.mxu0  ;;  %v5729_v50 = vpop.f32.mrf.mxu1  ;;  %5932 = vmatmul.mubr.msk.bf16.gmra.mxu1 %vm660_vm3, %v8093_v30  ;;  %v8290_v53 = vsel %vm6613_vm7, %v4415_v46, %v4416_v41  ;;  %v3917_v9 = vshll.u32 %v8269_v4, 16  ;;  %v8298_v30 = vcombine.low %v3886_v26, %v3896_v32  ;;  %v3904_v22 = vor.u32 %v3903_v54, %v3900_v40 }
 0x14c   : > { %v8293_v6 = vadd.f32 %v1499_v21, %v1075_v1  ;;  %v1096_v38 = vadd.f32 %v5729_v50, %v8987_v57  ;;  %5935 = vmatprep.mubr.msk.bf16.mxu1 %vm660_vm3, %v8111_v47  ;;  %v3914_v42 = vor.u32 %v3913_v39, %v8271_v33  ;;  %v4420_v46 = vrot.slane %v8214_v31, 5  ;;  %v8988_v1 = vld [vmem:[#allocation27_spill] sm:$0xff]  ;;  %v5416_v47 = vld [vmem:[%s6269_s30 + $0xc8] sm:$0x1] }
 0x14d   : > { %v1515_v48 = vpop.f32.mrf.mxu0  ;;  %v1087_v5 = vpop.f32.mrf.mxu1  ;;  %v3924_v41 = vrot.slane %v3922_v25, 4  ;;  %v3927_v21 = vrot.slane %v3925_v59, 5  ;;  %v8311_v26 = vrot.slane %v3931_v36, 5  ;;  %v3937_v40 = vrot.slane %v3935_v51, 4  ;;  %v8989_v39 = vld [vmem:[#allocation28_spill] sm:$0xff] }
 0x14e   : > { %v8303_v11 = vadd.f32 %v5763_v23, %v1096_v38  ;;  %v1088_v50 = vadd.f32 %v1087_v5, %v8988_v1  ;;  %v5498_v31 = vcombine.low %v8286_v43, %v8290_v53  ;;  %v8319_v23 = vrot.slane %v3917_v9, 5  ;;  %v8333_v38 = vld [vmem:[%s6269_s30 + $0xd0] sm:$0xf] }
 0x14f   : > { %v5767_v57 = vpop.f32.mrf.mxu0  ;;  %5970 = vmatmul.mubr.msk.bf16.gmra.mxu0 %vm660_vm3, %v5495_v3  ;;  %v5730_v54 = vpop.f32.mrf.mxu1  ;;  %v5482_v56 = vrot.slane %v5466_v14, 9  ;;  %v4427_v3 = vrot.slane %v8263_v35, 5  ;;  %v8326_v36 = vrot.slane %v3904_v22, 4  ;;  %v4423_v60 = vrot.slane %v8269_v4, 5 }
 0x150   : > { %5973 = vmatprep.mubr.msk.bf16.mxu0 %vm660_vm3, %v5496_v44  ;;  %v8323_v32 = vadd.f32 %v1512_v19, %v1088_v50  ;;  %v1099_v25 = vadd.f32 %v5730_v54, %v8989_v39  ;;  %v8330_v51 = vrot.slane %v3914_v42, 4  ;;  %v4422_v43 = vrot.slane %v4420_v46, 4 }
 0x151   : > { %v1528_v59 = vpop.f32.mrf.mxu0  ;;  %v1090_v44 = vpop.f32.mrf.mxu1  ;;  %v3928_v53 = vor.u32 %v3927_v21, %v3924_v41  ;;  %v3941_v9 = vshll.u32 %v5416_v47, 16  ;;  %v3938_v5 = vor.u32 %v3937_v40, %v8311_v26  ;;  %v5483_v22 = vrot.slane %v5467_v52, 9  ;;  %v8990_v21 = vld [vmem:[#allocation11_spill] sm:$0xff] }
 0x152   : > { %v8335_v14 = vadd.f32 %v5764_v37, %v1099_v25  ;;  %v1091_v35 = vadd.f32 %v1090_v44, %v8047_v13  ;;  %v4429_v4 = vrot.slane %v4427_v3, 4  ;;  %v4430_v42 = vrot.slane %v5416_v47, 5  ;;  %v8991_v44 = vld [vmem:[#allocation9_spill] sm:$0xff] }
 0x153   : > { %v5768_v19 = vpop.f32.mrf.mxu0  ;;  %v5733_v1 = vpop.f32.mrf.mxu1  ;;  %5936 = vmatmul.mubr.msk.bf16.gmra.mxu1 %vm660_vm3, %v8127_v63  ;;  %v3946_v50 = vshrl.u32 %v5417_v55, 16  ;;  %v3949_v54 = vshll.u32 %v5417_v55, 16  ;;  %v3955_v13 = vshll.u32 %v8333_v38, 16  ;;  %v3959_v40 = vshrl.u32 %v8333_v38, 16 }
 0x154   : > { %v8341_v41 = vadd.f32 %v1515_v48, %v1091_v35  ;;  %v1112_v39 = vadd.f32 %v5733_v1, %v8990_v21  ;;  %5939 = vmatprep.mubr.msk.bf16.mxu1 %vm660_vm3, %v8206_v8  ;;  %v4421_v63 = vsel %vm6613_vm7, %v5482_v56, %v4420_v46  ;;  %v4424_v47 = vsel %vm6613_vm7, %v4422_v43, %v4423_v60 }
 0x155   : > { %v1531_v37 = vpop.f32.mrf.mxu0  ;;  %v1103_v52 = vpop.f32.mrf.mxu1  ;;  %v3929_v25 = vrot.slane %v3928_v53, 4  ;;  %v3943_v48 = vrot.slane %v3941_v9, 5  ;;  %v3939_v8 = vrot.slane %v3938_v5, 4  ;;  %v4428_v46 = vsel %vm6613_vm7, %v5483_v22, %v4427_v3 }
 0x156   : > { %v8352_v55 = vadd.f32 %v5767_v57, %v1112_v39  ;;  %v1104_v35 = vadd.f32 %v1103_v52, %v8991_v44  ;;  %v4431_v57 = vsel %vm6613_vm7, %v4429_v4, %v4430_v42  ;;  %v3948_v60 = vrot.slane %v3946_v50, 4  ;;  %v5468_v52 = vld [vmem:[%s6269_s30 + $0xcc] sm:$0xe]  ;;  %v8993_v42 = vld [vmem:[#allocation16_spill] sm:$0xff] }
 0x157   : > { %v5771_v1 = vpop.f32.mrf.mxu0  ;;  %5974 = vmatmul.mubr.msk.bf16.gmra.mxu0 %vm660_vm3, %v5497_v15  ;;  %v5734_v56 = vpop.f32.mrf.mxu1  ;;  %v3951_v43 = vrot.slane %v3949_v54, 5  ;;  %v4434_v53 = vrot.slane %v8333_v38, 5  ;;  %v5419_v15 = vld [vmem:[%s6269_s30 + $0xd4] sm:$0x1]  ;;  %v3957_v5 = vrot.slane %v3955_v13, 5  ;;  %v3961_v39 = vrot.slane %v3959_v40, 4 }
 0x158   : > { %5977 = vmatprep.mubr.msk.bf16.mxu0 %vm660_vm3, %v5498_v31  ;;  %v8365_v9 = vadd.f32 %v1528_v59, %v1104_v35  ;;  %v1115_v7 = vadd.f32 %v5734_v56, %v8992_v18  ;;  %v3910_v31 = vsel %vm6318_vm4, %v8326_v36, %v8271_v33  ;;  %v3920_v38 = vsel %vm6318_vm4, %v8330_v51, %v8319_v23  ;;  %s5525_s30 = sshll.u32 %s6232_s16, 12 }
 0x159   : > { %v1544_v21 = vpop.f32.mrf.mxu0  ;;  %v1106_v3 = vpop.f32.mrf.mxu1  ;;  %v5499_v59 = vcombine.low %v4421_v63, %v4424_v47  ;;  %v3934_v22 = vsel %vm6318_vm4, %v3929_v25, %v8311_v26  ;;  %v3944_v13 = vsel %vm6318_vm4, %v3939_v8, %v3943_v48  ;;  %v5500_v40 = vcombine.low %v4428_v46, %v4431_v57  ;;  %v8994_v26 = vld [vmem:[#allocation17_spill] sm:$0xff]  ;;  %s8788_s11 = scalar_lea.hbm %s8849_s2, %s5525_s30 }
 0x15a   : > { %v8381_v4 = vadd.f32 %v5768_v19, %v1115_v7  ;;  %v1107_v50 = vadd.f32 %v1106_v3, %v8993_v42  ;;  %v3965_v36 = vshll.u32 %v5419_v15, 16  ;;  %v5484_v23 = vrot.slane %v5468_v52, 9  ;;  %v8995_v46 = vld [vmem:[#allocation13_spill] sm:$0xff] }
 0x15b   : > { %v5772_v54 = vpop.f32.mrf.mxu0  ;;  %v5737_v33 = vpop.f32.mrf.mxu1  ;;  %5940 = vmatmul.mubr.msk.bf16.gmra.mxu1 %vm660_vm3, %v8282_v61  ;;  %v4436_v51 = vrot.slane %v4434_v53, 4  ;;  %v4437_v63 = vrot.slane %v5419_v15, 5  ;;  %v3952_v44 = vor.u32 %v3951_v43, %v3948_v60  ;;  %v3962_v35 = vor.u32 %v3961_v39, %v3957_v5 }
 0x15c   : > { %v8388_v47 = vadd.f32 %v1531_v37, %v1107_v50  ;;  %v1128_v19 = vadd.f32 %v5737_v33, %v8994_v26  ;;  %5943 = vmatprep.mubr.msk.bf16.mxu1 %vm660_vm3, %v8298_v30  ;;  %v5434_v57 = vcombine.low %v3910_v31, %v3920_v38  ;;  %v5435_v37 = vcombine.low %v3934_v22, %v3944_v13 }
 0x15d   : > { %v1547_v25 = vpop.f32.mrf.mxu0  ;;  %v1119_v48 = vpop.f32.mrf.mxu1  ;;  %v3967_v7 = vrot.slane %v3965_v36, 5  ;;  %v4435_v15 = vsel %vm6613_vm7, %v5484_v23, %v4434_v53  ;;  %v4438_v30 = vsel %vm6613_vm7, %v4436_v51, %v4437_v63  ;;  %v3953_v52 = vrot.slane %v3952_v44, 4  ;;  %v8999_v51 = vld [vmem:[#allocation23_spill] sm:$0xff] }
 0x15e   : > { %v8393_v8 = vadd.f32 %v5771_v1, %v1128_v19  ;;  %v1120_v56 = vadd.f32 %v1119_v48, %v8995_v46  ;;  %v8996_v1 = vld [vmem:[#allocation19_spill] sm:$0xff]  ;;  %v3963_v3 = vrot.slane %v3962_v35, 4  ;;  %v5501_v50 = vcombine.low %v4435_v15, %v4438_v30  ;;  %v9000_v35 = vld [vmem:[#allocation24_spill] sm:$0xff] }
 0x15f   : > { %v5775_v61 = vpop.f32.mrf.mxu0  ;;  %5978 = vmatmul.mubr.msk.bf16.gmra.mxu0 %vm660_vm3, %v5499_v59  ;;  %v5738_v18 = vpop.f32.mrf.mxu1  ;;  %v8997_v59 = vld [vmem:[#allocation21_spill] sm:$0xff]  ;;  %v3958_v33 = vsel %vm6318_vm4, %v3953_v52, %v3957_v5 }
 0x160   : > { %5981 = vmatprep.mubr.msk.bf16.mxu0 %vm660_vm3, %v5500_v40  ;;  %v8402_v60 = vadd.f32 %v1544_v21, %v1120_v56  ;;  %v1131_v43 = vadd.f32 %v5738_v18, %v8996_v1 }
 0x161   : > { %v1560_v39 = vpop.f32.mrf.mxu0  ;;  %v1122_v31 = vpop.f32.mrf.mxu1 }
 0x162   : > { %v8405_v38 = vadd.f32 %v5772_v54, %v1131_v43  ;;  %v1123_v22 = vadd.f32 %v1122_v31, %v8997_v59  ;;  %v3968_v54 = vsel %vm6318_vm4, %v3963_v3, %v3967_v7 }
 0x163   : > { %v5776_v42 = vpop.f32.mrf.mxu0  ;;  %v5741_v13 = vpop.f32.mrf.mxu1  ;;  %5944 = vmatmul.mubr.msk.bf16.gmra.mxu1 %vm660_vm3, %v5434_v57 }
 0x164   : > { %v8409_v53 = vadd.f32 %v1547_v25, %v1123_v22  ;;  %v1144_v21 = vadd.f32 %v5741_v13, %v8998_v58  ;;  %5947 = vmatprep.mubr.msk.bf16.mxu1 %vm660_vm3, %v5435_v37  ;;  %v5436_v25 = vcombine.low %v3958_v33, %v3968_v54 }
 0x165   : > { %v1563_v40 = vpop.f32.mrf.mxu0  ;;  %v1135_v36 = vpop.f32.mrf.mxu1 }
 0x166   : > { %v8417_v23 = vadd.f32 %v5775_v61, %v1144_v21  ;;  %v1136_v63 = vadd.f32 %v1135_v36, %v8999_v51 }
 0x167   : > { %v5779_v26 = vpop.f32.mrf.mxu0  ;;  %5982 = vmatmul.mubr.msk.bf16.gmra.mxu0 %vm660_vm3, %v5501_v50  ;;  %v5742_v19 = vpop.f32.mrf.mxu1 }
 0x168   : > { %v8421_v44 = vadd.f32 %v1560_v39, %v1136_v63  ;;  %v1147_v48 = vadd.f32 %v5742_v19, %v9000_v35  ;;  %v9002_v63 = vld [vmem:[#allocation14_spill] sm:$0xff] }
 0x169   : > { %v1576_v46 = vpop.f32.mrf.mxu0  ;;  %v1138_v56 = vpop.f32.mrf.mxu1 }
 0x16a   : > { %v8424_v5 = vadd.f32 %v5776_v42, %v1147_v48  ;;  %v1139_v57 = vadd.f32 %v1138_v56, %v9001_v27 }
 0x16b   : > { %v5780_v18 = vpop.f32.mrf.mxu0  ;;  %v5745_v61 = vpop.f32.mrf.mxu1  ;;  %5948 = vmatmul.mubr.msk.bf16.gmra.mxu1 %vm660_vm3, %v5436_v25 }
 0x16c   : > { %v8428_v37 = vadd.f32 %v1563_v40, %v1139_v57  ;;  %v1160_v7 = vadd.f32 %v5745_v61, %v8039_v45 }
 0x16d   : > { %v1579_v15 = vpop.f32.mrf.mxu0  ;;  %v1151_v30 = vpop.f32.mrf.mxu1 }
 0x16e   : > { %v8431_v1 = vadd.f32 %v5779_v26, %v1160_v7  ;;  %v1152_v43 = vadd.f32 %v1151_v30, %v8053_v62 }
 0x16f   : > { %v5819_v39 = vpop.f32.mrf.mxu0  ;;  %v5746_v52 = vpop.f32.mrf.mxu1 }
 0x170   : > { %v8434_v3 = vadd.f32 %v1576_v46, %v1152_v43  ;;  %v1163_v31 = vadd.f32 %v5746_v52, %v8076_v2 }
 0x171   : > { %v2549_v59 = vpop.f32.mrf.mxu0  ;;  %v1154_v22 = vpop.f32.mrf.mxu1 }
 0x172   : > { %v8437_v42 = vadd.f32 %v5780_v18, %v1163_v31  ;;  %v1155_v50 = vadd.f32 %v1154_v22, %v8091_v29 }
 0x173   : > { %v5820_v13 = vpop.f32.mrf.mxu0  ;;  %v5785_v45 = vpop.f32.mrf.mxu1 }
 0x174   : > { %v8440_v58 = vadd.f32 %v1579_v15, %v1155_v50  ;;  %v1952_v21 = vadd.f32 %v5785_v45, %v8133_v0 }
 0x175   : > { %v2552_v40 = vpop.f32.mrf.mxu0  ;;  %v1823_v62 = vpop.f32.mrf.mxu1 }
 0x176   : > { %v8443_v33 = vadd.f32 %v5819_v39, %v1952_v21  ;;  %v1950_v54 = vadd.f32 %v1823_v62, %v8148_v34 }
 0x177   : > { %v5823_v36 = vpop.f32.mrf.mxu0  ;;  %v5786_v2 = vpop.f32.mrf.mxu1 }
 0x178   : > { %v8446_v51 = vadd.f32 %v2549_v59, %v1950_v54  ;;  %v1953_v26 = vadd.f32 %v5786_v2, %v9002_v63 }
 0x179   : > { %v2565_v19 = vpop.f32.mrf.mxu0  ;;  %v1826_v29 = vpop.f32.mrf.mxu1 }
 0x17a   : > { %v8449_v25 = vadd.f32 %v5820_v13, %v1953_v26  ;;  %v1951_v35 = vadd.f32 %v1826_v29, %v8170_v12 }
 0x17b   : > { %v5824_v48 = vpop.f32.mrf.mxu0  ;;  %v5789_v0 = vpop.f32.mrf.mxu1 }
 0x17c   : > { %v8452_v46 = vadd.f32 %v2552_v40, %v1951_v35  ;;  %v1956_v56 = vadd.f32 %v5789_v0, %v8185_v20 }
 0x17d   : > { %v2568_v27 = vpop.f32.mrf.mxu0  ;;  %v1839_v34 = vpop.f32.mrf.mxu1 }
 0x17e   : > { %v8455_v57 = vadd.f32 %v5823_v36, %v1956_v56  ;;  %v1954_v18 = vadd.f32 %v1839_v34, %v8203_v10 }
 0x17f   : > { %v5827_v61 = vpop.f32.mrf.mxu0  ;;  %v5790_v7 = vpop.f32.mrf.mxu1 }
 0x180   : > { %v8458_v15 = vadd.f32 %v2565_v19, %v1954_v18  ;;  %v1957_v30 = vadd.f32 %v5790_v7, %v8216_v16 }
 0x181   : > { %v2581_v43 = vpop.f32.mrf.mxu0  ;;  %v1842_v12 = vpop.f32.mrf.mxu1 }
 0x182   : > { %v8461_v39 = vadd.f32 %v5824_v48, %v1957_v30  ;;  %v1955_v52 = vadd.f32 %v1842_v12, %v8235_v49 }
 0x183   : > { %v5828_v31 = vpop.f32.mrf.mxu0  ;;  %v5793_v20 = vpop.f32.mrf.mxu1 }
 0x184   : > { %v8464_v59 = vadd.f32 %v2568_v27, %v1955_v52  ;;  %v1960_v22 = vadd.f32 %v5793_v20, %v8244_v28 }
 0x185   : > { %v2584_v50 = vpop.f32.mrf.mxu0  ;;  %v1855_v10 = vpop.f32.mrf.mxu1 }
 0x186   : > { %v8467_v13 = vadd.f32 %v5827_v61, %v1960_v22  ;;  %v1958_v45 = vadd.f32 %v1855_v10, %v8265_v24 }
 0x187   : > { %v5831_v21 = vpop.f32.mrf.mxu0  ;;  %v5794_v16 = vpop.f32.mrf.mxu1 }
 0x188   : > { %v8470_v40 = vadd.f32 %v2581_v43, %v1958_v45  ;;  %v1961_v62 = vadd.f32 %v5794_v16, %v8275_v17 }
 0x189   : > { %v2597_v54 = vpop.f32.mrf.mxu0  ;;  %v1858_v49 = vpop.f32.mrf.mxu1 }
 0x18a   : > { %v8473_v36 = vadd.f32 %v5828_v31, %v1961_v62  ;;  %v1959_v2 = vadd.f32 %v1858_v49, %v8293_v6 }
 0x18b   : > { %v5832_v63 = vpop.f32.mrf.mxu0  ;;  %v5797_v28 = vpop.f32.mrf.mxu1 }
 0x18c   : > { %v8476_v26 = vadd.f32 %v2584_v50, %v1959_v2  ;;  %v1964_v19 = vadd.f32 %v5797_v28, %v8303_v11 }
 0x18d   : > { %v2600_v29 = vpop.f32.mrf.mxu0  ;;  %v1871_v24 = vpop.f32.mrf.mxu1 }
 0x18e   : > { %v8479_v35 = vadd.f32 %v5831_v21, %v1964_v19  ;;  %v1962_v48 = vadd.f32 %v1871_v24, %v8323_v32 }
 0x18f   : > { %v5835_v0 = vpop.f32.mrf.mxu0  ;;  %v5798_v17 = vpop.f32.mrf.mxu1 }
 0x190   : > { %v8482_v56 = vadd.f32 %v2597_v54, %v1962_v48  ;;  %v1965_v27 = vadd.f32 %v5798_v17, %v8335_v14 }
 0x191   : > { %v2613_v34 = vpop.f32.mrf.mxu0  ;;  %v1874_v6 = vpop.f32.mrf.mxu1 }
 0x192   : > { %v8485_v18 = vadd.f32 %v5832_v63, %v1965_v27  ;;  %v1963_v61 = vadd.f32 %v1874_v6, %v8341_v41 }
 0x193   : > { %v5836_v7 = vpop.f32.mrf.mxu0  ;;  %v5801_v11 = vpop.f32.mrf.mxu1 }
 0x194   : > { %v8488_v30 = vadd.f32 %v2600_v29, %v1963_v61  ;;  %v1968_v43 = vadd.f32 %v5801_v11, %v8352_v55 }
 0x195   : > { %v2616_v12 = vpop.f32.mrf.mxu0  ;;  %v1887_v32 = vpop.f32.mrf.mxu1 }
 0x196   : > { %v8491_v52 = vadd.f32 %v5835_v0, %v1968_v43  ;;  %v1966_v31 = vadd.f32 %v1887_v32, %v8365_v9 }
 0x197   : > { %v5839_v20 = vpop.f32.mrf.mxu0  ;;  %v5802_v14 = vpop.f32.mrf.mxu1 }
 0x198   : > { %v8494_v22 = vadd.f32 %v2613_v34, %v1966_v31  ;;  %v1969_v50 = vadd.f32 %v5802_v14, %v8381_v4 }
 0x199   : > { %v2629_v10 = vpop.f32.mrf.mxu0  ;;  %v1890_v41 = vpop.f32.mrf.mxu1 }
 0x19a   : > { %v8497_v45 = vadd.f32 %v5836_v7, %v1969_v50  ;;  %v1967_v21 = vadd.f32 %v1890_v41, %v8388_v47 }
 0x19b   : > { %v5840_v16 = vpop.f32.mrf.mxu0  ;;  %v5805_v55 = vpop.f32.mrf.mxu1 }
 0x19c   : > { %9003 = vst [vmem:[#allocation15_spill] sm:$0xff] %v8497_v45  ;;  %v8500_v62 = vadd.f32 %v2616_v12, %v1967_v21  ;;  %v1972_v54 = vadd.f32 %v5805_v55, %v8393_v8 }
 0x19d   : > { %v2632_v49 = vpop.f32.mrf.mxu0  ;;  %v1903_v9 = vpop.f32.mrf.mxu1 }
 0x19e   : > { %9004 = vst [vmem:[#allocation8_spill] sm:$0xff] %v8500_v62  ;;  %v8503_v2 = vadd.f32 %v5839_v20, %v1972_v54  ;;  %v1970_v63 = vadd.f32 %v1903_v9, %v8402_v60 }
 0x19f   : > { %v5843_v28 = vpop.f32.mrf.mxu0  ;;  %v5806_v4 = vpop.f32.mrf.mxu1 }
 0x1a0   : > { %9005 = vst [vmem:[#allocation10_spill] sm:$0xff] %v8503_v2  ;;  %v8506_v19 = vadd.f32 %v2629_v10, %v1970_v63  ;;  %v1973_v29 = vadd.f32 %v5806_v4, %v8405_v38 }
 0x1a1   : > { %v2645_v24 = vpop.f32.mrf.mxu0  ;;  %v1906_v47 = vpop.f32.mrf.mxu1 }
 0x1a2   : > { %9006 = vst [vmem:[#allocation18_spill] sm:$0xff] %v8506_v19  ;;  %v8509_v48 = vadd.f32 %v5840_v16, %v1973_v29  ;;  %v1971_v0 = vadd.f32 %v1906_v47, %v8409_v53 }
 0x1a3   : > { %v5844_v17 = vpop.f32.mrf.mxu0  ;;  %v5809_v8 = vpop.f32.mrf.mxu1 }
 0x1a4   : > { %9007 = vst [vmem:[#allocation20_spill] sm:$0xff] %v8509_v48  ;;  %v8512_v27 = vadd.f32 %v2632_v49, %v1971_v0  ;;  %v1976_v34 = vadd.f32 %v5809_v8, %v8417_v23 }
 0x1a5   : > { %v2648_v6 = vpop.f32.mrf.mxu0  ;;  %v1919_v60 = vpop.f32.mrf.mxu1 }
 0x1a6   : > { %9008 = vst [vmem:[#allocation25_spill] sm:$0xff] %v8512_v27  ;;  %v8515_v61 = vadd.f32 %v5843_v28, %v1976_v34  ;;  %v1974_v7 = vadd.f32 %v1919_v60, %v8421_v44 }
 0x1a7   : > { %v5847_v11 = vpop.f32.mrf.mxu0  ;;  %v5810_v38 = vpop.f32.mrf.mxu1 }
 0x1a8   : > { %9009 = vst [vmem:[#allocation27_spill] sm:$0xff] %v8515_v61  ;;  %v8518_v43 = vadd.f32 %v2645_v24, %v1974_v7  ;;  %v1977_v12 = vadd.f32 %v5810_v38, %v8424_v5 }
 0x1a9   : > { %v2661_v32 = vpop.f32.mrf.mxu0  ;;  %v1922_v53 = vpop.f32.mrf.mxu1 }
 0x1aa   : > { %9010 = vst [vmem:[#allocation28_spill] sm:$0xff] %v8518_v43  ;;  %v8521_v31 = vadd.f32 %v5844_v17, %v1977_v12  ;;  %v1975_v20 = vadd.f32 %v1922_v53, %v8428_v37 }
 0x1ab   : > { %v5848_v14 = vpop.f32.mrf.mxu0  ;;  %v5813_v23 = vpop.f32.mrf.mxu1 }
 0x1ac   : > { %9011 = vst [vmem:[#allocation11_spill] sm:$0xff] %v8521_v31  ;;  %v8524_v50 = vadd.f32 %v2648_v6, %v1975_v20  ;;  %v1980_v10 = vadd.f32 %v5813_v23, %v8431_v1 }
 0x1ad   : > { %v2664_v41 = vpop.f32.mrf.mxu0  ;;  %v1935_v44 = vpop.f32.mrf.mxu1 }
 0x1ae   : > { %9012 = vst [vmem:[#allocation9_spill] sm:$0xff] %v8524_v50  ;;  %v8527_v21 = vadd.f32 %v5847_v11, %v1980_v10  ;;  %v1978_v16 = vadd.f32 %v1935_v44, %v8434_v3 }
 0x1af   : > { %v8530_v55 = vpop.f32.mrf.mxu0  ;;  %v5814_v5 = vpop.f32.mrf.mxu1 }
 0x1b0   : > { %9013 = vst [vmem:[#allocation12_spill] sm:$0xff] %v8527_v21  ;;  %v8532_v54 = vadd.f32 %v2661_v32, %v1978_v16  ;;  %v1981_v49 = vadd.f32 %v5814_v5, %v8437_v42 }
 0x1b1   : > { %v8535_v37 = vpop.f32.mrf.mxu0  ;;  %v1938_v9 = vpop.f32.mrf.mxu1 }
 0x1b2   : > { %9014 = vst [vmem:[#allocation16_spill] sm:$0xff] %v8532_v54  ;;  %v8537_v63 = vadd.f32 %v5848_v14, %v1981_v49  ;;  %v1979_v1 = vadd.f32 %v1938_v9, %v8440_v58 }
 0x1b3   : > { %v8540_v28 = vpop.f32.mrf.mxu0  ;;  %v5853_v4 = vpop.f32.mrf.mxu1 }
 0x1b4   : > { %9015 = vst [vmem:[#allocation17_spill] sm:$0xff] %v8537_v63  ;;  %v8542_v29 = vadd.f32 %v2664_v41, %v1979_v1 }
 0x1b5   : > { %v8544_v3 = vpop.f32.mrf.mxu0  ;;  %v3019_v24 = vpop.f32.mrf.mxu1 }
 0x1b6   : > { %9016 = vst [vmem:[#allocation13_spill] sm:$0xff] %v8542_v29 }
 0x1b7   : > { %v8546_v47 = vpop.f32.mrf.mxu0  ;;  %v5854_v0 = vpop.f32.mrf.mxu1 }
 0x1b9   : > { %v8548_v17 = vpop.f32.mrf.mxu0  ;;  %v8550_v42 = vpop.f32.mrf.mxu1 }
 0x1bb   : > { %v8552_v8 = vpop.f32.mrf.mxu0  ;;  %v8554_v34 = vpop.f32.mrf.mxu1 }
 0x1bd   : > { %v8556_v58 = vpop.f32.mrf.mxu0  ;;  %v8558_v6 = vpop.f32.mrf.mxu1 }
 0x1bf   : > { %v8560_v60 = vpop.f32.mrf.mxu0  ;;  %v8562_v7 = vpop.f32.mrf.mxu1 }
 0x1c1   : > { %v8564_v11 = vpop.f32.mrf.mxu0  ;;  %v8566_v38 = vpop.f32.mrf.mxu1 }
 0x1c3   : > { %v8568_v12 = vpop.f32.mrf.mxu0  ;;  %v8570_v32 = vpop.f32.mrf.mxu1 }
 0x1c5   : > { %v8572_v53 = vpop.f32.mrf.mxu0  ;;  %v8574_v20 = vpop.f32.mrf.mxu1 }
 0x1c7   : > { %v8576_v14 = vpop.f32.mrf.mxu0  ;;  %v8578_v23 = vpop.f32.mrf.mxu1 }
 0x1c9   : > { %v8580_v10 = vpop.f32.mrf.mxu0  ;;  %v8582_v41 = vpop.f32.mrf.mxu1 }
 0x1cb   : > { %v8584_v44 = vpop.f32.mrf.mxu0  ;;  %v8586_v16 = vpop.f32.mrf.mxu1 }
 0x1cd   : > { %v8588_v5 = vpop.f32.mrf.mxu0  ;;  %v8590_v49 = vpop.f32.mrf.mxu1 }
 0x1cf   : > { %v8592_v9 = vpop.f32.mrf.mxu0  ;;  %v8594_v1 = vpop.f32.mrf.mxu1 }
 0x1d0   : > { %9017 = vst [vmem:[#allocation19_spill] sm:$0xff] %v8592_v9 }
 0x1d1   : > { %v8596_v29 = vpop.f32.mrf.mxu0  ;;  %v8598_v63 = vpop.f32.mrf.mxu1 }
 0x1d2   : > { %9018 = vst [vmem:[#allocation21_spill] sm:$0xff] %v8596_v29 }
 0x1d3   : > { %v8600_v54 = vpop.f32.mrf.mxu0  ;;  %v8602_v21 = vpop.f32.mrf.mxu1 }
 0x1d4   : > { %9019 = vst [vmem:[#allocation22_spill] sm:$0xff] %v8600_v54 }
 0x1d5   : > { %v8604_v50 = vpop.f32.mrf.mxu0  ;;  %v8606_v31 = vpop.f32.mrf.mxu1 }
 0x1d6   : > { %9020 = vst [vmem:[#allocation23_spill] sm:$0xff] %v8604_v50 }
 0x1d7   : > { %v8608_v43 = vpop.f32.mrf.mxu0  ;;  %v8610_v61 = vpop.f32.mrf.mxu1 }
 0x1d8   : > { %9021 = vst [vmem:[#allocation24_spill] sm:$0xff] %v8608_v43  ;;  %9022 = vst [vmem:[#allocation26_spill] sm:$0xff] %v8610_v61 }
 0x1d9   : > { %v8612_v27 = vpop.f32.mrf.mxu0  ;;  %v8614_v48 = vpop.f32.mrf.mxu1 }
 0x1da   : > { %9023 = vst [vmem:[#allocation14_spill] sm:$0xff] %v8612_v27  ;;  %9024 = vst [vmem:[#allocation29_spill] sm:$0xff] %v8614_v48 }
 0x1db   : > { %v8616_v19 = vpop.f32.mrf.mxu0  ;;  %v8618_v2 = vpop.f32.mrf.mxu1 }
 0x1dc   : > { %9025 = vst [vmem:[#allocation30_spill] sm:$0xff] %v8616_v19  ;;  %9026 = vst [vmem:[#allocation31_spill] sm:$0xff] %v8618_v2 }
 0x1dd   : > { %v8620_v62 = vpop.f32.mrf.mxu0  ;;  %v8622_v54 = vpop.f32.mrf.mxu1 }
 0x1de   : > { %9027 = vst [vmem:[#allocation32_spill] sm:$0xff] %v8620_v62  ;;  %9028 = vst [vmem:[#allocation33_spill] sm:$0xff] %v8622_v54 }
 0x1df   : > { %v8624_v29 = vpop.f32.mrf.mxu0  ;;  %v8626_v50 = vpop.f32.mrf.mxu1 }
 0x1e0   : > { %9029 = vst [vmem:[#allocation34_spill] sm:$0xff] %v8624_v29  ;;  %9030 = vst [vmem:[#allocation35_spill] sm:$0xff] %v8626_v50 }
 0x1e1   : > { %v8628_v45 = vpop.f32.mrf.mxu0  ;;  %v8630_v43 = vpop.f32.mrf.mxu1 }
 0x1e2   : > { %9031 = vst [vmem:[#allocation36_spill] sm:$0xff] %v8628_v45  ;;  %9032 = vst [vmem:[#allocation37_spill] sm:$0xff] %v8630_v43 }
 0x1e3   : > { %v8632_v61 = vpop.f32.mrf.mxu0  ;;  %v8634_v27 = vpop.f32.mrf.mxu1 }
 0x1e4   : > { %9033 = vst [vmem:[#allocation38_spill] sm:$0xff] %v8632_v61  ;;  %9034 = vst [vmem:[#allocation39_spill] sm:$0xff] %v8634_v27 }
 0x1e5   : > { %v8636_v48 = vpop.f32.mrf.mxu0  ;;  %v8638_v19 = vpop.f32.mrf.mxu1 }
 0x1e6   : > { %9035 = vst [vmem:[#allocation40_spill] sm:$0xff] %v8636_v48  ;;  %9036 = vst [vmem:[#allocation41_spill] sm:$0xff] %v8638_v19  ;;  %v3148_v48 = vadd.f32 %v5853_v4, %v8443_v33  ;;  %v3147_v33 = vadd.f32 %v8550_v42, %v8452_v46 }
 0x1e7   : > { %v8640_v2 = vpop.f32.mrf.mxu0  ;;  %v8642_v62 = vpop.f32.mrf.mxu1 }
 0x1e8   : > { %9037 = vst [vmem:[#allocation42_spill] sm:$0xff] %v8640_v2  ;;  %9038 = vst [vmem:[#allocation43_spill] sm:$0xff] %v8642_v62  ;;  %v3146_v2 = vadd.f32 %v3019_v24, %v8446_v51  ;;  %v3152_v24 = vadd.f32 %v8554_v34, %v8455_v57 }
 0x1e9   : > { %v8644_v54 = vpop.f32.mrf.mxu0  ;;  %v8646_v29 = vpop.f32.mrf.mxu1 }
 0x1ea   : > { %9039 = vst [vmem:[#allocation44_spill] sm:$0xff] %v8644_v54  ;;  %9040 = vst [vmem:[#allocation45_spill] sm:$0xff] %v8646_v29  ;;  %v3507_v54 = vadd.f32 %v8530_v55, %v3148_v48 }
 0x1eb   : > { %v8648_v50 = vpop.f32.mrf.mxu0  ;;  %v8650_v45 = vpop.f32.mrf.mxu1 }
 0x1ec   : > { %9041 = vst [vmem:[#allocation46_spill] sm:$0xff] %v8648_v50  ;;  %9042 = vst [vmem:[#allocation47_spill] sm:$0xff] %v8650_v45  ;;  %v3149_v50 = vadd.f32 %v5854_v0, %v8449_v25 }
 0x1ed   : > { %v8652_v43 = vpop.f32.mrf.mxu0  ;;  %v8654_v61 = vpop.f32.mrf.mxu1 }
 0x1ee   : > { %9043 = vst [vmem:[#allocation48_spill] sm:$0xff] %v8652_v43  ;;  %9044 = vst [vmem:[#allocation49_spill] sm:$0xff] %v8654_v61  ;;  %v3505_v43 = vadd.f32 %v8535_v37, %v3146_v2  ;;  %v3508_v51 = vadd.f32 %v8540_v28, %v3149_v50  ;;  %v3150_v2 = vadd.f32 %v8558_v6, %v8458_v15 }
 0x1ef   : > { %v5955_v27 = vpop.f32.mrf.mxu0  ;;  %v8657_v19 = vpop.f32.mrf.mxu1  ;;  %v3511_v50 = vadd.f32 %v8546_v47, %v3152_v24  ;;  %v3151_v28 = vadd.f32 %v8566_v38, %v8464_v59  ;;  %v3156_v47 = vadd.f32 %v8570_v32, %v8467_v13 }
 0x1f0   : > { %9045 = vst [vmem:[#allocation50_spill] sm:$0xff] %v8657_v19  ;;  %v3509_v15 = vadd.f32 %v8548_v17, %v3150_v2 }
 0x1f1   : > { %v4574_v62 = vpop.f32.mrf.mxu0  ;;  %v8660_v9 = vpop.f32.mrf.mxu1  ;;  %v3510_v17 = vadd.f32 %v8556_v58, %v3151_v28  ;;  %v3515_v32 = vadd.f32 %v8560_v60, %v3156_v47  ;;  %v3158_v47 = vadd.f32 %v8590_v49, %v8482_v56 }
 0x1f2   : > { %9046 = vst [vmem:[#allocation51_spill] sm:$0xff] %v8660_v9  ;;  %v3506_v9 = vadd.f32 %v8544_v3, %v3147_v33 }
 0x1f3   : > { %v5956_v45 = vpop.f32.mrf.mxu0  ;;  %v5921_v29 = vpop.f32.mrf.mxu1 }
 0x1f4   : > { %v4233_v4 = vadd.f32 %v5921_v29, %v3507_v54 }
 0x1f5   : > { %v4577_v61 = vpop.f32.mrf.mxu0  ;;  %v4104_v19 = vpop.f32.mrf.mxu1 }
 0x1f6   : > { %v4703_v48 = vadd.f32 %v5955_v27, %v4233_v4  ;;  %v4231_v55 = vadd.f32 %v4104_v19, %v3505_v43  ;;  %v3153_v43 = vadd.f32 %v8562_v7, %v8461_v39 }
 0x1f7   : > { %v5959_v25 = vpop.f32.mrf.mxu0  ;;  %v5922_v0 = vpop.f32.mrf.mxu1 }
 0x1f8   : > { %4735 = vst [vmem:[%s6271_s4 + $0x10] sm:$0xff] %v4703_v48  ;;  %v4701_v46 = vadd.f32 %v4574_v62, %v4231_v55  ;;  %v4234_v54 = vadd.f32 %v5922_v0, %v3508_v51  ;;  %v3512_v59 = vadd.f32 %v8552_v8, %v3153_v43  ;;  %v4808_v38 = vmul.f32 %v4703_v48, %v4703_v48 }
 0x1f9   : > { %v4590_v37 = vpop.f32.mrf.mxu0  ;;  %v4107_v29 = vpop.f32.mrf.mxu1  ;;  %v3154_v0 = vadd.f32 %v8574_v20, %v8470_v40 }
 0x1fa   : > { %4733 = vst [vmem:[%s6271_s4] sm:$0xff] %v4701_v46  ;;  %v4704_v57 = vadd.f32 %v5956_v45, %v4234_v54  ;;  %v4232_v27 = vadd.f32 %v4107_v29, %v3506_v9  ;;  %v4806_v45 = vmul.f32 %v4701_v46, %v4701_v46 }
 0x1fb   : > { %v5960_v19 = vpop.f32.mrf.mxu0  ;;  %v5925_v3 = vpop.f32.mrf.mxu1  ;;  %v3513_v28 = vadd.f32 %v8564_v11, %v3154_v0  ;;  %v3159_v0 = vadd.f32 %v8598_v63, %v8488_v30 }
 0x1fc   : > { %4736 = vst [vmem:[%s6271_s4 + $0x18] sm:$0xff] %v4704_v57  ;;  %v4702_v62 = vadd.f32 %v4577_v61, %v4232_v27  ;;  %v4237_v42 = vadd.f32 %v5925_v3, %v3511_v50 }
 0x1fd   : > { %v4593_v34 = vpop.f32.mrf.mxu0  ;;  %v4120_v6 = vpop.f32.mrf.mxu1 }
 0x1fe   : > { %4734 = vst [vmem:[%s6271_s4 + $0x8] sm:$0xff] %v4702_v62  ;;  %v4766_v9 = vadd.f32 %v4702_v62, %v4701_v46  ;;  %v4807_v33 = vmul.f32 %v4702_v62, %v4702_v62  ;;  %v4707_v39 = vadd.f32 %v5959_v25, %v4237_v42  ;;  %v4235_v7 = vadd.f32 %v4120_v6, %v3509_v15 }
 0x1ff   : > { %v5963_v4 = vpop.f32.mrf.mxu0  ;;  %v5926_v61 = vpop.f32.mrf.mxu1  ;;  %v3157_v25 = vadd.f32 %v8578_v23, %v8473_v36  ;;  %v4809_v46 = vmul.f32 %v4704_v57, %v4704_v57 }
 0x200   : > { %v4767_v51 = vadd.f32 %v4766_v9, %v4703_v48  ;;  %v4838_v24 = vadd.f32 %v4807_v33, %v4806_v45  ;;  %4739 = vst [vmem:[%s6271_s4 + $0x30] sm:$0xff] %v4707_v39  ;;  %v4705_v55 = vadd.f32 %v4590_v37, %v4235_v7  ;;  %v4238_v2 = vadd.f32 %v5926_v61, %v3512_v59 }
 0x201   : > { %v4606_v13 = vpop.f32.mrf.mxu0  ;;  %v4123_v8 = vpop.f32.mrf.mxu1  ;;  %v3155_v37 = vadd.f32 %v8582_v41, %v8476_v26  ;;  %v3516_v3 = vadd.f32 %v8568_v12, %v3157_v25  ;;  %v4812_v12 = vmul.f32 %v4707_v39, %v4707_v39  ;;  %v3164_v25 = vadd.f32 %v8602_v21, %v8491_v52 }
 0x202   : > { %v4839_v54 = vadd.f32 %v4838_v24, %v4808_v38  ;;  %4737 = vst [vmem:[%s6271_s4 + $0x20] sm:$0xff] %v4705_v55  ;;  %v4768_v58 = vadd.f32 %v4767_v51, %v4704_v57  ;;  %v4236_v48 = vadd.f32 %v4123_v8, %v3510_v17  ;;  %v4810_v60 = vmul.f32 %v4705_v55, %v4705_v55 }
 0x203   : > { %v5964_v29 = vpop.f32.mrf.mxu0  ;;  %v4708_v50 = vadd.f32 %v5960_v19, %v4238_v2  ;;  %v5929_v27 = vpop.f32.mrf.mxu1  ;;  %v3514_v19 = vadd.f32 %v8572_v53, %v3155_v37 }
 0x204   : > { %v4769_v40 = vadd.f32 %v4768_v58, %v4705_v55  ;;  %v4840_v20 = vadd.f32 %v4839_v54, %v4809_v46  ;;  %v4706_v43 = vadd.f32 %v4593_v34, %v4236_v48  ;;  %v4241_v36 = vadd.f32 %v5929_v27, %v3515_v32  ;;  %v9047_v27 = vld [vmem:[#allocation19_spill] sm:$0xff] }
 0x205   : > { %v4609_v23 = vpop.f32.mrf.mxu0  ;;  %4740 = vst [vmem:[%s6271_s4 + $0x38] sm:$0xff] %v4708_v50  ;;  %v4136_v57 = vpop.f32.mrf.mxu1  ;;  %v3160_v34 = vadd.f32 %v8586_v16, %v8479_v35  ;;  %v4813_v53 = vmul.f32 %v4708_v50, %v4708_v50  ;;  %v3162_v48 = vadd.f32 %v8606_v31, %v8494_v22 }
 0x206   : > { %v4841_v15 = vadd.f32 %v4840_v20, %v4810_v60  ;;  %4738 = vst [vmem:[%s6271_s4 + $0x28] sm:$0xff] %v4706_v43  ;;  %v4770_v62 = vadd.f32 %v4769_v40, %v4706_v43  ;;  %v4811_v42 = vmul.f32 %v4706_v43, %v4706_v43  ;;  %v4711_v26 = vadd.f32 %v5963_v4, %v4241_v36  ;;  %v9048_v20 = vld [vmem:[#allocation15_spill] sm:$0xff]  ;;  %v9049_v43 = vld [vmem:[#allocation26_spill] sm:$0xff] }
 0x207   : > { %v5967_v41 = vpop.f32.mrf.mxu0  ;;  %v4239_v11 = vadd.f32 %v4136_v57, %v3513_v28  ;;  %v5930_v45 = vpop.f32.mrf.mxu1  ;;  %v3161_v4 = vadd.f32 %v8594_v1, %v8485_v18  ;;  %v3519_v38 = vadd.f32 %v8576_v14, %v3160_v34  ;;  %v3523_v40 = vadd.f32 %v9047_v27, %v3164_v25  ;;  %v9060_v25 = vld [vmem:[#allocation35_spill] sm:$0xff]  ;;  %v9063_v27 = vld [vmem:[#allocation25_spill] sm:$0xff] }
 0x208   : > { %v4771_v6 = vadd.f32 %v4770_v62, %v4707_v39  ;;  %v4842_v9 = vadd.f32 %v4841_v15, %v4811_v42  ;;  %4743 = vst [vmem:[%s6271_s4 + $0x50] sm:$0xff] %v4711_v26  ;;  %v4242_v33 = vadd.f32 %v5930_v45, %v3516_v3  ;;  %v3517_v39 = vadd.f32 %v8580_v10, %v3158_v47  ;;  %v9050_v15 = vld [vmem:[#allocation21_spill] sm:$0xff]  ;;  %v9051_v42 = vld [vmem:[#allocation8_spill] sm:$0xff] }
 0x209   : > { %v4622_v7 = vpop.f32.mrf.mxu0  ;;  %v4709_v59 = vadd.f32 %v4606_v13, %v4239_v11  ;;  %v4139_v17 = vpop.f32.mrf.mxu1  ;;  %v3520_v13 = vadd.f32 %v8584_v44, %v3161_v4  ;;  %v4816_v44 = vmul.f32 %v4711_v26, %v4711_v26  ;;  %v3165_v36 = vadd.f32 %v9049_v43, %v9048_v20  ;;  %v9054_v4 = vld [vmem:[#allocation10_spill] sm:$0xff] }
 0x20a   : > { %v4843_v35 = vadd.f32 %v4842_v9, %v4812_v12  ;;  %v4772_v16 = vadd.f32 %v4771_v6, %v4708_v50  ;;  %v4712_v61 = vadd.f32 %v5964_v29, %v4242_v33  ;;  %v4240_v56 = vadd.f32 %v4139_v17, %v3514_v19  ;;  %v9053_v6 = vld [vmem:[#allocation22_spill] sm:$0xff] }
 0x20b   : > { %v5968_v49 = vpop.f32.mrf.mxu0  ;;  %4741 = vst [vmem:[%s6271_s4 + $0x40] sm:$0xff] %v4709_v59  ;;  %v5933_v51 = vpop.f32.mrf.mxu1  ;;  %v4814_v55 = vmul.f32 %v4709_v59, %v4709_v59  ;;  %v3518_v50 = vadd.f32 %v8588_v5, %v3159_v0  ;;  %v3521_v62 = vadd.f32 %v9050_v15, %v3162_v48  ;;  %v3524_v9 = vadd.f32 %v9053_v6, %v3165_v36  ;;  %v9059_v0 = vld [vmem:[#allocation20_spill] sm:$0xff] }
 0x20c   : > { %v4773_v24 = vadd.f32 %v4772_v16, %v4709_v59  ;;  %v4844_v32 = vadd.f32 %v4843_v35, %v4813_v53  ;;  %4744 = vst [vmem:[%s6271_s4 + $0x58] sm:$0xff] %v4712_v61  ;;  %v4710_v18 = vadd.f32 %v4609_v23, %v4240_v56  ;;  %v4245_v14 = vadd.f32 %v5933_v51, %v3519_v38  ;;  %v9055_v53 = vld [vmem:[#allocation31_spill] sm:$0xff]  ;;  %v9069_v6 = vld [vmem:[#allocation28_spill] sm:$0xff] }
 0x20d   : > { %v4625_v1 = vpop.f32.mrf.mxu0  ;;  %v4152_v2 = vpop.f32.mrf.mxu1  ;;  %v4817_v22 = vmul.f32 %v4712_v61, %v4712_v61  ;;  %v3168_v59 = vadd.f32 %v9055_v53, %v9054_v4 }
 0x20e   : > { %v4845_v8 = vadd.f32 %v4844_v32, %v4814_v55  ;;  %4742 = vst [vmem:[%s6271_s4 + $0x48] sm:$0xff] %v4710_v18  ;;  %v4774_v10 = vadd.f32 %v4773_v24, %v4710_v18  ;;  %v4815_v46 = vmul.f32 %v4710_v18, %v4710_v18  ;;  %v4243_v54 = vadd.f32 %v4152_v2, %v3517_v39  ;;  %v9056_v39 = vld [vmem:[#allocation23_spill] sm:$0xff]  ;;  %v9057_v24 = vld [vmem:[#allocation18_spill] sm:$0xff]  ;;  %v9058_v55 = vld [vmem:[#allocation33_spill] sm:$0xff] }
 0x20f   : > { %v5971_v58 = vpop.f32.mrf.mxu0  ;;  %v4715_v29 = vadd.f32 %v5967_v41, %v4245_v14  ;;  %v5934_v37 = vpop.f32.mrf.mxu1  ;;  %v3166_v32 = vadd.f32 %v9058_v55, %v9057_v24  ;;  %v3169_v14 = vadd.f32 %v9060_v25, %v9059_v0  ;;  %v9074_v25 = vld [vmem:[#allocation36_spill] sm:$0xff] }
 0x210   : > { %v4775_v30 = vadd.f32 %v4774_v10, %v4711_v26  ;;  %v4846_v63 = vadd.f32 %v4845_v8, %v4815_v46  ;;  %v4713_v60 = vadd.f32 %v4622_v7, %v4243_v54  ;;  %v4246_v52 = vadd.f32 %v5934_v37, %v3520_v13  ;;  %v9052_v26 = vld [vmem:[#allocation29_spill] sm:$0xff]  ;;  %v9061_v54 = vld [vmem:[#allocation24_spill] sm:$0xff] }
 0x211   : > { %v4638_v21 = vpop.f32.mrf.mxu0  ;;  %4747 = vst [vmem:[%s6271_s4 + $0x70] sm:$0xff] %v4715_v29  ;;  %v4155_v23 = vpop.f32.mrf.mxu1  ;;  %v3163_v41 = vadd.f32 %v9052_v26, %v9051_v42  ;;  %v4820_v2 = vmul.f32 %v4715_v29, %v4715_v29  ;;  %v9067_v42 = vld [vmem:[#allocation39_spill] sm:$0xff] }
 0x212   : > { %v4847_v31 = vadd.f32 %v4846_v63, %v4816_v44  ;;  %4745 = vst [vmem:[%s6271_s4 + $0x60] sm:$0xff] %v4713_v60  ;;  %v4776_v28 = vadd.f32 %v4775_v30, %v4712_v61  ;;  %v4716_v3 = vadd.f32 %v5968_v49, %v4246_v52  ;;  %v4244_v5 = vadd.f32 %v4155_v23, %v3518_v50  ;;  %v9065_v23 = vld [vmem:[#allocation30_spill] sm:$0xff] }
 0x213   : > { %v5972_v57 = vpop.f32.mrf.mxu0  ;;  %v5937_v19 = vpop.f32.mrf.mxu1  ;;  %v4818_v47 = vmul.f32 %v4713_v60, %v4713_v60  ;;  %v3522_v51 = vadd.f32 %v9056_v39, %v3163_v41  ;;  %v9073_v39 = vld [vmem:[#allocation34_spill] sm:$0xff] }
 0x214   : > { %v4777_v34 = vadd.f32 %v4776_v28, %v4713_v60  ;;  %v4848_v11 = vadd.f32 %v4847_v31, %v4817_v22  ;;  %4748 = vst [vmem:[%s6271_s4 + $0x78] sm:$0xff] %v4716_v3  ;;  %v4249_v45 = vadd.f32 %v5937_v19, %v3523_v40  ;;  %v4714_v33 = vadd.f32 %v4625_v1, %v4244_v5  ;;  %v9064_v40 = vld [vmem:[#allocation37_spill] sm:$0xff] }
 0x215   : > { %v4641_v12 = vpop.f32.mrf.mxu0  ;;  %v4168_v7 = vpop.f32.mrf.mxu1  ;;  %v4821_v30 = vmul.f32 %v4716_v3, %v4716_v3  ;;  %v3167_v20 = vadd.f32 %v9064_v40, %v9063_v27  ;;  %v3528_v22 = vadd.f32 %v9065_v23, %v3169_v14  ;;  %v9080_v23 = vld [vmem:[#allocation40_spill] sm:$0xff] }
 0x216   : > { %v4849_v17 = vadd.f32 %v4848_v11, %v4818_v47  ;;  %v4719_v35 = vadd.f32 %v5971_v58, %v4249_v45  ;;  %v4247_v16 = vadd.f32 %v4168_v7, %v3521_v62  ;;  %4746 = vst [vmem:[%s6271_s4 + $0x68] sm:$0xff] %v4714_v33  ;;  %v4778_v56 = vadd.f32 %v4777_v34, %v4714_v33  ;;  %v9066_v62 = vld [vmem:[#allocation27_spill] sm:$0xff]  ;;  %v9068_v45 = vld [vmem:[#allocation32_spill] sm:$0xff] }
 0x217   : > { %v5975_v61 = vpop.f32.mrf.mxu0  ;;  %v4819_v49 = vmul.f32 %v4714_v33, %v4714_v33  ;;  %v5938_v38 = vpop.f32.mrf.mxu1  ;;  %v3527_v58 = vadd.f32 %v9061_v54, %v3168_v59  ;;  %v9071_v59 = vld [vmem:[#allocation11_spill] sm:$0xff] }
 0x218   : > { %4751 = vst [vmem:[%s6271_s4 + $0x90] sm:$0xff] %v4719_v35  ;;  %v4717_v18 = vadd.f32 %v4638_v21, %v4247_v16  ;;  %v4250_v1 = vadd.f32 %v5938_v38, %v3524_v9  ;;  %v4779_v8 = vadd.f32 %v4778_v56, %v4715_v29  ;;  %v9062_v21 = vld [vmem:[#allocation14_spill] sm:$0xff]  ;;  %v9070_v9 = vld [vmem:[#allocation41_spill] sm:$0xff] }
 0x219   : > { %v4654_v13 = vpop.f32.mrf.mxu0  ;;  %v4850_v10 = vadd.f32 %v4849_v17, %v4819_v49  ;;  %v4171_v46 = vpop.f32.mrf.mxu1  ;;  %v3525_v50 = vadd.f32 %v9062_v21, %v3166_v32  ;;  %v3170_v33 = vadd.f32 %v9070_v9, %v9069_v6  ;;  %v9072_v17 = vld [vmem:[#allocation43_spill] sm:$0xff] }
 0x21a   : > { %4749 = vst [vmem:[%s6271_s4 + $0x80] sm:$0xff] %v4717_v18  ;;  %v4720_v48 = vadd.f32 %v5972_v57, %v4250_v1  ;;  %v4248_v44 = vadd.f32 %v4171_v46, %v3522_v51  ;;  %v4780_v60 = vadd.f32 %v4779_v8, %v4716_v3  ;;  %v4822_v28 = vmul.f32 %v4717_v18, %v4717_v18  ;;  %v9076_v8 = vld [vmem:[#allocation45_spill] sm:$0xff]  ;;  %v9079_v21 = vld [vmem:[#allocation47_spill] sm:$0xff] }
 0x21b   : > { %v5976_v37 = vpop.f32.mrf.mxu0  ;;  %v4851_v63 = vadd.f32 %v4850_v10, %v4820_v2  ;;  %v5941_v52 = vpop.f32.mrf.mxu1  ;;  %v3172_v3 = vadd.f32 %v9067_v42, %v9066_v62  ;;  %v3173_v16 = vadd.f32 %v9072_v17, %v9071_v59  ;;  %v3529_v14 = vadd.f32 %v9074_v25, %v3170_v33  ;;  %v9075_v2 = vld [vmem:[#allocation9_spill] sm:$0xff]  ;;  %v9086_v59 = vld [vmem:[#allocation44_spill] sm:$0xff] }
 0x21c   : > { %4752 = vst [vmem:[%s6271_s4 + $0x98] sm:$0xff] %v4720_v48  ;;  %v4718_v29 = vadd.f32 %v4641_v12, %v4248_v44  ;;  %v4253_v43 = vadd.f32 %v5941_v52, %v3527_v58  ;;  %v4781_v31 = vadd.f32 %v4780_v60, %v4717_v18  ;;  %v3526_v12 = vadd.f32 %v9068_v45, %v3167_v20  ;;  %v9077_v58 = vld [vmem:[#allocation38_spill] sm:$0xff]  ;;  %v9078_v52 = vld [vmem:[#allocation12_spill] sm:$0xff] }
 0x21d   : > { %v4657_v36 = vpop.f32.mrf.mxu0  ;;  %v4852_v57 = vadd.f32 %v4851_v63, %v4821_v30  ;;  %v4184_v15 = vpop.f32.mrf.mxu1  ;;  %v3531_v51 = vadd.f32 %v9073_v39, %v3172_v3  ;;  %v4825_v18 = vmul.f32 %v4720_v48, %v4720_v48  ;;  %v3171_v10 = vadd.f32 %v9076_v8, %v9075_v2  ;;  %v9090_v8 = vld [vmem:[#allocation48_spill] sm:$0xff] }
 0x21e   : > { %4750 = vst [vmem:[%s6271_s4 + $0x88] sm:$0xff] %v4718_v29  ;;  %v4823_v26 = vmul.f32 %v4718_v29, %v4718_v29  ;;  %v4723_v41 = vadd.f32 %v5975_v61, %v4253_v43  ;;  %v4251_v5 = vadd.f32 %v4184_v15, %v3525_v50  ;;  %v4782_v47 = vadd.f32 %v4781_v31, %v4718_v29  ;;  %v9081_v31 = vld [vmem:[#allocation16_spill] sm:$0xff] }
 0x21f   : > { %v5979_v19 = vpop.f32.mrf.mxu0  ;;  %v4853_v34 = vadd.f32 %v4852_v57, %v4822_v28  ;;  %v5942_v11 = vpop.f32.mrf.mxu1  ;;  %v4824_v61 = vmul.f32 %v4719_v35, %v4719_v35  ;;  %v3532_v44 = vadd.f32 %v9077_v58, %v3173_v16  ;;  %v9082_v28 = vld [vmem:[#allocation49_spill] sm:$0xff] }
 0x220   : > { %4755 = vst [vmem:[%s6271_s4 + $0xb0] sm:$0xff] %v4723_v41  ;;  %v4721_v7 = vadd.f32 %v4654_v13, %v4251_v5  ;;  %v4254_v4 = vadd.f32 %v5942_v11, %v3528_v22  ;;  %v4783_v56 = vadd.f32 %v4782_v47, %v4719_v35  ;;  %v3530_v22 = vadd.f32 %v9080_v23, %v3171_v10  ;;  %v9084_v47 = vld [vmem:[#allocation17_spill] sm:$0xff]  ;;  %v9085_v11 = vld [vmem:[#allocation50_spill] sm:$0xff] }
 0x221   : > { %v4670_v53 = vpop.f32.mrf.mxu0  ;;  %v4854_v49 = vadd.f32 %v4853_v34, %v4823_v26  ;;  %v4187_v38 = vpop.f32.mrf.mxu1  ;;  %v3174_v57 = vadd.f32 %v9082_v28, %v9081_v31  ;;  %v4828_v42 = vmul.f32 %v4723_v41, %v4723_v41  ;;  %v3177_v45 = vadd.f32 %v9085_v11, %v9084_v47  ;;  %v9087_v16 = vld [vmem:[#allocation13_spill] sm:$0xff] }
 0x222   : > { %4753 = vst [vmem:[%s6271_s4 + $0xa0] sm:$0xff] %v4721_v7  ;;  %v4724_v24 = vadd.f32 %v5976_v37, %v4254_v4  ;;  %v4252_v55 = vadd.f32 %v4187_v38, %v3526_v12  ;;  %v4784_v13 = vadd.f32 %v4783_v56, %v4720_v48  ;;  %v4826_v30 = vmul.f32 %v4721_v7, %v4721_v7 }
 0x223   : > { %v5980_v32 = vpop.f32.mrf.mxu0  ;;  %v4855_v1 = vadd.f32 %v4854_v49, %v4824_v61  ;;  %v5945_v0 = vpop.f32.mrf.mxu1  ;;  %v3176_v48 = vadd.f32 %v9079_v21, %v9078_v52  ;;  %v3533_v17 = vadd.f32 %v9086_v59, %v3174_v57 }
 0x224   : > { %4756 = vst [vmem:[%s6271_s4 + $0xb8] sm:$0xff] %v4724_v24  ;;  %v4722_v35 = vadd.f32 %v4657_v36, %v4252_v55  ;;  %v4257_v46 = vadd.f32 %v5945_v0, %v3531_v51  ;;  %v4785_v37 = vadd.f32 %v4784_v13, %v4721_v7  ;;  %v4829_v9 = vmul.f32 %v4724_v24, %v4724_v24 }
 0x225   : > { %v4673_v54 = vpop.f32.mrf.mxu0  ;;  %v4856_v63 = vadd.f32 %v4855_v1, %v4825_v18  ;;  %v4200_v60 = vpop.f32.mrf.mxu1 }
 0x226   : > { %4754 = vst [vmem:[%s6271_s4 + $0xa8] sm:$0xff] %v4722_v35  ;;  %v4827_v50 = vmul.f32 %v4722_v35, %v4722_v35  ;;  %v4727_v27 = vadd.f32 %v5979_v19, %v4257_v46  ;;  %v4255_v40 = vadd.f32 %v4200_v60, %v3529_v14  ;;  %v4786_v29 = vadd.f32 %v4785_v37, %v4722_v35  ;;  %v9083_v19 = vld [vmem:[#allocation42_spill] sm:$0xff] }
 0x227   : > { %v4857_v20 = vadd.f32 %v4856_v63, %v4826_v30  ;;  %v5946_v43 = vpop.f32.mrf.mxu1  ;;  %v5983_v36 = vpop.f32.mrf.mxu0  ;;  %v3535_v34 = vadd.f32 %v9083_v19, %v3176_v48 }
 0x228   : > { %4759 = vst [vmem:[%s6271_s4 + $0xd0] sm:$0xff] %v4727_v27  ;;  %v4725_v15 = vadd.f32 %v4670_v53, %v4255_v40  ;;  %v4258_v62 = vadd.f32 %v5946_v43, %v3532_v44  ;;  %v4787_v3 = vadd.f32 %v4786_v29, %v4723_v41  ;;  %v9088_v41 = vld [vmem:[#allocation51_spill] sm:$0xff] }
 0x229   : > { %v4858_v26 = vadd.f32 %v4857_v20, %v4827_v50  ;;  %v4203_v5 = vpop.f32.mrf.mxu1  ;;  %v4686_v53 = vpop.f32.mrf.mxu0  ;;  %v3175_v61 = vadd.f32 %v9088_v41, %v9087_v16 }
 0x22a   : > { %4757 = vst [vmem:[%s6271_s4 + $0xc0] sm:$0xff] %v4725_v15  ;;  %v4728_v12 = vadd.f32 %v5980_v32, %v4258_v62  ;;  %v4256_v6 = vadd.f32 %v4203_v5, %v3530_v22  ;;  %v4788_v7 = vadd.f32 %v4787_v3, %v4724_v24  ;;  %v4830_v39 = vmul.f32 %v4725_v15, %v4725_v15  ;;  %v9089_v32 = vld [vmem:[#allocation46_spill] sm:$0xff] }
 0x22b   : > { %v4859_v33 = vadd.f32 %v4858_v26, %v4828_v42  ;;  %v5949_v4 = vpop.f32.mrf.mxu1  ;;  %v3536_v18 = vadd.f32 %v9089_v32, %v3177_v45  ;;  %v5984_v2 = vpop.f32.mrf.mxu0  ;;  %v3534_v10 = vadd.f32 %v9090_v8, %v3175_v61 }
 0x22c   : > { %4760 = vst [vmem:[%s6271_s4 + $0xd8] sm:$0xff] %v4728_v12  ;;  %v4726_v56 = vadd.f32 %v4673_v54, %v4256_v6  ;;  %v4261_v49 = vadd.f32 %v5949_v4, %v3535_v34  ;;  %v4789_v38 = vadd.f32 %v4788_v7, %v4725_v15  ;;  %v4832_v54 = vmul.f32 %v4727_v27, %v4727_v27 }
 0x22d   : > { %v4860_v51 = vadd.f32 %v4859_v33, %v4829_v9  ;;  %v4216_v55 = vpop.f32.mrf.mxu1  ;;  %v4833_v60 = vmul.f32 %v4728_v12, %v4728_v12  ;;  %v4689_v48 = vpop.f32.mrf.mxu0 }
 0x22e   : > { %4758 = vst [vmem:[%s6271_s4 + $0xc8] sm:$0xff] %v4726_v56  ;;  %v4831_v24 = vmul.f32 %v4726_v56, %v4726_v56  ;;  %v4731_v1 = vadd.f32 %v5983_v36, %v4261_v49  ;;  %v4259_v13 = vadd.f32 %v4216_v55, %v3533_v17  ;;  %v4790_v25 = vadd.f32 %v4789_v38, %v4726_v56 }
 0x22f   : > { %v4861_v0 = vadd.f32 %v4860_v51, %v4830_v39  ;;  %v5950_v14 = vpop.f32.mrf.mxu1 }
 0x230   : > { %4763 = vst [vmem:[%s6271_s4 + $0xf0] sm:$0xff] %v4731_v1  ;;  %v4729_v35 = vadd.f32 %v4686_v53, %v4259_v13  ;;  %v4262_v46 = vadd.f32 %v5950_v14, %v3536_v18  ;;  %v4791_v58 = vadd.f32 %v4790_v25, %v4727_v27 }
 0x231   : > { %v4862_v44 = vadd.f32 %v4861_v0, %v4831_v24  ;;  %v4219_v37 = vpop.f32.mrf.mxu1 }
 0x232   : > { %4761 = vst [vmem:[%s6271_s4 + $0xe0] sm:$0xff] %v4729_v35  ;;  %v4732_v30 = vadd.f32 %v5984_v2, %v4262_v46  ;;  %v4260_v63 = vadd.f32 %v4219_v37, %v3534_v10  ;;  %v4792_v21 = vadd.f32 %v4791_v58, %v4728_v12  ;;  %v4834_v40 = vmul.f32 %v4729_v35, %v4729_v35 }
 0x233   : > { %v4863_v52 = vadd.f32 %v4862_v44, %v4832_v54 }
 0x234   : > { %4764 = vst [vmem:[%s6271_s4 + $0xf8] sm:$0xff] %v4732_v30  ;;  %v4730_v50 = vadd.f32 %v4689_v48, %v4260_v63  ;;  %v4793_v27 = vadd.f32 %v4792_v21, %v4729_v35 }
 0x235   : > { %v4864_v20 = vadd.f32 %v4863_v52, %v4833_v60 }
 0x236   : > { %4762 = vst [vmem:[%s6271_s4 + $0xe8] sm:$0xff] %v4730_v50  ;;  %v4835_v29 = vmul.f32 %v4730_v50, %v4730_v50  ;;  %v4794_v36 = vadd.f32 %v4793_v27, %v4730_v50 }
 0x237   : > { %v4865_v43 = vadd.f32 %v4864_v20, %v4834_v40 }
 0x238   : > { %6109 = shalt.err (!%p6106_p7)
}
 0x239   : > { %s6110_s24 = scalar_lea.hbm %s8788_s11, 4096  ;;  %s6114_s28 = scalar_lea.hbm %s8849_s2, 8192 }
 0x23a   : > { %p6111_p8 = scmp.ne.s32.totalorder %s8788_s11, %s6110_s24  ;;  %p6115_p11 = scmp.lt.s32.totalorder %s8788_s11, %s8849_s2 }
 0x23b   : > { %p6116_p12 = scmp.lt.s32.totalorder %s6114_s28, %s6110_s24 }
 0x23c   : > { %p6112_p9 = pnand %p6111_p8, %p6251_p5 }
 0x23d   : > { %p6117_p13 = por %p6116_p12, %p6115_p11 }
 0x23e   : > { %p6113_p10 = pneg %p6112_p9 }
 0x240   : > { %p6118_p0 = pnand %p6117_p13, %p6113_p10 }
 0x242   : > { %6121 = shalt.err (!%p6118_p0)
}
 0x243   : > { %s6188_s6 = smov 128   ;;  %s6189_s7 = smov 8   ;;  %v4836_v23 = vmul.f32 %v4731_v1, %v4731_v1  ;;  %v4795_v22 = vadd.f32 %v4794_v36, %v4731_v1  ;;  %v4866_v31 = vadd.f32 %v4865_v43, %v4835_v29  ;;  %v4837_v28 = vmul.f32 %v4732_v30, %v4732_v30  ;;  %v4765_v12 = vld [vmem:[#allocation4] sm:$0x1]  ;;  %v4805_v33 = vld [vmem:[#allocation4 + $0x1] sm:$0x1] }
 0x244   : > { %5998 = dma.vmem_to_hbm [thread:$0]  (%p6251_p5), %s8790_s8, 4096, %s8788_s11, %s8796_s17, %s6188_s6, %s6188_s6, %s6189_s7  }
 0x245   : > { %v4796_v57 = vadd.f32 %v4795_v22, %v4732_v30  ;;  %v4867_v15 = vadd.f32 %v4866_v31, %v4836_v23  ;;  %s6190_s22 = smov [#allocation4]  }
 0x246   : > { %s4905_s30 = sshll.u32 %s6190_s22, 4  ;;  %s4906_s30 = int_to_ptr.vmem [resolvable:$true] %s4905_s30 }
 0x247   : > { %v4797_v62 = vrot.slane %v4796_v57, 4  ;;  %v4868_v42 = vadd.f32 %v4867_v15, %v4837_v28  ;;  %s6122_s8 = scalar_lea.vmem %s4906_s30, 32  ;;  %p6129_p4 = scmp.lt.s32.totalorder %s4906_s30, %s4906_s30 }
 0x248   : > { %p6123_p5 = scmp.ne.s32.totalorder %s4906_s30, %s6122_s8  ;;  %p6130_p7 = scmp.lt.s32.totalorder %s6122_s8, %s6122_s8 }
 0x249   : > { %v4798_v3 = vadd.f32 %v4797_v62, %v4796_v57  ;;  %v4869_v26 = vrot.slane %v4868_v42, 4 }
 0x24a   : > { %p6124_p1 = pnand %p6123_p5, %p83_p2  ;;  %p6131_p8 = por %p6130_p7, %p6129_p4 }
 0x24b   : > { %v4799_v5 = vrot.slane %v4798_v3, 2  ;;  %v4870_v19 = vadd.f32 %v4869_v26, %v4868_v42 }
 0x24c   : > { %p6125_p3 = pneg %p6124_p1 }
 0x24d   : > { %v4800_v34 = vadd.f32 %v4799_v5, %v4798_v3  ;;  %v4871_v47 = vrot.slane %v4870_v19, 2 }
 0x24e   : > { %p6132_p9 = pnand %p6131_p8, %p6125_p3 }
 0x24f   : > { %v4801_v11 = vrot.slane %v4800_v34, 1  ;;  %v4872_v45 = vadd.f32 %v4871_v47, %v4870_v19 }
 0x251   : > { %v4802_v6 = vadd.f32 %v4801_v11, %v4800_v34  ;;  %v4873_v9 = vrot.slane %v4872_v45, 1 }
 0x253   : > { %v4803_v7 = vadd.f32 %v4802_v6, %v4765_v12  ;;  %v4874_v4 = vadd.f32 %v4873_v9, %v4872_v45 }
 0x255   : > { %4804 = vst [vmem:[#allocation4] sm:$0x1] %v4803_v7  ;;  %v4875_v53 = vadd.f32 %v4874_v4, %v4805_v33 }
 0x257   : > { %4876 = vst [vmem:[#allocation4 + $0x1] sm:$0x1] %v4875_v53 }
 0x258   : > { %6135 = shalt.err (!%p6132_p9)
}
 0x259   : > { %6000 = dma.vmem_to_hbm [thread:$0]  (%p83_p2), %s4906_s30, 32, %s8850_s3, [#allocation5]  }
 0x25a   : > { %6163 = dma.done.wait (%p83_p2), [#allocation5], 32  }
 0x25b   : > { %6165 = vsyncadd (%p83_p2), [#allocation5], 4294967264 }
 0x25c PF: > { %p6010_p10 = scmp.ge.s32.totalorder %s6184_s15, 2  ;;  %s4921_s11 = sand.u32 1, %s6172_s12  }
 0x25d   : > { %s4922_s17 = scalar_lea.sflag [#allocation3], %s4921_s11 }
 0x25e   : > { %p6005_p11 = pnand %p6010_p10, %p6255_p6 }
 0x260   : > { %p6006_p12 = pneg %p6005_p11 }
 0x262   : > { %6167 = dma.done.wait (%p6006_p12), %s4922_s17, 4096  }
 0x263   : > { %6169 = vsyncadd (%p6006_p12), %s4922_s17, 4294963200  ;;  %p15_p13 = scmp.ge.s32.totalorder %s6236_s18, 4   ;;  %s9091_s12 = smov %s6176_s13 }
 0x264   : > { %s9092_s13 = smov %s6180_s14  ;;  %s9093_s14 = smov %s6247_s21 }
 0x265   : > { %s9094_s15 = smov %s6236_s18  ;;  %17 = sbr.rel (!%p15_p13) target bundleno = 4 (0x4), region = 85 }
 0x26a   :  { %4927 = vsyncpa [#allocation3], 1 }
 0x26b   :  { %4929 = vsyncpa [#allocation3 + $0x1], 1 }
 0x26c   :  { %4930 = vsyncpa [#allocation5], 1 }

</bundles_post_ra>
